<compile_context>
chip_gen: v7x
topology: tpu7x:2x2x1
jax: 0.10.0
libtpu: 0.0.40
codegen_flags: <defaults>
</compile_context>

<pallas_src>
import functools
import math

import numpy as np
import jax
import jax.numpy as jnp
from jax.experimental import pallas as pl
from jax.experimental.pallas import tpu as pltpu


# --------------------------------------------------------------------------
# Static (numpy) precompute: relative coords table, relative position index,
# shifted-window attention mask.  These depend only on static shapes.
# --------------------------------------------------------------------------
def _relative_coords_table_np(wh, ww):
    rch = np.arange(-(wh - 1), wh, dtype=np.float32)
    rcw = np.arange(-(ww - 1), ww, dtype=np.float32)
    table = np.stack(np.meshgrid(rch, rcw, indexing="ij"))          # (2, 2wh-1, 2ww-1)
    table = table.transpose(1, 2, 0)[None].copy()                   # (1, 2wh-1, 2ww-1, 2)
    table[..., 0] /= wh - 1
    table[..., 1] /= ww - 1
    table *= 8.0
    table = np.sign(table) * np.log2(np.abs(table) + 1.0) / 3.0
    return table.astype(np.float32)


def _relative_position_index_np(wh, ww):
    coords_h = np.arange(wh)
    coords_w = np.arange(ww)
    coords = np.stack(np.meshgrid(coords_h, coords_w, indexing="ij"))  # (2, wh, ww)
    flat = coords.reshape(2, -1)
    rel = flat[:, :, None] - flat[:, None, :]                          # (2, N, N)
    rel = rel.transpose(1, 2, 0).copy()
    rel[:, :, 0] += wh - 1
    rel[:, :, 1] += ww - 1
    rel[:, :, 0] *= 2 * ww - 1
    return rel.sum(-1).reshape(-1).astype(np.int32)                    # (N*N,)


def _build_attn_mask_np(pH, pW, wh, ww, sh, sw):
    img = np.zeros((pH, pW), dtype=np.float32)
    h_slices = (slice(0, pH - wh), slice(pH - wh, pH - sh), slice(pH - sh, pH))
    w_slices = (slice(0, pW - ww), slice(pW - ww, pW - sw), slice(pW - sw, pW))
    cnt = 0
    for hs in h_slices:
        for ws in w_slices:
            img[hs, ws] = cnt
            cnt += 1
    m = img.reshape(pH // wh, wh, pW // ww, ww).transpose(0, 2, 1, 3).reshape(-1, wh * ww)
    diff = m[:, None, :] - m[:, :, None]                               # (nW, N, N)
    return np.where(diff != 0, -100.0, 0.0).astype(np.float32)


# --------------------------------------------------------------------------
# Relative position bias via the continuous-position-bias MLP (plain JAX glue)
# --------------------------------------------------------------------------
def _relative_position_bias(params, window_size, num_heads):
    wh, ww = window_size
    N = wh * ww
    table = jnp.asarray(_relative_coords_table_np(wh, ww))             # (1, 2wh-1, 2ww-1, 2)
    idx = jnp.asarray(_relative_position_index_np(wh, ww))             # (N*N,)
    h1 = jnp.maximum(table @ params["cpb_w1"].T + params["cpb_b1"], 0.0)
    bias_table = (h1 @ params["cpb_w2"].T).reshape(-1, num_heads)      # ((2wh-1)(2ww-1), nh)
    rpb = bias_table[idx].reshape(N, N, num_heads).transpose(2, 0, 1)  # (nh, N, N)
    return 16.0 * jax.nn.sigmoid(rpb)


# --------------------------------------------------------------------------
# Shared glue: pad, cyclic shift, window partition, fused bias, scale
# --------------------------------------------------------------------------
def _prep(x, params, window_size, shift_size, num_heads):
    B, H, W, C = x.shape
    wh, ww = window_size
    pad_b = (wh - H % wh) % wh
    pad_r = (ww - W % ww) % ww
    xp = jnp.pad(x, ((0, 0), (0, pad_b), (0, pad_r), (0, 0)))
    pH, pW = H + pad_b, W + pad_r
    sh, sw = shift_size
    if wh >= pH:
        sh = 0
    if ww >= pW:
        sw = 0
    do_shift = (sh + sw) > 0
    if do_shift:
        xp = jnp.roll(xp, shift=(-sh, -sw), axis=(1, 2))
    nWh, nWw = pH // wh, pW // ww
    nW = nWh * nWw
    N = wh * ww
    xw = (xp.reshape(B, nWh, wh, nWw, ww, C)
            .transpose(0, 1, 3, 2, 4, 5)
            .reshape(B * nW, N, C))

    rpb = _relative_position_bias(params, window_size, num_heads)      # (nh, N, N)
    if do_shift:
        mask = jnp.asarray(_build_attn_mask_np(pH, pW, wh, ww, sh, sw))  # (nW, N, N)
        bias = rpb[None, :, :, :] + mask[:, None, :, :]                  # (nW, nh, N, N)
    else:
        bias = rpb[None, :, :, :]                                        # (1, nh, N, N)

    scale = jnp.exp(jnp.minimum(params["logit_scale"].reshape(num_heads),
                                math.log(100.0)))                        # (nh,)

    meta = dict(B=B, H=H, W=W, C=C, pH=pH, pW=pW, nWh=nWh, nWw=nWw,
                wh=wh, ww=ww, sh=sh, sw=sw, do_shift=do_shift, N=N, nW=nW)
    return xw, bias, scale, meta


def _unprep(out_w, meta):
    B, C = meta["B"], meta["C"]
    out = out_w.reshape(B, meta["nWh"], meta["nWw"], meta["wh"], meta["ww"], C)
    out = out.transpose(0, 1, 3, 2, 4, 5).reshape(B, meta["pH"], meta["pW"], C)
    if meta["do_shift"]:
        out = jnp.roll(out, shift=(meta["sh"], meta["sw"]), axis=(1, 2))
    return out[:, :meta["H"], :meta["W"], :]


# --------------------------------------------------------------------------
# Generation-aware tiling helpers / compiler params
# --------------------------------------------------------------------------
def _vmem_capacity_bytes():
    try:
        return int(pltpu.get_tpu_info().vmem_capacity_bytes)
    except Exception:
        return 64 * 1024 * 1024          # conservative (v7x) fallback


def _compiler_params(est_bytes):
    cap = _vmem_capacity_bytes()
    limit = int(min(int(0.85 * cap), max(32 * 1024 * 1024, int(est_bytes) + (8 << 20))))
    limit = max(limit, 16 * 1024 * 1024)
    return pltpu.CompilerParams(dimension_semantics=("parallel",),
                                vmem_limit_bytes=limit)


def _resident_spec(block_shape, index_map):
    """Grid-invariant operand: single VMEM buffer (no double-buffering) when supported."""
    try:
        return pl.BlockSpec(block_shape, index_map, pipeline_mode=pl.Buffered(1))
    except Exception:
        return pl.BlockSpec(block_shape, index_map)


def _row_tile(n_rows, target=256, cap=1024):
    cands = [t for t in range(8, min(n_rows, cap) + 1, 8) if n_rows % t == 0]
    if not cands:
        return n_rows

    def score(t):
        g = n_rows // t
        even = 1 if (g % 2 == 0 and g >= 2) else 0
        return (even, min(t, target), -t)

    return max(cands, key=score)


def _choose_window_batch(n_win, n_pos, batch, n_tok, dim, num_heads, do_shift,
                         target_rows=512):
    """Windows per grid step: keeps matmul rows near the target, fits the VMEM
    budget of the current generation, and prefers even grid extents (v7x)."""
    cands = sorted({d for d in range(1, n_pos + 1) if n_pos % d == 0}
                   | {n_pos * k for k in range(1, batch + 1) if batch % k == 0})
    budget = int(0.25 * _vmem_capacity_bytes())

    def step_bytes(w):
        io = w * n_tok * dim * (4 * 2 + 2 * 2)            # x f32 + out bf16, double-buffered
        inner = w * n_tok * dim * (12 + 8 + 2 + 4)         # qkv f32, q/k f32, v bf16, out f32
        logits = w * num_heads * n_tok * n_tok * (4 + 2)   # f32 logits + bf16 probs
        weights = 2 * dim * 3 * dim + 4 * 3 * dim
        nb = min(w, n_pos) if do_shift else 1
        return io + inner + logits + weights + 4 * nb * num_heads * n_tok * n_tok

    ok = [w for w in cands if step_bytes(w) <= budget] or cands[:1]

    def score(w):
        g = n_win // w
        rows = w * n_tok
        even = 1 if (g % 2 == 0 and g >= 2) else 0
        return (even, min(rows, target_rows), -rows)

    return max(ok, key=score)


# --------------------------------------------------------------------------
# In-kernel helpers (kept in f32: v5e has no bf16 VALU/EUP)
# --------------------------------------------------------------------------
def _layer_norm_f32(v, gamma, beta, eps=1e-5):
    mu = jnp.mean(v, axis=-1, keepdims=True)
    d = v - mu
    var = jnp.mean(d * d, axis=-1, keepdims=True)
    return d * jax.lax.rsqrt(var + eps) * gamma + beta


def _gelu_tanh(v):
    # TODO(synk): torch nn.GELU defaults to the exact erf form; the tanh
    # approximation (|diff| <= ~3e-3) is used to stay on guaranteed Mosaic ops.
    c = math.sqrt(2.0 / math.pi)
    return 0.5 * v * (1.0 + jnp.tanh(c * (v + 0.044715 * (v * v * v))))


# --------------------------------------------------------------------------
# Fused kernel: QKV projection + windowed cosine attention (lane-dense I/O)
# --------------------------------------------------------------------------
def _make_attention_kernel(wb, num_heads, n_tok, head_dim, dim, n_pos, bias_mode):
    def kernel(x_ref, wqkv_ref, bqkv_ref, bias_ref, scale_ref, o_ref):
        # fused QKV projection: (wb*N, C) x (C, 3C), bf16 operands / f32 accumulate
        x2 = x_ref[...].reshape(wb * n_tok, dim).astype(jnp.bfloat16)
        qkv = jnp.dot(x2, wqkv_ref[...], preferred_element_type=jnp.float32)
        qkv = qkv + bqkv_ref[...]

        scale = scale_ref[...]                             # (1, nh) f32
        qn_l, kn_l, v_l = [], [], []
        for h in range(num_heads):
            lo = h * head_dim
            hi = (h + 1) * head_dim
            qh = qkv[:, lo:hi].reshape(wb, 1, n_tok, head_dim)
            kh = qkv[:, dim + lo:dim + hi].reshape(wb, 1, n_tok, head_dim)
            vh = qkv[:, 2 * dim + lo:2 * dim + hi].reshape(wb, 1, n_tok, head_dim)
            # cosine attention: L2-normalize q/k in f32 (F.normalize eps=1e-12);
            # the clamped-exp per-head logit scale is folded into the q normalizer.
            q_inv = jax.lax.rsqrt(jnp.maximum(jnp.sum(qh * qh, axis=-1, keepdims=True), 1e-24))
            k_inv = jax.lax.rsqrt(jnp.maximum(jnp.sum(kh * kh, axis=-1, keepdims=True), 1e-24))
            qn_l.append(qh * (q_inv * scale[:, h:h + 1]))
            kn_l.append(kh * k_inv)
            v_l.append(vh.astype(jnp.bfloat16))
        qn = jnp.concatenate(qn_l, axis=1).reshape(wb * num_heads, n_tok, head_dim)
        kn = jnp.concatenate(kn_l, axis=1).reshape(wb * num_heads, n_tok, head_dim)
        v = jnp.concatenate(v_l, axis=1).reshape(wb * num_heads, n_tok, head_dim)

        # q.k cosine logits kept with f32 operands: the (<=x100) logit scale and the
        # exp amplify operand rounding, and this matmul is ~1% of the block's flops.
        logits = jnp.einsum("bqd,bkd->bqk", qn, kn, preferred_element_type=jnp.float32)
        logits = logits.reshape(wb, num_heads, n_tok, n_tok)
        if bias_mode == "wrap":
            # bias resident once per window position; broadcast in-kernel over images
            rep = wb // n_pos
            logits = (logits.reshape(rep, n_pos, num_heads, n_tok, n_tok)
                      + bias_ref[...]).reshape(wb, num_heads, n_tok, n_tok)
        else:
            # "tile": shapes match; "bcast": leading-1 bias broadcasts over windows
            logits = logits + bias_ref[...]
        logits = logits.reshape(wb * num_heads, n_tok, n_tok)

        logits = logits - jnp.max(logits, axis=-1, keepdims=True)
        p = jnp.exp(logits)
        p = p * pl.reciprocal(jnp.sum(p, axis=-1, keepdims=True), approx=True)

        out = jnp.einsum("bqk,bkd->bqd", p.astype(jnp.bfloat16), v,
                         preferred_element_type=jnp.float32)
        out = out.reshape(wb, num_heads, n_tok, head_dim)
        # merge heads back into lane-dense channels inside the kernel
        o_ref[...] = jnp.concatenate([out[:, h] for h in range(num_heads)],
                                     axis=-1).astype(o_ref.dtype)
    return kernel


# --------------------------------------------------------------------------
# Fused tail kernel: out-proj + LN1 + residual + MLP(GELU) + LN2 + residual
# --------------------------------------------------------------------------
def _tail_kernel(x_ref, a_ref, pw_ref, pb_ref, g1_ref, b1_ref, w1_ref, c1_ref,
                 w2_ref, c2_ref, g2_ref, b2_ref, o_ref):
    x = x_ref[...]                                        # f32 residual rows
    a = a_ref[...]                                        # bf16 pre-proj attention rows
    # attention output projection (bf16 operands, f32 accumulate)
    ao = jnp.dot(a, pw_ref[...], preferred_element_type=jnp.float32) + pb_ref[...]
    # SwinV2 post-norm residual.
    # TODO(synk): stochastic depth (training-time row dropout) treated as identity.
    y = x + _layer_norm_f32(ao, g1_ref[...], b1_ref[...])
    # MLP
    h = jnp.dot(y.astype(jnp.bfloat16), w1_ref[...],
                preferred_element_type=jnp.float32) + c1_ref[...]
    h = _gelu_tanh(h)
    m = jnp.dot(h.astype(jnp.bfloat16), w2_ref[...],
                preferred_element_type=jnp.float32) + c2_ref[...]
    o = y + _layer_norm_f32(m, g2_ref[...], b2_ref[...])
    o_ref[...] = o.astype(o_ref.dtype)


# --------------------------------------------------------------------------
# Wrappers
# --------------------------------------------------------------------------
def _shifted_window_attention_core(x, params, window_size, shift_size, num_heads):
    """Fused QKV + windowed cosine attention; returns the head-merged attention
    output (B, H, W, C) in bf16 *before* the output projection (fused in the tail)."""
    xw, bias, scale, meta = _prep(x, params, window_size, shift_size, num_heads)
    N, C = meta["N"], meta["C"]
    nW, B = meta["nW"], meta["B"]
    do_shift = meta["do_shift"]
    assert C % num_heads == 0
    hd = C // num_heads
    n_win = xw.shape[0]

    wb = _choose_window_batch(n_win, nW, B, N, C, num_heads, do_shift)
    assert n_win % wb == 0, (n_win, wb)
    assert (nW % wb == 0) or (wb % nW == 0), (wb, nW)   # bias index_map validity

    # fused relative-position bias + shift mask, per window position
    if not do_shift:
        bias_mode = "bcast"
        bias_block = (1, num_heads, N, N)
        bias_spec = _resident_spec(bias_block, lambda w: (0, 0, 0, 0))
    elif wb <= nW:
        bias_mode = "tile"
        nbb = nW // wb
        bias_block = (wb, num_heads, N, N)
        if nbb == 1:
            bias_spec = _resident_spec(bias_block, lambda w: (0, 0, 0, 0))
        else:
            bias_spec = pl.BlockSpec(bias_block, lambda w, _n=nbb: (w % _n, 0, 0, 0))
    else:
        bias_mode = "wrap"
        bias_block = (nW, num_heads, N, N)
        bias_spec = _resident_spec(bias_block, lambda w: (0, 0, 0, 0))

    wqkv = params["qkv_w"].T.astype(jnp.bfloat16)            # (C, 3C)
    bqkv = params["qkv_b"].reshape(1, 3 * C)                 # f32
    scale_row = scale.reshape(1, num_heads)                  # lane-dense (1, nh) f32

    kernel = _make_attention_kernel(wb, num_heads, N, hd, C, nW, bias_mode)

    est = (wb * N * C * 38 + wb * num_heads * N * N * 6
           + 2 * C * 3 * C + 4 * 3 * C + 4 * int(np.prod(bias_block)))

    o = pl.pallas_call(
        kernel,
        out_shape=jax.ShapeDtypeStruct((n_win, N, C), jnp.bfloat16),
        grid=(n_win // wb,),
        in_specs=[
            pl.BlockSpec((wb, N, C), lambda w: (w, 0, 0)),           # x windows
            _resident_spec((C, 3 * C), lambda w: (0, 0)),            # qkv weight (bf16)
            _resident_spec((1, 3 * C), lambda w: (0, 0)),            # qkv bias
            bias_spec,                                               # rel-pos bias + mask
            _resident_spec((1, num_heads), lambda w: (0, 0)),        # per-head logit scale
        ],
        out_specs=pl.BlockSpec((wb, N, C), lambda w: (w, 0, 0)),
        compiler_params=_compiler_params(est),
    )(xw, wqkv, bqkv, bias, scale_row)

    # un-window / un-shift (XLA layout plumbing on the bf16 result)
    return _unprep(o, meta)


def swin_block_forward_pallas(x, params, window_size, shift_size, num_heads):
    attn_pre = _shifted_window_attention_core(x, params, window_size, shift_size, num_heads)
    B, H, W, C = x.shape
    hidden = params["fc1_w"].shape[0]
    R = B * H * W
    tmc = _row_tile(R, target=256, cap=512)
    assert R % tmc == 0

    est = (tmc * C * (8 + 4 + 8) + tmc * hidden * 8 + tmc * C * 16
           + 2 * (C * C + 2 * C * hidden) + 4 * (5 * C + hidden))

    out = pl.pallas_call(
        _tail_kernel,
        out_shape=jax.ShapeDtypeStruct((R, C), x.dtype),
        grid=(R // tmc,),
        in_specs=[
            pl.BlockSpec((tmc, C), lambda i: (i, 0)),                # x rows (residual)
            pl.BlockSpec((tmc, C), lambda i: (i, 0)),                # attention rows (bf16)
            _resident_spec((C, C), lambda i: (0, 0)),                # proj weight (bf16)
            _resident_spec((1, C), lambda i: (0, 0)),                # proj bias
            _resident_spec((1, C), lambda i: (0, 0)),                # ln1 gamma
            _resident_spec((1, C), lambda i: (0, 0)),                # ln1 beta
            _resident_spec((C, hidden), lambda i: (0, 0)),           # fc1 weight (bf16)
            _resident_spec((1, hidden), lambda i: (0, 0)),           # fc1 bias
            _resident_spec((hidden, C), lambda i: (0, 0)),           # fc2 weight (bf16)
            _resident_spec((1, C), lambda i: (0, 0)),                # fc2 bias
            _resident_spec((1, C), lambda i: (0, 0)),                # ln2 gamma
            _resident_spec((1, C), lambda i: (0, 0)),                # ln2 beta
        ],
        out_specs=pl.BlockSpec((tmc, C), lambda i: (i, 0)),
        compiler_params=_compiler_params(est),
    )(x.reshape(R, C), attn_pre.reshape(R, C),
      params["proj_w"].T.astype(jnp.bfloat16), params["proj_b"].reshape(1, -1),
      params["ln1_w"].reshape(1, -1), params["ln1_b"].reshape(1, -1),
      params["fc1_w"].T.astype(jnp.bfloat16), params["fc1_b"].reshape(1, -1),
      params["fc2_w"].T.astype(jnp.bfloat16), params["fc2_b"].reshape(1, -1),
      params["ln2_w"].reshape(1, -1), params["ln2_b"].reshape(1, -1))
    return out.reshape(B, H, W, C)


# --------------------------------------------------------------------------
# Pure-JAX f32 reference (mirrors torchvision/birder SwinV2 block forward)
# --------------------------------------------------------------------------
def shifted_window_attention_reference(x, params, window_size, shift_size, num_heads):
    xw, bias, scale, meta = _prep(x, params, window_size, shift_size, num_heads)
    N, C = meta["N"], meta["C"]
    nW, B = meta["nW"], meta["B"]
    Bw = xw.shape[0]
    hd = C // num_heads

    qkv = xw @ params["qkv_w"].T + params["qkv_b"]
    qkv = qkv.reshape(Bw, N, 3, num_heads, hd).transpose(2, 0, 3, 1, 4)
    q, k, v = qkv[0], qkv[1], qkv[2]
    qn = q / jnp.maximum(jnp.linalg.norm(q, axis=-1, keepdims=True), 1e-12)
    kn = k / jnp.maximum(jnp.linalg.norm(k, axis=-1, keepdims=True), 1e-12)
    attn = jnp.einsum("bhqd,bhkd->bhqk", qn, kn)
    attn = attn * scale[None, :, None, None]
    attn = attn.reshape(B, nW, num_heads, N, N) + bias[None]
    attn = attn.reshape(Bw, num_heads, N, N)
    attn = jax.nn.softmax(attn, axis=-1)
    out = jnp.einsum("bhqk,bhkd->bhqd", attn, v)
    out = out.transpose(0, 2, 1, 3).reshape(Bw, N, C)
    out = out @ params["proj_w"].T + params["proj_b"]
    return _unprep(out, meta)


def swin_block_reference(x, params, window_size, shift_size, num_heads):
    a = shifted_window_attention_reference(x, params, window_size, shift_size, num_heads)
    y = x + _layer_norm_f32(a, params["ln1_w"], params["ln1_b"])
    h = _gelu_tanh(y @ params["fc1_w"].T + params["fc1_b"])
    m = h @ params["fc2_w"].T + params["fc2_b"]
    return y + _layer_norm_f32(m, params["ln2_w"], params["ln2_b"])


# --------------------------------------------------------------------------
# Deterministic parameter init (shapes per the module's __init__)
# --------------------------------------------------------------------------
def init_params(key, dim, num_heads, mlp_ratio):
    hidden = int(dim * mlp_ratio)
    ks = jax.random.split(key, 15)
    qkv_w = 0.02 * jax.random.normal(ks[0], (3 * dim, dim), jnp.float32)
    qkv_b = 0.02 * jax.random.normal(ks[1], (3 * dim,), jnp.float32)
    qkv_b = qkv_b.at[dim:2 * dim].set(0.0)  # k-bias zeroed (SwinV2 / __init__)
    proj_w = 0.02 * jax.random.normal(ks[2], (dim, dim), jnp.float32)
    proj_b = 0.02 * jax.random.normal(ks[3], (dim,), jnp.float32)
    cpb_w1 = 0.1 * jax.random.normal(ks[4], (512, 2), jnp.float32)
    cpb_b1 = 0.1 * jax.random.normal(ks[5], (512,), jnp.float32)
    cpb_w2 = 0.2 * jax.random.normal(ks[6], (num_heads, 512), jnp.float32)
    logit_scale = jnp.log(10.0 * jnp.ones((num_heads, 1, 1), jnp.float32))
    ln1_w = 1.0 + 0.05 * jax.random.normal(ks[7], (dim,), jnp.float32)
    ln1_b = 0.05 * jax.random.normal(ks[8], (dim,), jnp.float32)
    ln2_w = 1.0 + 0.05 * jax.random.normal(ks[9], (dim,), jnp.float32)
    ln2_b = 0.05 * jax.random.normal(ks[10], (dim,), jnp.float32)
    lim = math.sqrt(6.0 / (dim + hidden))                     # xavier_uniform
    fc1_w = jax.random.uniform(ks[11], (hidden, dim), jnp.float32, -lim, lim)
    fc1_b = 1e-6 * jax.random.normal(ks[12], (hidden,), jnp.float32)
    fc2_w = jax.random.uniform(ks[13], (dim, hidden), jnp.float32, -lim, lim)
    fc2_b = 1e-6 * jax.random.normal(ks[14], (dim,), jnp.float32)
    return dict(qkv_w=qkv_w, qkv_b=qkv_b, proj_w=proj_w, proj_b=proj_b,
                cpb_w1=cpb_w1, cpb_b1=cpb_b1, cpb_w2=cpb_w2,
                logit_scale=logit_scale,
                ln1_w=ln1_w, ln1_b=ln1_b, ln2_w=ln2_w, ln2_b=ln2_b,
                fc1_w=fc1_w, fc1_b=fc1_b, fc2_w=fc2_w, fc2_b=fc2_b)


if __name__ == "__main__":
    B, H, W, C = 2, 8, 8, 32
    num_heads = 4
    window_size = (4, 4)
    shift_size = (2, 2)
    mlp_ratio = 4.0

    key = jax.random.PRNGKey(0)
    k_x, k_p = jax.random.split(key)
    x = jax.random.normal(k_x, (B, H, W, C), jnp.float32)
    params = init_params(k_p, C, num_heads, mlp_ratio)

    fwd = jax.jit(functools.partial(
        swin_block_forward_pallas, window_size=window_size,
        shift_size=shift_size, num_heads=num_heads))
    out = jax.block_until_ready(fwd(x, params))

    ref = jax.block_until_ready(
        swin_block_reference(x, params, window_size, shift_size, num_heads))

    assert out.shape == (B, H, W, C), out.shape
    # Kernel uses bf16 MXU operands (f32 accumulation) vs the f32 reference, so
    # validate with a relative L2 criterion (bugs give >=3e-1; bf16 gives ~1e-2).
    rel_err = float(jnp.linalg.norm((out - ref).astype(jnp.float32))
                    / jnp.linalg.norm(ref.astype(jnp.float32)))
    if not (rel_err < 4e-2 and bool(jnp.all(jnp.isfinite(out)))):
        raise AssertionError(f"Pallas kernel mismatch vs reference: rel L2 err={rel_err:.4e}")
    print("KERNEL_OK")
</pallas_src>

<mosaic_0001>
module attributes {stable_mosaic.version = 11 : i64} {
  func.func @kernel(%arg0: i32, %arg1: memref<4x16x32xf32, #tpu.memory_space<vmem>>, %arg2: memref<32x96xbf16, #tpu.memory_space<vmem>>, %arg3: memref<1x96xf32, #tpu.memory_space<vmem>>, %arg4: memref<4x4x16x16xf32, #tpu.memory_space<vmem>>, %arg5: memref<1x4xf32, #tpu.memory_space<vmem>>, %arg6: memref<4x16x32xbf16, #tpu.memory_space<vmem>>) attributes {dimension_semantics = [#tpu.dimension_semantics<parallel>], iteration_bounds = array<i64: 2>, scalar_prefetch = 0 : i64, scratch_operands = 0 : i64, tpu.core_type = #tpu.core_type<tc>, window_params = [{transform_indices = @transform_0, window_bounds = array<i64: 4, 16, 32>}, {pipeline_mode = #tpu.pipeline_mode<synchronous>, transform_indices = @transform_1, window_bounds = array<i64: 32, 96>}, {pipeline_mode = #tpu.pipeline_mode<synchronous>, transform_indices = @transform_2, window_bounds = array<i64: 1, 96>}, {pipeline_mode = #tpu.pipeline_mode<synchronous>, transform_indices = @transform_3, window_bounds = array<i64: 4, 4, 16, 16>}, {pipeline_mode = #tpu.pipeline_mode<synchronous>, transform_indices = @transform_4, window_bounds = array<i64: 1, 4>}, {transform_indices = @transform_5, window_bounds = array<i64: 4, 16, 32>}]} {
    %c0 = arith.constant 0 : index
    %c0_0 = arith.constant 0 : index
    %c0_1 = arith.constant 0 : index
    %0 = vector.load %arg1[%c0, %c0_0, %c0_1] : memref<4x16x32xf32, #tpu.memory_space<vmem>>, vector<4x16x32xf32>
    %1 = vector.shape_cast %0 : vector<4x16x32xf32> to vector<64x32xf32>
    %2 = arith.truncf %1 : vector<64x32xf32> to vector<64x32xbf16>
    %c0_2 = arith.constant 0 : index
    %c0_3 = arith.constant 0 : index
    %3 = vector.load %arg2[%c0_2, %c0_3] : memref<32x96xbf16, #tpu.memory_space<vmem>>, vector<32x96xbf16>
    %cst = arith.constant dense<0.000000e+00> : vector<64x96xf32>
    %4 = tpu.matmul %2, %3, %cst {dimension_numbers = #tpu.dot_dimension_numbers<[1], [0], [0], [1], [0, 0, 1, 1], [], []>} : vector<64x32xbf16>, vector<32x96xbf16>, vector<64x96xf32> -> vector<64x96xf32>
    %c0_4 = arith.constant 0 : index
    %c0_5 = arith.constant 0 : index
    %5 = vector.load %arg3[%c0_4, %c0_5] : memref<1x96xf32, #tpu.memory_space<vmem>>, vector<1x96xf32>
    %6 = vector.broadcast %5 : vector<1x96xf32> to vector<64x96xf32>
    %7 = arith.addf %4, %6 : vector<64x96xf32>
    %c0_6 = arith.constant 0 : index
    %c0_7 = arith.constant 0 : index
    %8 = vector.load %arg5[%c0_6, %c0_7] : memref<1x4xf32, #tpu.memory_space<vmem>>, vector<1x4xf32>
    %9 = vector.extract_strided_slice %7 {offsets = [0, 0], sizes = [64, 8], strides = [1, 1]} : vector<64x96xf32> to vector<64x8xf32>
    %10 = vector.shape_cast %9 : vector<64x8xf32> to vector<4x1x16x8xf32>
    %11 = vector.extract_strided_slice %7 {offsets = [0, 32], sizes = [64, 8], strides = [1, 1]} : vector<64x96xf32> to vector<64x8xf32>
    %12 = vector.shape_cast %11 : vector<64x8xf32> to vector<4x1x16x8xf32>
    %13 = vector.extract_strided_slice %7 {offsets = [0, 64], sizes = [64, 8], strides = [1, 1]} : vector<64x96xf32> to vector<64x8xf32>
    %14 = vector.shape_cast %13 : vector<64x8xf32> to vector<4x1x16x8xf32>
    %15 = arith.mulf %10, %10 : vector<4x1x16x8xf32>
    %cst_8 = arith.constant dense<0.000000e+00> : vector<4x1x16xf32>
    %16 = vector.multi_reduction <add>, %15, %cst_8 [3] : vector<4x1x16x8xf32> to vector<4x1x16xf32>
    %17 = vector.shape_cast %16 : vector<4x1x16xf32> to vector<4x1x16x1xf32>
    %cst_9 = arith.constant 1.000000e-24 : f32
    %18 = vector.broadcast %cst_9 : f32 to vector<4x1x16x1xf32>
    %19 = arith.maximumf %17, %18 : vector<4x1x16x1xf32>
    %20 = math.rsqrt %19 : vector<4x1x16x1xf32>
    %21 = arith.mulf %12, %12 : vector<4x1x16x8xf32>
    %cst_10 = arith.constant dense<0.000000e+00> : vector<4x1x16xf32>
    %22 = vector.multi_reduction <add>, %21, %cst_10 [3] : vector<4x1x16x8xf32> to vector<4x1x16xf32>
    %23 = vector.shape_cast %22 : vector<4x1x16xf32> to vector<4x1x16x1xf32>
    %cst_11 = arith.constant 1.000000e-24 : f32
    %24 = vector.broadcast %cst_11 : f32 to vector<4x1x16x1xf32>
    %25 = arith.maximumf %23, %24 : vector<4x1x16x1xf32>
    %26 = math.rsqrt %25 : vector<4x1x16x1xf32>
    %27 = vector.extract_strided_slice %8 {offsets = [0, 0], sizes = [1, 1], strides = [1, 1]} : vector<1x4xf32> to vector<1x1xf32>
    %28 = vector.shape_cast %27 : vector<1x1xf32> to vector<1x1x1x1xf32>
    %29 = vector.broadcast %28 : vector<1x1x1x1xf32> to vector<4x1x16x1xf32>
    %30 = arith.mulf %20, %29 : vector<4x1x16x1xf32>
    %31 = vector.broadcast %30 : vector<4x1x16x1xf32> to vector<4x1x16x8xf32>
    %32 = arith.mulf %10, %31 : vector<4x1x16x8xf32>
    %33 = vector.broadcast %26 : vector<4x1x16x1xf32> to vector<4x1x16x8xf32>
    %34 = arith.mulf %12, %33 : vector<4x1x16x8xf32>
    %35 = arith.truncf %14 : vector<4x1x16x8xf32> to vector<4x1x16x8xbf16>
    %36 = vector.extract_strided_slice %7 {offsets = [0, 8], sizes = [64, 8], strides = [1, 1]} : vector<64x96xf32> to vector<64x8xf32>
    %37 = vector.shape_cast %36 : vector<64x8xf32> to vector<4x1x16x8xf32>
    %38 = vector.extract_strided_slice %7 {offsets = [0, 40], sizes = [64, 8], strides = [1, 1]} : vector<64x96xf32> to vector<64x8xf32>
    %39 = vector.shape_cast %38 : vector<64x8xf32> to vector<4x1x16x8xf32>
    %40 = vector.extract_strided_slice %7 {offsets = [0, 72], sizes = [64, 8], strides = [1, 1]} : vector<64x96xf32> to vector<64x8xf32>
    %41 = vector.shape_cast %40 : vector<64x8xf32> to vector<4x1x16x8xf32>
    %42 = arith.mulf %37, %37 : vector<4x1x16x8xf32>
    %cst_12 = arith.constant dense<0.000000e+00> : vector<4x1x16xf32>
    %43 = vector.multi_reduction <add>, %42, %cst_12 [3] : vector<4x1x16x8xf32> to vector<4x1x16xf32>
    %44 = vector.shape_cast %43 : vector<4x1x16xf32> to vector<4x1x16x1xf32>
    %cst_13 = arith.constant 1.000000e-24 : f32
    %45 = vector.broadcast %cst_13 : f32 to vector<4x1x16x1xf32>
    %46 = arith.maximumf %44, %45 : vector<4x1x16x1xf32>
    %47 = math.rsqrt %46 : vector<4x1x16x1xf32>
    %48 = arith.mulf %39, %39 : vector<4x1x16x8xf32>
    %cst_14 = arith.constant dense<0.000000e+00> : vector<4x1x16xf32>
    %49 = vector.multi_reduction <add>, %48, %cst_14 [3] : vector<4x1x16x8xf32> to vector<4x1x16xf32>
    %50 = vector.shape_cast %49 : vector<4x1x16xf32> to vector<4x1x16x1xf32>
    %cst_15 = arith.constant 1.000000e-24 : f32
    %51 = vector.broadcast %cst_15 : f32 to vector<4x1x16x1xf32>
    %52 = arith.maximumf %50, %51 : vector<4x1x16x1xf32>
    %53 = math.rsqrt %52 : vector<4x1x16x1xf32>
    %54 = vector.extract_strided_slice %8 {offsets = [0, 1], sizes = [1, 1], strides = [1, 1]} : vector<1x4xf32> to vector<1x1xf32>
    %55 = vector.shape_cast %54 : vector<1x1xf32> to vector<1x1x1x1xf32>
    %56 = vector.broadcast %55 : vector<1x1x1x1xf32> to vector<4x1x16x1xf32>
    %57 = arith.mulf %47, %56 : vector<4x1x16x1xf32>
    %58 = vector.broadcast %57 : vector<4x1x16x1xf32> to vector<4x1x16x8xf32>
    %59 = arith.mulf %37, %58 : vector<4x1x16x8xf32>
    %60 = vector.broadcast %53 : vector<4x1x16x1xf32> to vector<4x1x16x8xf32>
    %61 = arith.mulf %39, %60 : vector<4x1x16x8xf32>
    %62 = arith.truncf %41 : vector<4x1x16x8xf32> to vector<4x1x16x8xbf16>
    %63 = vector.extract_strided_slice %7 {offsets = [0, 16], sizes = [64, 8], strides = [1, 1]} : vector<64x96xf32> to vector<64x8xf32>
    %64 = vector.shape_cast %63 : vector<64x8xf32> to vector<4x1x16x8xf32>
    %65 = vector.extract_strided_slice %7 {offsets = [0, 48], sizes = [64, 8], strides = [1, 1]} : vector<64x96xf32> to vector<64x8xf32>
    %66 = vector.shape_cast %65 : vector<64x8xf32> to vector<4x1x16x8xf32>
    %67 = vector.extract_strided_slice %7 {offsets = [0, 80], sizes = [64, 8], strides = [1, 1]} : vector<64x96xf32> to vector<64x8xf32>
    %68 = vector.shape_cast %67 : vector<64x8xf32> to vector<4x1x16x8xf32>
    %69 = arith.mulf %64, %64 : vector<4x1x16x8xf32>
    %cst_16 = arith.constant dense<0.000000e+00> : vector<4x1x16xf32>
    %70 = vector.multi_reduction <add>, %69, %cst_16 [3] : vector<4x1x16x8xf32> to vector<4x1x16xf32>
    %71 = vector.shape_cast %70 : vector<4x1x16xf32> to vector<4x1x16x1xf32>
    %cst_17 = arith.constant 1.000000e-24 : f32
    %72 = vector.broadcast %cst_17 : f32 to vector<4x1x16x1xf32>
    %73 = arith.maximumf %71, %72 : vector<4x1x16x1xf32>
    %74 = math.rsqrt %73 : vector<4x1x16x1xf32>
    %75 = arith.mulf %66, %66 : vector<4x1x16x8xf32>
    %cst_18 = arith.constant dense<0.000000e+00> : vector<4x1x16xf32>
    %76 = vector.multi_reduction <add>, %75, %cst_18 [3] : vector<4x1x16x8xf32> to vector<4x1x16xf32>
    %77 = vector.shape_cast %76 : vector<4x1x16xf32> to vector<4x1x16x1xf32>
    %cst_19 = arith.constant 1.000000e-24 : f32
    %78 = vector.broadcast %cst_19 : f32 to vector<4x1x16x1xf32>
    %79 = arith.maximumf %77, %78 : vector<4x1x16x1xf32>
    %80 = math.rsqrt %79 : vector<4x1x16x1xf32>
    %81 = vector.extract_strided_slice %8 {offsets = [0, 2], sizes = [1, 1], strides = [1, 1]} : vector<1x4xf32> to vector<1x1xf32>
    %82 = vector.shape_cast %81 : vector<1x1xf32> to vector<1x1x1x1xf32>
    %83 = vector.broadcast %82 : vector<1x1x1x1xf32> to vector<4x1x16x1xf32>
    %84 = arith.mulf %74, %83 : vector<4x1x16x1xf32>
    %85 = vector.broadcast %84 : vector<4x1x16x1xf32> to vector<4x1x16x8xf32>
    %86 = arith.mulf %64, %85 : vector<4x1x16x8xf32>
    %87 = vector.broadcast %80 : vector<4x1x16x1xf32> to vector<4x1x16x8xf32>
    %88 = arith.mulf %66, %87 : vector<4x1x16x8xf32>
    %89 = arith.truncf %68 : vector<4x1x16x8xf32> to vector<4x1x16x8xbf16>
    %90 = vector.extract_strided_slice %7 {offsets = [0, 24], sizes = [64, 8], strides = [1, 1]} : vector<64x96xf32> to vector<64x8xf32>
    %91 = vector.shape_cast %90 : vector<64x8xf32> to vector<4x1x16x8xf32>
    %92 = vector.extract_strided_slice %7 {offsets = [0, 56], sizes = [64, 8], strides = [1, 1]} : vector<64x96xf32> to vector<64x8xf32>
    %93 = vector.shape_cast %92 : vector<64x8xf32> to vector<4x1x16x8xf32>
    %94 = vector.extract_strided_slice %7 {offsets = [0, 88], sizes = [64, 8], strides = [1, 1]} : vector<64x96xf32> to vector<64x8xf32>
    %95 = vector.shape_cast %94 : vector<64x8xf32> to vector<4x1x16x8xf32>
    %96 = arith.mulf %91, %91 : vector<4x1x16x8xf32>
    %cst_20 = arith.constant dense<0.000000e+00> : vector<4x1x16xf32>
    %97 = vector.multi_reduction <add>, %96, %cst_20 [3] : vector<4x1x16x8xf32> to vector<4x1x16xf32>
    %98 = vector.shape_cast %97 : vector<4x1x16xf32> to vector<4x1x16x1xf32>
    %cst_21 = arith.constant 1.000000e-24 : f32
    %99 = vector.broadcast %cst_21 : f32 to vector<4x1x16x1xf32>
    %100 = arith.maximumf %98, %99 : vector<4x1x16x1xf32>
    %101 = math.rsqrt %100 : vector<4x1x16x1xf32>
    %102 = arith.mulf %93, %93 : vector<4x1x16x8xf32>
    %cst_22 = arith.constant dense<0.000000e+00> : vector<4x1x16xf32>
    %103 = vector.multi_reduction <add>, %102, %cst_22 [3] : vector<4x1x16x8xf32> to vector<4x1x16xf32>
    %104 = vector.shape_cast %103 : vector<4x1x16xf32> to vector<4x1x16x1xf32>
    %cst_23 = arith.constant 1.000000e-24 : f32
    %105 = vector.broadcast %cst_23 : f32 to vector<4x1x16x1xf32>
    %106 = arith.maximumf %104, %105 : vector<4x1x16x1xf32>
    %107 = math.rsqrt %106 : vector<4x1x16x1xf32>
    %108 = vector.extract_strided_slice %8 {offsets = [0, 3], sizes = [1, 1], strides = [1, 1]} : vector<1x4xf32> to vector<1x1xf32>
    %109 = vector.shape_cast %108 : vector<1x1xf32> to vector<1x1x1x1xf32>
    %110 = vector.broadcast %109 : vector<1x1x1x1xf32> to vector<4x1x16x1xf32>
    %111 = arith.mulf %101, %110 : vector<4x1x16x1xf32>
    %112 = vector.broadcast %111 : vector<4x1x16x1xf32> to vector<4x1x16x8xf32>
    %113 = arith.mulf %91, %112 : vector<4x1x16x8xf32>
    %114 = vector.broadcast %107 : vector<4x1x16x1xf32> to vector<4x1x16x8xf32>
    %115 = arith.mulf %93, %114 : vector<4x1x16x8xf32>
    %116 = arith.truncf %95 : vector<4x1x16x8xf32> to vector<4x1x16x8xbf16>
    %117 = tpu.concatenate %32, %59, %86, %113 in 1 : vector<4x1x16x8xf32>, vector<4x1x16x8xf32>, vector<4x1x16x8xf32>, vector<4x1x16x8xf32> -> vector<4x4x16x8xf32>
    %118 = vector.shape_cast %117 : vector<4x4x16x8xf32> to vector<16x16x8xf32>
    %119 = tpu.concatenate %34, %61, %88, %115 in 1 : vector<4x1x16x8xf32>, vector<4x1x16x8xf32>, vector<4x1x16x8xf32>, vector<4x1x16x8xf32> -> vector<4x4x16x8xf32>
    %120 = vector.shape_cast %119 : vector<4x4x16x8xf32> to vector<16x16x8xf32>
    %121 = tpu.concatenate %35, %62, %89, %116 in 1 : vector<4x1x16x8xbf16>, vector<4x1x16x8xbf16>, vector<4x1x16x8xbf16>, vector<4x1x16x8xbf16> -> vector<4x4x16x8xbf16>
    %122 = vector.shape_cast %121 : vector<4x4x16x8xbf16> to vector<16x16x8xbf16>
    "tpu.trace_start"() <{level = 10 : i32, message = "bqd,bkd->bqk"}> : () -> ()
    %cst_24 = arith.constant dense<0.000000e+00> : vector<16x16x16xf32>
    %123 = tpu.matmul %118, %120, %cst_24 {dimension_numbers = #tpu.dot_dimension_numbers<[2], [2], [1], [1], [0, 0, 0, 1, 1, 1], [0], [0]>} : vector<16x16x8xf32>, vector<16x16x8xf32>, vector<16x16x16xf32> -> vector<16x16x16xf32>
    "tpu.trace_stop"() : () -> ()
    %124 = vector.shape_cast %123 : vector<16x16x16xf32> to vector<4x4x16x16xf32>
    %c0_25 = arith.constant 0 : index
    %c0_26 = arith.constant 0 : index
    %c0_27 = arith.constant 0 : index
    %c0_28 = arith.constant 0 : index
    %125 = vector.load %arg4[%c0_25, %c0_26, %c0_27, %c0_28] : memref<4x4x16x16xf32, #tpu.memory_space<vmem>>, vector<4x4x16x16xf32>
    %126 = arith.addf %124, %125 : vector<4x4x16x16xf32>
    %127 = vector.shape_cast %126 : vector<4x4x16x16xf32> to vector<16x16x16xf32>
    %cst_29 = arith.constant dense<0xFF800000> : vector<16x16xf32>
    %128 = vector.multi_reduction <maximumf>, %127, %cst_29 [2] : vector<16x16x16xf32> to vector<16x16xf32>
    %129 = vector.shape_cast %128 : vector<16x16xf32> to vector<16x16x1xf32>
    %130 = vector.broadcast %129 : vector<16x16x1xf32> to vector<16x16x16xf32>
    %131 = arith.subf %127, %130 : vector<16x16x16xf32>
    %132 = math.exp %131 : vector<16x16x16xf32>
    %cst_30 = arith.constant dense<0.000000e+00> : vector<16x16xf32>
    %133 = vector.multi_reduction <add>, %132, %cst_30 [2] : vector<16x16x16xf32> to vector<16x16xf32>
    %134 = vector.shape_cast %133 : vector<16x16xf32> to vector<16x16x1xf32>
    %135 = tpu.reciprocal %134 {approx = true} : vector<16x16x1xf32> -> vector<16x16x1xf32>
    %136 = vector.broadcast %135 : vector<16x16x1xf32> to vector<16x16x16xf32>
    %137 = arith.mulf %132, %136 : vector<16x16x16xf32>
    %138 = arith.truncf %137 : vector<16x16x16xf32> to vector<16x16x16xbf16>
    "tpu.trace_start"() <{level = 10 : i32, message = "bqk,bkd->bqd"}> : () -> ()
    %cst_31 = arith.constant dense<0.000000e+00> : vector<16x16x8xf32>
    %139 = tpu.matmul %138, %122, %cst_31 {dimension_numbers = #tpu.dot_dimension_numbers<[2], [1], [1], [2], [0, 0, 0, 1, 1, 2], [0], [0]>} : vector<16x16x16xbf16>, vector<16x16x8xbf16>, vector<16x16x8xf32> -> vector<16x16x8xf32>
    "tpu.trace_stop"() : () -> ()
    %140 = vector.shape_cast %139 : vector<16x16x8xf32> to vector<4x4x16x8xf32>
    %141 = vector.extract_strided_slice %140 {offsets = [0, 0, 0, 0], sizes = [4, 1, 16, 8], strides = [1, 1, 1, 1]} : vector<4x4x16x8xf32> to vector<4x1x16x8xf32>
    %142 = vector.shape_cast %141 : vector<4x1x16x8xf32> to vector<4x16x8xf32>
    %143 = vector.extract_strided_slice %140 {offsets = [0, 1, 0, 0], sizes = [4, 1, 16, 8], strides = [1, 1, 1, 1]} : vector<4x4x16x8xf32> to vector<4x1x16x8xf32>
    %144 = vector.shape_cast %143 : vector<4x1x16x8xf32> to vector<4x16x8xf32>
    %145 = vector.extract_strided_slice %140 {offsets = [0, 2, 0, 0], sizes = [4, 1, 16, 8], strides = [1, 1, 1, 1]} : vector<4x4x16x8xf32> to vector<4x1x16x8xf32>
    %146 = vector.shape_cast %145 : vector<4x1x16x8xf32> to vector<4x16x8xf32>
    %147 = vector.extract_strided_slice %140 {offsets = [0, 3, 0, 0], sizes = [4, 1, 16, 8], strides = [1, 1, 1, 1]} : vector<4x4x16x8xf32> to vector<4x1x16x8xf32>
    %148 = vector.shape_cast %147 : vector<4x1x16x8xf32> to vector<4x16x8xf32>
    %149 = tpu.concatenate %142, %144, %146, %148 in 2 : vector<4x16x8xf32>, vector<4x16x8xf32>, vector<4x16x8xf32>, vector<4x16x8xf32> -> vector<4x16x32xf32>
    %150 = arith.truncf %149 : vector<4x16x32xf32> to vector<4x16x32xbf16>
    %c0_32 = arith.constant 0 : index
    %c0_33 = arith.constant 0 : index
    %c0_34 = arith.constant 0 : index
    %151 = vector.load %arg6[%c0_32, %c0_33, %c0_34] : memref<4x16x32xbf16, #tpu.memory_space<vmem>>, vector<4x16x32xbf16>
    tpu.vector_store %arg6[%c0_32, %c0_33, %c0_34], %150 {strides = array<i32>} : memref<4x16x32xbf16, #tpu.memory_space<vmem>>, vector<4x16x32xbf16>,
    return
  }
  func.func @transform_0(%arg0: i32) -> (i32, i32, i32) {
    %c0_i32 = arith.constant 0 : i32
    %c0_i32_0 = arith.constant 0 : i32
    %c0_i32_1 = arith.constant 0 : i32
    return %arg0, %c0_i32, %c0_i32_0 : i32, i32, i32
  }
  func.func @transform_1(%arg0: i32) -> (i32, i32) {
    %c0_i32 = arith.constant 0 : i32
    %c0_i32_0 = arith.constant 0 : i32
    %c0_i32_1 = arith.constant 0 : i32
    return %c0_i32, %c0_i32_0 : i32, i32
  }
  func.func @transform_2(%arg0: i32) -> (i32, i32) {
    %c0_i32 = arith.constant 0 : i32
    %c0_i32_0 = arith.constant 0 : i32
    %c0_i32_1 = arith.constant 0 : i32
    return %c0_i32, %c0_i32_0 : i32, i32
  }
  func.func @transform_3(%arg0: i32) -> (i32, i32, i32, i32) {
    %c0_i32 = arith.constant 0 : i32
    %c0_i32_0 = arith.constant 0 : i32
    %c0_i32_1 = arith.constant 0 : i32
    %c0_i32_2 = arith.constant 0 : i32
    %c0_i32_3 = arith.constant 0 : i32
    return %c0_i32, %c0_i32_0, %c0_i32_1, %c0_i32_2 : i32, i32, i32, i32
  }
  func.func @transform_4(%arg0: i32) -> (i32, i32) {
    %c0_i32 = arith.constant 0 : i32
    %c0_i32_0 = arith.constant 0 : i32
    %c0_i32_1 = arith.constant 0 : i32
    return %c0_i32, %c0_i32_0 : i32, i32
  }
  func.func @transform_5(%arg0: i32) -> (i32, i32, i32) {
    %c0_i32 = arith.constant 0 : i32
    %c0_i32_0 = arith.constant 0 : i32
    %c0_i32_1 = arith.constant 0 : i32
    return %arg0, %c0_i32, %c0_i32_0 : i32, i32, i32
  }
}

module attributes {stable_mosaic.version = 11 : i64} {
  func.func @_tail_kernel(%arg0: i32, %arg1: memref<64x32xf32, #tpu.memory_space<vmem>>, %arg2: memref<64x32xbf16, #tpu.memory_space<vmem>>, %arg3: memref<32x32xbf16, #tpu.memory_space<vmem>>, %arg4: memref<1x32xf32, #tpu.memory_space<vmem>>, %arg5: memref<1x32xf32, #tpu.memory_space<vmem>>, %arg6: memref<1x32xf32, #tpu.memory_space<vmem>>, %arg7: memref<32x128xbf16, #tpu.memory_space<vmem>>, %arg8: memref<1x128xf32, #tpu.memory_space<vmem>>, %arg9: memref<128x32xbf16, #tpu.memory_space<vmem>>, %arg10: memref<1x32xf32, #tpu.memory_space<vmem>>, %arg11: memref<1x32xf32, #tpu.memory_space<vmem>>, %arg12: memref<1x32xf32, #tpu.memory_space<vmem>>, %arg13: memref<64x32xf32, #tpu.memory_space<vmem>>) attributes {dimension_semantics = [#tpu.dimension_semantics<parallel>], iteration_bounds = array<i64: 2>, scalar_prefetch = 0 : i64, scratch_operands = 0 : i64, tpu.core_type = #tpu.core_type<tc>, window_params = [{transform_indices = @transform_0, window_bounds = array<i64: 64, 32>}, {transform_indices = @transform_1, window_bounds = array<i64: 64, 32>}, {pipeline_mode = #tpu.pipeline_mode<synchronous>, transform_indices = @transform_2, window_bounds = array<i64: 32, 32>}, {pipeline_mode = #tpu.pipeline_mode<synchronous>, transform_indices = @transform_3, window_bounds = array<i64: 1, 32>}, {pipeline_mode = #tpu.pipeline_mode<synchronous>, transform_indices = @transform_4, window_bounds = array<i64: 1, 32>}, {pipeline_mode = #tpu.pipeline_mode<synchronous>, transform_indices = @transform_5, window_bounds = array<i64: 1, 32>}, {pipeline_mode = #tpu.pipeline_mode<synchronous>, transform_indices = @transform_6, window_bounds = array<i64: 32, 128>}, {pipeline_mode = #tpu.pipeline_mode<synchronous>, transform_indices = @transform_7, window_bounds = array<i64: 1, 128>}, {pipeline_mode = #tpu.pipeline_mode<synchronous>, transform_indices = @transform_8, window_bounds = array<i64: 128, 32>}, {pipeline_mode = #tpu.pipeline_mode<synchronous>, transform_indices = @transform_9, window_bounds = array<i64: 1, 32>}, {pipeline_mode = #tpu.pipeline_mode<synchronous>, transform_indices = @transform_10, window_bounds = array<i64: 1, 32>}, {pipeline_mode = #tpu.pipeline_mode<synchronous>, transform_indices = @transform_11, window_bounds = array<i64: 1, 32>}, {transform_indices = @transform_12, window_bounds = array<i64: 64, 32>}]} {
    %c0 = arith.constant 0 : index
    %c0_0 = arith.constant 0 : index
    %0 = vector.load %arg1[%c0, %c0_0] : memref<64x32xf32, #tpu.memory_space<vmem>>, vector<64x32xf32>
    %c0_1 = arith.constant 0 : index
    %c0_2 = arith.constant 0 : index
    %1 = vector.load %arg2[%c0_1, %c0_2] : memref<64x32xbf16, #tpu.memory_space<vmem>>, vector<64x32xbf16>
    %c0_3 = arith.constant 0 : index
    %c0_4 = arith.constant 0 : index
    %2 = vector.load %arg3[%c0_3, %c0_4] : memref<32x32xbf16, #tpu.memory_space<vmem>>, vector<32x32xbf16>
    %cst = arith.constant dense<0.000000e+00> : vector<64x32xf32>
    %3 = tpu.matmul %1, %2, %cst {dimension_numbers = #tpu.dot_dimension_numbers<[1], [0], [0], [1], [0, 0, 1, 1], [], []>} : vector<64x32xbf16>, vector<32x32xbf16>, vector<64x32xf32> -> vector<64x32xf32>
    %c0_5 = arith.constant 0 : index
    %c0_6 = arith.constant 0 : index
    %4 = vector.load %arg4[%c0_5, %c0_6] : memref<1x32xf32, #tpu.memory_space<vmem>>, vector<1x32xf32>
    %5 = vector.broadcast %4 : vector<1x32xf32> to vector<64x32xf32>
    %6 = arith.addf %3, %5 : vector<64x32xf32>
    %c0_7 = arith.constant 0 : index
    %c0_8 = arith.constant 0 : index
    %7 = vector.load %arg5[%c0_7, %c0_8] : memref<1x32xf32, #tpu.memory_space<vmem>>, vector<1x32xf32>
    %c0_9 = arith.constant 0 : index
    %c0_10 = arith.constant 0 : index
    %8 = vector.load %arg6[%c0_9, %c0_10] : memref<1x32xf32, #tpu.memory_space<vmem>>, vector<1x32xf32>
    %cst_11 = arith.constant dense<0.000000e+00> : vector<64xf32>
    %9 = vector.multi_reduction <add>, %6, %cst_11 [1] : vector<64x32xf32> to vector<64xf32>
    %10 = vector.shape_cast %9 : vector<64xf32> to vector<64x1xf32>
    %cst_12 = arith.constant 3.200000e+01 : f32
    %11 = vector.broadcast %cst_12 : f32 to vector<64x1xf32>
    %12 = arith.divf %10, %11 : vector<64x1xf32>
    %13 = vector.broadcast %12 : vector<64x1xf32> to vector<64x32xf32>
    %14 = arith.subf %6, %13 : vector<64x32xf32>
    %15 = arith.mulf %14, %14 : vector<64x32xf32>
    %cst_13 = arith.constant dense<0.000000e+00> : vector<64xf32>
    %16 = vector.multi_reduction <add>, %15, %cst_13 [1] : vector<64x32xf32> to vector<64xf32>
    %17 = vector.shape_cast %16 : vector<64xf32> to vector<64x1xf32>
    %cst_14 = arith.constant 3.200000e+01 : f32
    %18 = vector.broadcast %cst_14 : f32 to vector<64x1xf32>
    %19 = arith.divf %17, %18 : vector<64x1xf32>
    %cst_15 = arith.constant 9.99999974E-6 : f32
    %20 = vector.broadcast %cst_15 : f32 to vector<64x1xf32>
    %21 = arith.addf %19, %20 : vector<64x1xf32>
    %22 = math.rsqrt %21 : vector<64x1xf32>
    %23 = vector.broadcast %22 : vector<64x1xf32> to vector<64x32xf32>
    %24 = arith.mulf %14, %23 : vector<64x32xf32>
    %25 = vector.broadcast %7 : vector<1x32xf32> to vector<64x32xf32>
    %26 = arith.mulf %24, %25 : vector<64x32xf32>
    %27 = vector.broadcast %8 : vector<1x32xf32> to vector<64x32xf32>
    %28 = arith.addf %26, %27 : vector<64x32xf32>
    %29 = arith.addf %0, %28 : vector<64x32xf32>
    %30 = arith.truncf %29 : vector<64x32xf32> to vector<64x32xbf16>
    %c0_16 = arith.constant 0 : index
    %c0_17 = arith.constant 0 : index
    %31 = vector.load %arg7[%c0_16, %c0_17] : memref<32x128xbf16, #tpu.memory_space<vmem>>, vector<32x128xbf16>
    %cst_18 = arith.constant dense<0.000000e+00> : vector<64x128xf32>
    %32 = tpu.matmul %30, %31, %cst_18 {dimension_numbers = #tpu.dot_dimension_numbers<[1], [0], [0], [1], [0, 0, 1, 1], [], []>} : vector<64x32xbf16>, vector<32x128xbf16>, vector<64x128xf32> -> vector<64x128xf32>
    %c0_19 = arith.constant 0 : index
    %c0_20 = arith.constant 0 : index
    %33 = vector.load %arg8[%c0_19, %c0_20] : memref<1x128xf32, #tpu.memory_space<vmem>>, vector<1x128xf32>
    %34 = vector.broadcast %33 : vector<1x128xf32> to vector<64x128xf32>
    %35 = arith.addf %32, %34 : vector<64x128xf32>
    %cst_21 = arith.constant 5.000000e-01 : f32
    %36 = vector.broadcast %cst_21 : f32 to vector<64x128xf32>
    %37 = arith.mulf %36, %35 : vector<64x128xf32>
    %38 = arith.mulf %35, %35 : vector<64x128xf32>
    %39 = arith.mulf %38, %35 : vector<64x128xf32>
    %cst_22 = arith.constant 4.471500e-02 : f32
    %40 = vector.broadcast %cst_22 : f32 to vector<64x128xf32>
    %41 = arith.mulf %40, %39 : vector<64x128xf32>
    %42 = arith.addf %35, %41 : vector<64x128xf32>
    %cst_23 = arith.constant 0.797884583 : f32
    %43 = vector.broadcast %cst_23 : f32 to vector<64x128xf32>
    %44 = arith.mulf %43, %42 : vector<64x128xf32>
    %45 = math.tanh %44 : vector<64x128xf32>
    %cst_24 = arith.constant 1.000000e+00 : f32
    %46 = vector.broadcast %cst_24 : f32 to vector<64x128xf32>
    %47 = arith.addf %46, %45 : vector<64x128xf32>
    %48 = arith.mulf %37, %47 : vector<64x128xf32>
    %49 = arith.truncf %48 : vector<64x128xf32> to vector<64x128xbf16>
    %c0_25 = arith.constant 0 : index
    %c0_26 = arith.constant 0 : index
    %50 = vector.load %arg9[%c0_25, %c0_26] : memref<128x32xbf16, #tpu.memory_space<vmem>>, vector<128x32xbf16>
    %cst_27 = arith.constant dense<0.000000e+00> : vector<64x32xf32>
    %51 = tpu.matmul %49, %50, %cst_27 {dimension_numbers = #tpu.dot_dimension_numbers<[1], [0], [0], [1], [0, 0, 1, 1], [], []>} : vector<64x128xbf16>, vector<128x32xbf16>, vector<64x32xf32> -> vector<64x32xf32>
    %c0_28 = arith.constant 0 : index
    %c0_29 = arith.constant 0 : index
    %52 = vector.load %arg10[%c0_28, %c0_29] : memref<1x32xf32, #tpu.memory_space<vmem>>, vector<1x32xf32>
    %53 = vector.broadcast %52 : vector<1x32xf32> to vector<64x32xf32>
    %54 = arith.addf %51, %53 : vector<64x32xf32>
    %c0_30 = arith.constant 0 : index
    %c0_31 = arith.constant 0 : index
    %55 = vector.load %arg11[%c0_30, %c0_31] : memref<1x32xf32, #tpu.memory_space<vmem>>, vector<1x32xf32>
    %c0_32 = arith.constant 0 : index
    %c0_33 = arith.constant 0 : index
    %56 = vector.load %arg12[%c0_32, %c0_33] : memref<1x32xf32, #tpu.memory_space<vmem>>, vector<1x32xf32>
    %cst_34 = arith.constant dense<0.000000e+00> : vector<64xf32>
    %57 = vector.multi_reduction <add>, %54, %cst_34 [1] : vector<64x32xf32> to vector<64xf32>
    %58 = vector.shape_cast %57 : vector<64xf32> to vector<64x1xf32>
    %cst_35 = arith.constant 3.200000e+01 : f32
    %59 = vector.broadcast %cst_35 : f32 to vector<64x1xf32>
    %60 = arith.divf %58, %59 : vector<64x1xf32>
    %61 = vector.broadcast %60 : vector<64x1xf32> to vector<64x32xf32>
    %62 = arith.subf %54, %61 : vector<64x32xf32>
    %63 = arith.mulf %62, %62 : vector<64x32xf32>
    %cst_36 = arith.constant dense<0.000000e+00> : vector<64xf32>
    %64 = vector.multi_reduction <add>, %63, %cst_36 [1] : vector<64x32xf32> to vector<64xf32>
    %65 = vector.shape_cast %64 : vector<64xf32> to vector<64x1xf32>
    %cst_37 = arith.constant 3.200000e+01 : f32
    %66 = vector.broadcast %cst_37 : f32 to vector<64x1xf32>
    %67 = arith.divf %65, %66 : vector<64x1xf32>
    %cst_38 = arith.constant 9.99999974E-6 : f32
    %68 = vector.broadcast %cst_38 : f32 to vector<64x1xf32>
    %69 = arith.addf %67, %68 : vector<64x1xf32>
    %70 = math.rsqrt %69 : vector<64x1xf32>
    %71 = vector.broadcast %70 : vector<64x1xf32> to vector<64x32xf32>
    %72 = arith.mulf %62, %71 : vector<64x32xf32>
    %73 = vector.broadcast %55 : vector<1x32xf32> to vector<64x32xf32>
    %74 = arith.mulf %72, %73 : vector<64x32xf32>
    %75 = vector.broadcast %56 : vector<1x32xf32> to vector<64x32xf32>
    %76 = arith.addf %74, %75 : vector<64x32xf32>
    %77 = arith.addf %29, %76 : vector<64x32xf32>
    %c0_39 = arith.constant 0 : index
    %c0_40 = arith.constant 0 : index
    %78 = vector.load %arg13[%c0_39, %c0_40] : memref<64x32xf32, #tpu.memory_space<vmem>>, vector<64x32xf32>
    tpu.vector_store %arg13[%c0_39, %c0_40], %77 {strides = array<i32>} : memref<64x32xf32, #tpu.memory_space<vmem>>, vector<64x32xf32>,
    return
  }
  func.func @transform_0(%arg0: i32) -> (i32, i32) {
    %c0_i32 = arith.constant 0 : i32
    %c0_i32_0 = arith.constant 0 : i32
    return %arg0, %c0_i32 : i32, i32
  }
  func.func @transform_1(%arg0: i32) -> (i32, i32) {
    %c0_i32 = arith.constant 0 : i32
    %c0_i32_0 = arith.constant 0 : i32
    return %arg0, %c0_i32 : i32, i32
  }
  func.func @transform_2(%arg0: i32) -> (i32, i32) {
    %c0_i32 = arith.constant 0 : i32
    %c0_i32_0 = arith.constant 0 : i32
    %c0_i32_1 = arith.constant 0 : i32
    return %c0_i32, %c0_i32_0 : i32, i32
  }
  func.func @transform_3(%arg0: i32) -> (i32, i32) {
    %c0_i32 = arith.constant 0 : i32
    %c0_i32_0 = arith.constant 0 : i32
    %c0_i32_1 = arith.constant 0 : i32
    return %c0_i32, %c0_i32_0 : i32, i32
  }
  func.func @transform_4(%arg0: i32) -> (i32, i32) {
    %c0_i32 = arith.constant 0 : i32
    %c0_i32_0 = arith.constant 0 : i32
    %c0_i32_1 = arith.constant 0 : i32
    return %c0_i32, %c0_i32_0 : i32, i32
  }
  func.func @transform_5(%arg0: i32) -> (i32, i32) {
    %c0_i32 = arith.constant 0 : i32
    %c0_i32_0 = arith.constant 0 : i32
    %c0_i32_1 = arith.constant 0 : i32
    return %c0_i32, %c0_i32_0 : i32, i32
  }
  func.func @transform_6(%arg0: i32) -> (i32, i32) {
    %c0_i32 = arith.constant 0 : i32
    %c0_i32_0 = arith.constant 0 : i32
    %c0_i32_1 = arith.constant 0 : i32
    return %c0_i32, %c0_i32_0 : i32, i32
  }
  func.func @transform_7(%arg0: i32) -> (i32, i32) {
    %c0_i32 = arith.constant 0 : i32
    %c0_i32_0 = arith.constant 0 : i32
    %c0_i32_1 = arith.constant 0 : i32
    return %c0_i32, %c0_i32_0 : i32, i32
  }
  func.func @transform_8(%arg0: i32) -> (i32, i32) {
    %c0_i32 = arith.constant 0 : i32
    %c0_i32_0 = arith.constant 0 : i32
    %c0_i32_1 = arith.constant 0 : i32
    return %c0_i32, %c0_i32_0 : i32, i32
  }
  func.func @transform_9(%arg0: i32) -> (i32, i32) {
    %c0_i32 = arith.constant 0 : i32
    %c0_i32_0 = arith.constant 0 : i32
    %c0_i32_1 = arith.constant 0 : i32
    return %c0_i32, %c0_i32_0 : i32, i32
  }
  func.func @transform_10(%arg0: i32) -> (i32, i32) {
    %c0_i32 = arith.constant 0 : i32
    %c0_i32_0 = arith.constant 0 : i32
    %c0_i32_1 = arith.constant 0 : i32
    return %c0_i32, %c0_i32_0 : i32, i32
  }
  func.func @transform_11(%arg0: i32) -> (i32, i32) {
    %c0_i32 = arith.constant 0 : i32
    %c0_i32_0 = arith.constant 0 : i32
    %c0_i32_1 = arith.constant 0 : i32
    return %c0_i32, %c0_i32_0 : i32, i32
  }
  func.func @transform_12(%arg0: i32) -> (i32, i32) {
    %c0_i32 = arith.constant 0 : i32
    %c0_i32_0 = arith.constant 0 : i32
    return %arg0, %c0_i32 : i32, i32
  }
}

</mosaic_0001>

<bundles_post_ra>
// kernel: swin_block_forward_pallas.3
= control target key start
LH: loop header
LB: loop body
LE: loop exit
PB: predicated region body
PF: predicated region fallthrough
CT: control target
= control target key end

     0   :  { %s2020_s0 = inlined_call_operand.vmem [shape: f32[128,32], index: 0, kind: input, shape index: {}]   ;;  %s2021_s1 = inlined_call_operand.vmem [shape: bf16[128,32], index: 1, kind: input, shape index: {}]   ;;  %s2022_s2 = inlined_call_operand.vmem [shape: bf16[32,32], index: 2, kind: input, shape index: {}]   ;;  %s2023_s3 = inlined_call_operand.vmem [shape: f32[1,32], index: 3, kind: input, shape index: {}]   ;;  %s2024_s4 = inlined_call_operand.vmem [shape: f32[1,32], index: 4, kind: input, shape index: {}]   ;;  %s2025_s5 = inlined_call_operand.vmem [shape: f32[1,32], index: 5, kind: input, shape index: {}]   ;;  %s2026_s6 = inlined_call_operand.vmem [shape: bf16[32,128], index: 6, kind: input, shape index: {}]   ;;  %s2027_s7 = inlined_call_operand.vmem [shape: f32[1,128], index: 7, kind: input, shape index: {}]   ;;  %s2028_s8 = inlined_call_operand.vmem [shape: bf16[128,32], index: 8, kind: input, shape index: {}]   ;;  %s2029_s9 = inlined_call_operand.vmem [shape: f32[1,32], index: 9, kind: input, shape index: {}]   ;;  %s2030_s10 = inlined_call_operand.vmem [shape: f32[1,32], index: 10, kind: input, shape index: {}]   ;;  %s2031_s11 = inlined_call_operand.vmem [shape: f32[1,32], index: 11, kind: input, shape index: {}]   ;;  %s2032_s12 = inlined_call_operand.hbm [shape: f32[128,32], index: 12, kind: output, shape index: {}]  }
   0x1   :  { %2033 = sst [smem:[#allocation5_spill]] %s2020_s0 }
   0x2   :  { %17 = vsyncpa [#allocation3], 0 }
   0x3   :  { %19 = vsyncpa [#allocation3 + $0x1], 0  ;;  %s1627_s21 = smov 0   ;;  %s1629_s22 = smov 0  }
   0x4   :  { %s1631_s23 = smov 0   ;;  %s1633_s24 = smov 0  }
   0x5 LB: > { %s1648_s25 = sadd.s32 4294967295, %s1557_s24   ;;  %s1272_s26 = sadd.s32 4294967294, %s1557_s24   ;;  %s1557_s24 = sphi %s1633_s24, %s2040_s24   ;;  %s1553_s23 = sphi %s1631_s23, %s2039_s23   ;;  %s1549_s22 = sphi %s1629_s22, %s2038_s22   ;;  %s1545_s21 = sphi %s1627_s21, %s2037_s21  }
   0x6   : > { %s1652_s27 = sadd.s32 1, %s1557_s24   ;;  %s294_s28 = sadd.s32 1, %s1553_s23 }
   0x7   : > { %s291_s29 = ssub.s32 %s1557_s24, %s1652_s27  ;;  %p304_p0 = scmp.ne.s32.totalorder %s1553_s23, %s1549_s22 }
   0x8   : > { %p292_p1 = scmp.eq.s32.totalorder %s291_s29, 0  ;;  %p305_p2 = scmp.eq.s32.totalorder %s1648_s25, 1 }
   0x9   : > { %p310_p3 = scmp.ne.s32.totalorder %s1549_s22, %s1545_s21  ;;  %p311_p4 = scmp.eq.s32.totalorder %s1272_s26, 1 }
   0xa   : > { %s1663_s30 = scalar_select %p292_p1, %s1553_s23, %s294_s28  }
   0xb   : > { %p1665_p5 = por %p305_p2, %p304_p0  ;;  %p1669_p6 = por %p311_p4, %p310_p3 }
   0xc   : > { %p1275_p7 = scmp.ge.s32.totalorder %s1557_s24, 1  ;;  %p377_p8 = scmp.lt.s32.totalorder %s1557_s24, 3 }
   0xe   : > { %p378_p9 = pnand %p1275_p7, %p377_p8 }
   0xf   : > { %v1431_v0 = vld [vmem:[%s2022_s2] sm:$0xff] (!%p378_p9)   ;;  %s1277_s17 = sshll.u32 (!%p378_p9), %s1648_s25, 3  ;;  %v1432_v1 = vld [vmem:[%s2022_s2 + $0x8] sm:$0xff] (!%p378_p9)   ;;  %vm497_vm0 = vcmask (!%p378_p9), 261120   ;;  %s2036_s0 = sld [smem:[#allocation5_spill]] (!%p378_p9) }
  0x10   : > { %381 = sbr.rel (%p378_p9) target bundleno = 1372 (0x55c), region = 68  ;;  %p425_p10 = scmp.lt.s32.totalorder (!%p378_p9), %s1277_s17, 15  ;;  %1342 = vmatprep.subr.bf16.mxu1 (!%p378_p9), %v1431_v0  ;;  %v1281_v6 = vld [vmem:[%s2023_s3] ss:$0 sm:$0xff] (!%p378_p9) }
  0x11   : > { %1343 = vmatpush3.bf16.msra.mxu1 (!%p378_p9), %v1431_v0  ;;  %s421_s16 = sand.u32 (!%p378_p9), 1, %s1549_s22  }
  0x12   : > { %1344 = vmatprep.subr.bf16.mxu1 (!%p378_p9), %v1432_v1 }
  0x15   : > { %1345 = vmatpush3.bf16.msra.mxu1 (!%p378_p9), %v1432_v1 }
  0x17   : > { %s2042_s17 = smov (!%p425_p10, %s1277_s17), 15 }
  0x18   : > { %s1280_s20 = sshll.u32 %s2042_s17, 2  ;;  %s1278_s15 = sshll.u32 %s2042_s17, 3 }
  0x19   : > { %s434_s29 = scalar_lea.vmem %s2021_s1, %s1280_s20  ;;  %s1760_s26 = scalar_lea.vmem %s2036_s0, %s1278_s15 }
  0x1a   : > { %v1433_v2 = vld [vmem:[%s434_s29] sm:$0xff]   ;;  %v1434_v3 = vld [vmem:[%s434_s29 + $0x8] sm:$0xff]   ;;  %v1435_v4 = vld [vmem:[%s434_s29 + $0x10] sm:$0xff]   ;;  %s1276_s20 = sshll.u32 %s421_s16, 6  ;;  %s1317_s17 = sshll.u32 %s1648_s25, 10 }
  0x1b   : > { %1346 = vmatprep.mubr.msk.bf16.mxu1 %vm497_vm0, %v1433_v2  ;;  %v1436_v5 = vld [vmem:[%s434_s29 + $0x18] sm:$0xff]   ;;  %s1968_s18 = scalar_lea.hbm %s2032_s12, %s1317_s17  ;;  %s1979_s25 = scalar_lea.sflag [#allocation3], %s421_s16 }
  0x1c   : > { %1347 = vmatmul.mubr.msk.bf16.vlgmr.msra.gmra.mrb[0].mxu1 %vm497_vm0, %v1434_v3 }
  0x1d   : > { %1350 = vmatprep.mubr.msk.bf16.mxu1 %vm497_vm0, %v1435_v4 }
  0x24   : > { %1351 = vmatmul.mubr.msk.bf16.gmra.mrb[4].mxu1 %vm497_vm0, %v1436_v5 }
  0xef   : > { %v1348_v7 = vpop.f32.mrb[0].mxu1 }
  0xf0   : > { %v553_v8 = vadd.f32 %v1348_v7, %v1281_v6  ;;  %v544_v9 = vpop.f32.mrb[1].mxu1  ;;  %v1437_v7 = vld [vmem:[%s2026_s6] sm:$0xff]  }
  0xf1   : > { %v545_v10 = vadd.f32 %v1281_v6, %v544_v9  ;;  %v1349_v11 = vpop.f32.mrb[2].mxu1  ;;  %1354 = vmatprep.subr.bf16.mxu1 %v1437_v7 }
  0xf2   : > { %v556_v12 = vadd.f32 %v1349_v11, %v1281_v6  ;;  %v547_v13 = vpop.f32.mrb[3].mxu1  ;;  %v583_v14 = vsel %vm497_vm0, %v553_v8, 0.0  ;;  %1355 = vmatpush3.bf16.msra.mxu1 %v1437_v7 }
  0xf3   : > { %v548_v15 = vadd.f32 %v1281_v6, %v547_v13  ;;  %584 = vadd.xlane.f32.xlu1 %v583_v14  ;;  %v577_v16 = vsel %vm497_vm0, %v545_v10, 0.0 }
  0xf4   : > { %578 = vadd.xlane.f32.xlu0 %v577_v16  ;;  %v586_v17 = vsel %vm497_vm0, %v556_v12, 0.0 }
  0xf5   : > { %v580_v19 = vsel %vm497_vm0, %v548_v15, 0.0 }
  0xf7   : > { %587 = vadd.xlane.f32.xlu1 %v586_v17  ;;  %v1352_v18 = vpop.f32.mrb[4].mxu1 }
  0xf8   : > { %v560_v20 = vpop.f32.mrb[5].mxu1  ;;  %581 = vadd.xlane.f32.xlu0 %v580_v19  ;;  %v569_v24 = vadd.f32 %v1352_v18, %v1281_v6 }
  0xf9   : > { %v561_v21 = vadd.f32 %v1281_v6, %v560_v20  ;;  %v1353_v22 = vpop.f32.mrb[6].mxu1 }
  0xfa   : > { %v563_v23 = vpop.f32.mrb[7].mxu1  ;;  %v572_v27 = vadd.f32 %v1353_v22, %v1281_v6  ;;  %v595_v29 = vsel %vm497_vm0, %v569_v24, 0.0 }
  0xfb   : > { %v564_v25 = vadd.f32 %v1281_v6, %v563_v23  ;;  %v589_v26 = vsel %vm497_vm0, %v561_v21, 0.0 }
  0xfc   : > { %590 = vadd.xlane.f32.xlu0 %v589_v26  ;;  %v598_v30 = vsel %vm497_vm0, %v572_v27, 0.0 }
  0xfd   : > { %v592_v28 = vsel %vm497_vm0, %v564_v25, 0.0 }
  0xfe   : > { %593 = vadd.xlane.f32.xlu1 %v592_v28 }
 0x100   : > { %596 = vadd.xlane.f32.xlu0 %v595_v29  ;;  %v1292_v29 = vld [vmem:[%s2024_s4] ss:$0 sm:$0xff] }
 0x102   : > { %599 = vadd.xlane.f32.xlu1 %v598_v30 }
 0x180   : > { %v585_v31 = vpop.xlane.xlu1 %584 }
 0x181   : > { %v604_v32 = vmul.f32 0.03125, %v585_v31  ;;  %v579_v33 = vpop.xlane.xlu0 %578 }
 0x182   : > { %v602_v34 = vmul.f32 0.03125, %v579_v33 }
 0x183   : > { %v1703_v35 = vsub.f32 %v553_v8, %v604_v32  ;;  %v1438_v8 = vld [vmem:[%s2026_s6 + $0x8] sm:$0xff]  }
 0x184   : > { %v1705_v36 = vsub.f32 %v545_v10, %v602_v34  ;;  %v588_v37 = vpop.xlane.xlu1 %587  ;;  %1356 = vmatprep.subr.bf16.mxu1 %v1438_v8 }
 0x185   : > { %v605_v38 = vmul.f32 0.03125, %v588_v37  ;;  %v582_v39 = vpop.xlane.xlu0 %581  ;;  %v620_v45 = vmul.f32 %v1703_v35, %v1703_v35  ;;  %1357 = vmatpush3.bf16.msra.mxu1 %v1438_v8 }
 0x186   : > { %v603_v40 = vmul.f32 0.03125, %v582_v39  ;;  %v618_v41 = vmul.f32 %v1705_v36, %v1705_v36  ;;  %v1293_v39 = vld [vmem:[%s2025_s5] ss:$0 sm:$0xff] }
 0x187   : > { %v1709_v42 = vsub.f32 %v556_v12, %v605_v38  ;;  %v632_v53 = vsel %vm497_vm0, %v620_v45, 0.0 }
 0x188   : > { %v1711_v43 = vsub.f32 %v548_v15, %v603_v40  ;;  %v626_v44 = vsel %vm497_vm0, %v618_v41, 0.0 }
 0x189   : > { %627 = vadd.xlane.f32.xlu0 %v626_v44  ;;  %v591_v46 = vpop.xlane.xlu0 %590  ;;  %v621_v50 = vmul.f32 %v1709_v42, %v1709_v42 }
 0x18a   : > { %v606_v47 = vmul.f32 0.03125, %v591_v46  ;;  %v619_v48 = vmul.f32 %v1711_v43, %v1711_v43 }
 0x18b   : > { %v594_v49 = vpop.xlane.xlu1 %593  ;;  %v635_v60 = vsel %vm497_vm0, %v621_v50, 0.0  ;;  %v439_v50 = vld [vmem:[%s1760_s26 + $0x8] sm:$0xff] }
 0x18c   : > { %v1720_v51 = vsub.f32 %v561_v21, %v606_v47  ;;  %v607_v52 = vmul.f32 0.03125, %v594_v49  ;;  %v629_v54 = vsel %vm497_vm0, %v619_v48, 0.0  ;;  %v438_v49 = vld [vmem:[%s1760_s26] sm:$0xff] }
 0x18d   : > { %633 = vadd.xlane.f32.xlu0 %v632_v53  ;;  %630 = vadd.xlane.f32.xlu1 %v629_v54  ;;  %v597_v55 = vpop.xlane.xlu0 %596 }
 0x18e   : > { %v1724_v56 = vsub.f32 %v564_v25, %v607_v52  ;;  %v608_v57 = vmul.f32 0.03125, %v597_v55  ;;  %v622_v58 = vmul.f32 %v1720_v51, %v1720_v51 }
 0x18f   : > { %v600_v59 = vpop.xlane.xlu1 %599 }
 0x190   : > { %v1729_v61 = vsub.f32 %v569_v24, %v608_v57  ;;  %v609_v62 = vmul.f32 0.03125, %v600_v59  ;;  %v638_v63 = vsel %vm497_vm0, %v622_v58, 0.0  ;;  %v623_v0 = vmul.f32 %v1724_v56, %v1724_v56 }
 0x191   : > { %636 = vadd.xlane.f32.xlu1 %v635_v60  ;;  %639 = vadd.xlane.f32.xlu0 %v638_v63  ;;  %v440_v60 = vld [vmem:[%s1760_s26 + $0x10] sm:$0xff] }
 0x192   : > { %v1734_v1 = vsub.f32 %v572_v27, %v609_v62  ;;  %v624_v2 = vmul.f32 %v1729_v61, %v1729_v61  ;;  %v641_v3 = vsel %vm497_vm0, %v623_v0, 0.0  ;;  %v441_v62 = vld [vmem:[%s1760_s26 + $0x18] sm:$0xff] }
 0x194   : > { %v644_v4 = vsel %vm497_vm0, %v624_v2, 0.0  ;;  %v625_v5 = vmul.f32 %v1734_v1, %v1734_v1 }
 0x195   : > { %642 = vadd.xlane.f32.xlu1 %v641_v3  ;;  %645 = vadd.xlane.f32.xlu0 %v644_v4 }
 0x196   : > { %v647_v6 = vsel %vm497_vm0, %v625_v5, 0.0 }
 0x199   : > { %648 = vadd.xlane.f32.xlu1 %v647_v6 }
 0x216   : > { %v628_v9 = vpop.xlane.xlu0 %627 }
 0x217   : > { %v650_v10 = vmul.f32 0.03125, %v628_v9  ;;  %v442_v9 = vld [vmem:[%s1760_s26 + $0x20] sm:$0xff] }
 0x219   : > { %v658_v11 = vadd.f32 1e-05, %v650_v10  ;;  %v443_v10 = vld [vmem:[%s1760_s26 + $0x28] sm:$0xff] }
 0x21a   : > { %v631_v12 = vpop.xlane.xlu1 %630  ;;  %v634_v13 = vpop.xlane.xlu0 %633 }
 0x21b   : > { %1447 = vrsqrt.f32 %v658_v11  ;;  %v651_v14 = vmul.f32 0.03125, %v631_v12  ;;  %v652_v15 = vmul.f32 0.03125, %v634_v13 }
 0x21d   : > { %v659_v16 = vadd.f32 1e-05, %v651_v14  ;;  %v660_v17 = vadd.f32 1e-05, %v652_v15 }
 0x21e   : > { %v637_v18 = vpop.xlane.xlu1 %636  ;;  %v640_v19 = vpop.xlane.xlu0 %639 }
 0x21f   : > { %1449 = vrsqrt.f32 %v659_v16  ;;  %v653_v20 = vmul.f32 0.03125, %v637_v18  ;;  %v654_v21 = vmul.f32 0.03125, %v640_v19  ;;  %v445_v18 = vld [vmem:[%s1760_s26 + $0x38] sm:$0xff] }
 0x220   : > { %1451 = vrsqrt.f32 %v660_v17  ;;  %v444_v17 = vld [vmem:[%s1760_s26 + $0x30] sm:$0xff]  ;;  %s1939_s26 = scalar_lea.vmem [#allocation2], %s1276_s20  ;;  %s1559_s20 = smov [#allocation2]  }
 0x221   : > { %v661_v22 = vadd.f32 1e-05, %v653_v20  ;;  %v662_v23 = vadd.f32 1e-05, %v654_v21  ;;  %s1198_s28 = sshll.u32 %s1939_s26, 4  ;;  %s1499_s17 = sshll.u32 %s1559_s20, 4  ;;  %s1970_s28 = int_to_ptr.vmem [resolvable:$true] %s1198_s28  ;;  %s1500_s17 = int_to_ptr.vmem [resolvable:$false] %s1499_s17 }
 0x222   : > { %v643_v24 = vpop.xlane.xlu1 %642  ;;  %v646_v25 = vpop.xlane.xlu0 %645  ;;  %s1495_s19 = scalar_lea.vmem %s1970_s28, 1024  ;;  %s1501_s29 = scalar_lea.vmem %s1500_s17, 2048 }
 0x223   : > { %1453 = vrsqrt.f32 %v661_v22  ;;  %v655_v26 = vmul.f32 0.03125, %v643_v24  ;;  %v656_v27 = vmul.f32 0.03125, %v646_v25  ;;  %v1440_v24 = vld [vmem:[%s2028_s8 + $0x8] sm:$0xff]   ;;  %v1441_v25 = vld [vmem:[%s2028_s8 + $0x10] sm:$0xff]   ;;  %p1496_p11 = scmp.ne.s32.totalorder %s1970_s28, %s1495_s19  ;;  %p1502_p0 = scmp.lt.s32.totalorder %s1970_s28, %s1500_s17 }
 0x224   : > { %1455 = vrsqrt.f32 %v662_v23  ;;  %v1439_v23 = vld [vmem:[%s2028_s8] sm:$0xff]   ;;  %p1503_p1 = scmp.lt.s32.totalorder %s1501_s29, %s1495_s19 }
 0x225   : > { %v1448_v28 = vpop.eup %1447  ;;  %v663_v30 = vadd.f32 1e-05, %v655_v26  ;;  %v664_v31 = vadd.f32 1e-05, %v656_v27  ;;  %1366 = vmatprep.subr.bf16.mxu0 %v1439_v23  ;;  %v1442_v26 = vld [vmem:[%s2028_s8 + $0x18] sm:$0xff]   ;;  %v1443_v27 = vld [vmem:[%s2028_s8 + $0x20] sm:$0xff]   ;;  %p1497_p12 = pnand %p1496_p11, %p1665_p5 }
 0x226   : > { %v674_v32 = vmul.f32 %v1448_v28, %v1705_v36  ;;  %v649_v33 = vpop.xlane.xlu1 %648  ;;  %1367 = vmatpush3.bf16.msra.mxu0 %v1439_v23  ;;  %v1444_v28 = vld [vmem:[%s2028_s8 + $0x28] sm:$0xff]   ;;  %p1504_p2 = por %p1503_p1, %p1502_p0 }
 0x227   : > { %1457 = vrsqrt.f32 %v663_v30  ;;  %v657_v34 = vmul.f32 0.03125, %v649_v33  ;;  %1368 = vmatprep.subr.bf16.mxu0 %v1440_v24  ;;  %v1446_v30 = vld [vmem:[%s2028_s8 + $0x38] sm:$0xff]   ;;  %p1498_p13 = pneg %p1497_p12 }
 0x228   : > { %1459 = vrsqrt.f32 %v664_v31  ;;  %v688_v37 = vmul.f32 %v1292_v29, %v674_v32  ;;  %v1294_v31 = vld [vmem:[%s2027_s7] ss:$0 sm:$0xff] }
 0x229   : > { %v1450_v38 = vpop.eup %1449  ;;  %v665_v40 = vadd.f32 1e-05, %v657_v34  ;;  %p1505_p3 = pnand %p1504_p2, %p1498_p13 }
 0x22a   : > { %v1452_v41 = vpop.eup %1451  ;;  %v675_v36 = vmul.f32 %v1450_v38, %v1711_v43  ;;  %v702_v46 = vadd.f32 %v1293_v39, %v688_v37  ;;  %1369 = vmatpush3.bf16.msra.mxu0 %v1440_v24 }
 0x22b   : > { %v676_v44 = vmul.f32 %v1452_v41, %v1703_v35  ;;  %1461 = vrsqrt.f32 %v665_v40  ;;  %1370 = vmatprep.subr.bf16.mxu0 %v1441_v25 }
 0x22c   : > { %v689_v45 = vmul.f32 %v1292_v29, %v675_v36  ;;  %v1768_v43 = vadd.f32 %v702_v46, %v438_v49 }
 0x22d   : > { %v1454_v47 = vpop.eup %1453  ;;  %v690_v48 = vmul.f32 %v1292_v29, %v676_v44 }
 0x22e   : > { %v1456_v52 = vpop.eup %1455  ;;  %v677_v53 = vmul.f32 %v1454_v47, %v1709_v42  ;;  %v703_v54 = vadd.f32 %v1293_v39, %v689_v45  ;;  %1371 = vmatpush3.bf16.msra.mxu0 %v1441_v25 }
 0x22f   : > { %v678_v55 = vmul.f32 %v1456_v52, %v1720_v51  ;;  %v704_v57 = vadd.f32 %v1293_v39, %v690_v48  ;;  %1372 = vmatprep.subr.bf16.mxu0 %v1442_v26 }
 0x230   : > { %v691_v58 = vmul.f32 %v1292_v29, %v677_v53  ;;  %v1770_v35 = vadd.f32 %v703_v54, %v439_v50 }
 0x231   : > { %v1458_v59 = vpop.eup %1457  ;;  %v692_v63 = vmul.f32 %v1292_v29, %v678_v55  ;;  %v1778_v4 = vadd.f32 %v704_v57, %v440_v60 }
 0x232   : > { %v1460_v0 = vpop.eup %1459  ;;  %v705_v2 = vadd.f32 %v1293_v39, %v691_v58  ;;  %v679_v3 = vmul.f32 %v1458_v59, %v1724_v56  ;;  %v718_v42 = vpack.c.bf16 %v1770_v35, %v1768_v43  ;;  %1373 = vmatpush3.bf16.msra.mxu0 %v1442_v26 }
 0x233   : > { %v680_v51 = vmul.f32 %v1460_v0, %v1729_v61  ;;  %v706_v7 = vadd.f32 %v1293_v39, %v692_v63  ;;  %1374 = vmatprep.subr.bf16.mxu0 %v1443_v27 }
 0x234   : > { %v1780_v5 = vadd.f32 %v705_v2, %v441_v62  ;;  %1358 = vmatprep.mubr.msk.bf16.mxu1 %vm497_vm0, %v718_v42  ;;  %v693_v6 = vmul.f32 %v1292_v29, %v679_v3 }
 0x235   : > { %v1462_v8 = vpop.eup %1461  ;;  %v694_v11 = vmul.f32 %v1292_v29, %v680_v51  ;;  %v1789_v13 = vadd.f32 %v706_v7, %v442_v9 }
 0x236   : > { %v681_v56 = vmul.f32 %v1462_v8, %v1734_v1  ;;  %v719_v12 = vpack.c.bf16 %v1780_v5, %v1778_v4  ;;  %v707_v61 = vadd.f32 %v1293_v39, %v693_v6  ;;  %1375 = vmatpush3.bf16.msra.mxu0 %v1443_v27 }
 0x237   : > { %v708_v16 = vadd.f32 %v1293_v39, %v694_v11  ;;  %1376 = vmatprep.subr.bf16.mxu0 %v1444_v28 }
 0x238   : > { %1359 = vmatmul.mubr.msk.bf16.vlgmr.msra.gmra.mrb[8].mxu1 %vm497_vm0, %v719_v12  ;;  %v1791_v14 = vadd.f32 %v707_v61, %v443_v10  ;;  %v695_v15 = vmul.f32 %v1292_v29, %v681_v56  ;;  %v1445_v29 = vld [vmem:[%s2028_s8 + $0x30] sm:$0xff]  }
 0x239   : > { %v1798_v1 = vadd.f32 %v708_v16, %v444_v17 }
 0x23a   : > { %v720_v19 = vpack.c.bf16 %v1791_v14, %v1789_v13  ;;  %v709_v20 = vadd.f32 %v1293_v39, %v695_v15  ;;  %1377 = vmatpush3.bf16.msra.mxu0 %v1444_v28 }
 0x23b   : > { %1378 = vmatprep.subr.bf16.mxu0 %v1445_v29 }
 0x23c   : > { %1362 = vmatprep.mubr.msk.bf16.mxu1 %vm497_vm0, %v720_v19  ;;  %v1800_v21 = vadd.f32 %v709_v20, %v445_v18 }
 0x23e   : > { %v721_v22 = vpack.c.bf16 %v1800_v21, %v1798_v1  ;;  %1379 = vmatpush3.bf16.msra.mxu0 %v1445_v29 }
 0x23f   : > { %1380 = vmatprep.subr.bf16.mxu0 %v1446_v30 }
 0x240   : > { %1363 = vmatmul.mubr.msk.bf16.gmra.mrb[12].mxu1 %vm497_vm0, %v721_v22 }
 0x242   : > { %1381 = vmatpush3.bf16.msra.mxu0 %v1446_v30 }
 0x30b   : > { %v1360_v32 = vpop.f32.mrb[8].mxu1 }
 0x30c   : > { %v1832_v33 = vadd.f32 %v1360_v32, %v1294_v31  ;;  %v791_v34 = vpop.f32.mrb[9].mxu1 }
 0x30d   : > { %v1834_v37 = vadd.f32 %v1294_v31, %v791_v34  ;;  %v1361_v38 = vpop.f32.mrb[10].mxu1 }
 0x30e   : > { %v832_v39 = vmul.f32 %v1832_v33, %v1832_v33  ;;  %v1838_v40 = vadd.f32 %v1361_v38, %v1294_v31  ;;  %v794_v41 = vpop.f32.mrb[11].mxu1 }
 0x30f   : > { %v830_v36 = vmul.f32 %v1834_v37, %v1834_v37  ;;  %v1842_v44 = vadd.f32 %v1294_v31, %v794_v41 }
 0x310   : > { %v840_v45 = vmul.f32 %v832_v39, %v1832_v33  ;;  %v833_v46 = vmul.f32 %v1838_v40, %v1838_v40 }
 0x311   : > { %v838_v47 = vmul.f32 %v830_v36, %v1834_v37  ;;  %v831_v48 = vmul.f32 %v1842_v44, %v1842_v44 }
 0x312   : > { %v848_v49 = vmul.f32 0.044715, %v840_v45  ;;  %v841_v50 = vmul.f32 %v833_v46, %v1838_v40  ;;  %v824_v45 = vmul.f32 0.5, %v1832_v33  ;;  %v825_v46 = vmul.f32 0.5, %v1838_v40 }
 0x313   : > { %v846_v52 = vmul.f32 0.044715, %v838_v47  ;;  %v839_v53 = vmul.f32 %v831_v48, %v1842_v44  ;;  %v1364_v54 = vpop.f32.mrb[12].mxu1  ;;  %v822_v48 = vmul.f32 0.5, %v1834_v37 }
 0x314   : > { %v856_v55 = vadd.f32 %v848_v49, %v1832_v33  ;;  %v849_v57 = vmul.f32 0.044715, %v841_v50  ;;  %v1853_v58 = vadd.f32 %v1364_v54, %v1294_v31  ;;  %v807_v59 = vpop.f32.mrb[13].mxu1  ;;  %v823_v49 = vmul.f32 0.5, %v1842_v44 }
 0x315   : > { %v847_v60 = vmul.f32 0.044715, %v839_v53  ;;  %v1855_v62 = vadd.f32 %v1294_v31, %v807_v59  ;;  %v1365_v63 = vpop.f32.mrb[14].mxu1  ;;  %v854_v0 = vadd.f32 %v846_v52, %v1834_v37 }
 0x316   : > { %v864_v2 = vmul.f32 0.7978846, %v856_v55  ;;  %v857_v3 = vadd.f32 %v849_v57, %v1838_v40  ;;  %v836_v42 = vmul.f32 %v1853_v58, %v1853_v58  ;;  %v819_v51 = vadd.f32 %v1365_v63, %v1294_v31  ;;  %v810_v6 = vpop.f32.mrb[15].mxu1 }
 0x317   : > { %v834_v7 = vmul.f32 %v1855_v62, %v1855_v62  ;;  %v811_v8 = vadd.f32 %v1294_v31, %v810_v6  ;;  %v855_v9 = vadd.f32 %v847_v60, %v1842_v44  ;;  %v862_v10 = vmul.f32 0.7978846, %v854_v0 }
 0x318   : > { %1463 = vtanh.f32 %v864_v2  ;;  %v865_v11 = vmul.f32 0.7978846, %v857_v3  ;;  %v844_v56 = vmul.f32 %v836_v42, %v1853_v58  ;;  %v837_v12 = vmul.f32 %v819_v51, %v819_v51 }
 0x319   : > { %v842_v61 = vmul.f32 %v834_v7, %v1855_v62  ;;  %v835_v15 = vmul.f32 %v811_v8, %v811_v8  ;;  %v863_v16 = vmul.f32 0.7978846, %v855_v9  ;;  %1465 = vtanh.f32 %v862_v10 }
 0x31a   : > { %1467 = vtanh.f32 %v865_v11  ;;  %v852_v17 = vmul.f32 0.044715, %v844_v56  ;;  %v845_v18 = vmul.f32 %v837_v12, %v819_v51  ;;  %v828_v40 = vmul.f32 0.5, %v1853_v58 }
 0x31b   : > { %v850_v19 = vmul.f32 0.044715, %v842_v61  ;;  %v843_v20 = vmul.f32 %v835_v15, %v811_v8  ;;  %1469 = vtanh.f32 %v863_v16  ;;  %v829_v37 = vmul.f32 0.5, %v819_v51  ;;  %v1301_v15 = vld [vmem:[%s2029_s9] ss:$0 sm:$0xff] }
 0x31c   : > { %v860_v22 = vadd.f32 %v852_v17, %v1853_v58  ;;  %v853_v23 = vmul.f32 0.044715, %v845_v18  ;;  %v826_v44 = vmul.f32 0.5, %v1855_v62  ;;  %v827_v6 = vmul.f32 0.5, %v811_v8 }
 0x31d   : > { %v858_v24 = vadd.f32 %v850_v19, %v1855_v62  ;;  %v851_v25 = vmul.f32 0.044715, %v843_v20 }
 0x31e   : > { %v868_v26 = vmul.f32 0.7978846, %v860_v22  ;;  %v861_v27 = vadd.f32 %v853_v23, %v819_v51 }
 0x31f   : > { %v866_v28 = vmul.f32 0.7978846, %v858_v24  ;;  %v859_v29 = vadd.f32 %v851_v25, %v811_v8 }
 0x320   : > { %1471 = vtanh.f32 %v868_v26  ;;  %v869_v30 = vmul.f32 0.7978846, %v861_v27 }
 0x321   : > { %1473 = vtanh.f32 %v866_v28  ;;  %v867_v31 = vmul.f32 0.7978846, %v859_v29 }
 0x322   : > { %v1464_v32 = vpop.eup %1463  ;;  %1475 = vtanh.f32 %v869_v30 }
 0x323   : > { %v1466_v34 = vpop.eup %1465  ;;  %1477 = vtanh.f32 %v867_v31  ;;  %v880_v38 = vadd.f32 1.0, %v1464_v32 }
 0x324   : > { %v1468_v39 = vpop.eup %1467  ;;  %v878_v41 = vadd.f32 1.0, %v1466_v34 }
 0x325   : > { %v1470_v36 = vpop.eup %1469  ;;  %v881_v47 = vadd.f32 1.0, %v1468_v39  ;;  %v888_v52 = vmul.f32 %v880_v38, %v824_v45 }
 0x326   : > { %v879_v50 = vadd.f32 1.0, %v1470_v36  ;;  %v886_v54 = vmul.f32 %v878_v41, %v822_v48 }
 0x327   : > { %v889_v53 = vmul.f32 %v881_v47, %v825_v46 }
 0x328   : > { %v887_v55 = vmul.f32 %v879_v50, %v823_v49 }
 0x329   : > { %v895_v57 = vpack.c.bf16 %v889_v53, %v888_v52 }
 0x32a   : > { %v1472_v59 = vpop.eup %1471  ;;  %v894_v60 = vpack.c.bf16 %v887_v55, %v886_v54 }
 0x32b   : > { %v1474_v63 = vpop.eup %1473  ;;  %v884_v0 = vadd.f32 1.0, %v1472_v59 }
 0x32c   : > { %v1476_v2 = vpop.eup %1475  ;;  %1382 = vmatprep.mubr.bf16.mxu0 %v894_v60  ;;  %v882_v33 = vadd.f32 1.0, %v1474_v63 }
 0x32d   : > { %v1478_v3 = vpop.eup %1477  ;;  %1383 = vmatmul.mubr.bf16.vlgmr.msra.gmra.mrb[0].mxu0 %v895_v57  ;;  %v885_v42 = vadd.f32 1.0, %v1476_v2  ;;  %v892_v9 = vmul.f32 %v884_v0, %v828_v40 }
 0x32e   : > { %v883_v7 = vadd.f32 1.0, %v1478_v3  ;;  %v890_v11 = vmul.f32 %v882_v33, %v826_v44 }
 0x32f   : > { %v893_v10 = vmul.f32 %v885_v42, %v829_v37 }
 0x330   : > { %v891_v56 = vmul.f32 %v883_v7, %v827_v6 }
 0x331   : > { %v897_v12 = vpack.c.bf16 %v893_v10, %v892_v9 }
 0x332   : > { %v896_v61 = vpack.c.bf16 %v891_v56, %v890_v11 }
 0x334   : > { %1386 = vmatprep.mubr.bf16.mxu0 %v896_v61 }
 0x335   : > { %1387 = vmatmul.mubr.bf16.gmra.mrb[4].mxu0 %v897_v12 }
 0x400   : > { %v1384_v16 = vpop.f32.mrb[0].mxu0 }
 0x401   : > { %v1012_v58 = vadd.f32 %v1384_v16, %v1301_v15  ;;  %v1003_v51 = vpop.f32.mrb[1].mxu0 }
 0x402   : > { %v1385_v17 = vpop.f32.mrb[2].mxu0  ;;  %v1004_v18 = vadd.f32 %v1301_v15, %v1003_v51 }
 0x403   : > { %v1015_v62 = vadd.f32 %v1385_v17, %v1301_v15  ;;  %v1006_v8 = vpop.f32.mrb[3].mxu0  ;;  %v1042_v19 = vsel %vm497_vm0, %v1012_v58, 0.0 }
 0x404   : > { %1043 = vadd.xlane.f32.xlu0 %v1042_v19  ;;  %v1007_v20 = vadd.f32 %v1301_v15, %v1006_v8  ;;  %v1036_v23 = vsel %vm497_vm0, %v1004_v18, 0.0 }
 0x405   : > { %v1045_v22 = vsel %vm497_vm0, %v1015_v62, 0.0 }
 0x406   : > { %1046 = vadd.xlane.f32.xlu1 %v1045_v22  ;;  %v1039_v26 = vsel %vm497_vm0, %v1007_v20, 0.0 }
 0x408   : > { %v1388_v24 = vpop.f32.mrb[4].mxu0  ;;  %1037 = vadd.xlane.f32.xlu0 %v1036_v23 }
 0x409   : > { %v1019_v25 = vpop.f32.mrb[5].mxu0  ;;  %v1028_v30 = vadd.f32 %v1388_v24, %v1301_v15 }
 0x40a   : > { %v1020_v27 = vadd.f32 %v1301_v15, %v1019_v25  ;;  %v1389_v28 = vpop.f32.mrb[6].mxu0  ;;  %1040 = vadd.xlane.f32.xlu1 %v1039_v26 }
 0x40b   : > { %v1022_v29 = vpop.f32.mrb[7].mxu0  ;;  %v1031_v34 = vadd.f32 %v1389_v28, %v1301_v15  ;;  %v1054_v39 = vsel %vm497_vm0, %v1028_v30, 0.0 }
 0x40c   : > { %v1023_v31 = vadd.f32 %v1301_v15, %v1022_v29  ;;  %v1048_v32 = vsel %vm497_vm0, %v1020_v27, 0.0 }
 0x40d   : > { %1049 = vadd.xlane.f32.xlu0 %v1048_v32  ;;  %v1057_v41 = vsel %vm497_vm0, %v1031_v34, 0.0 }
 0x40e   : > { %v1051_v38 = vsel %vm497_vm0, %v1023_v31, 0.0 }
 0x40f   : > { %1052 = vadd.xlane.f32.xlu1 %v1051_v38 }
 0x411   : > { %1055 = vadd.xlane.f32.xlu0 %v1054_v39 }
 0x413   : > { %1058 = vadd.xlane.f32.xlu1 %v1057_v41 }
 0x491   : > { %v1044_v36 = vpop.xlane.xlu0 %1043 }
 0x492   : > { %v1062_v45 = vmul.f32 0.03125, %v1044_v36 }
 0x493   : > { %v1047_v46 = vpop.xlane.xlu1 %1046 }
 0x494   : > { %v1885_v47 = vsub.f32 %v1012_v58, %v1062_v45  ;;  %v1063_v48 = vmul.f32 0.03125, %v1047_v46 }
 0x495   : > { %v1038_v49 = vpop.xlane.xlu0 %1037 }
 0x496   : > { %v1887_v50 = vsub.f32 %v1015_v62, %v1063_v48  ;;  %v1060_v52 = vmul.f32 0.03125, %v1038_v49  ;;  %v1078_v53 = vmul.f32 %v1885_v47, %v1885_v47 }
 0x497   : > { %v1041_v54 = vpop.xlane.xlu1 %1040 }
 0x498   : > { %v1891_v55 = vsub.f32 %v1004_v18, %v1060_v52  ;;  %v1061_v57 = vmul.f32 0.03125, %v1041_v54  ;;  %v1090_v59 = vsel %vm497_vm0, %v1078_v53, 0.0  ;;  %v1079_v60 = vmul.f32 %v1887_v50, %v1887_v50  ;;  %v1310_v52 = vld [vmem:[%s2030_s10] ss:$0 sm:$0xff] }
 0x499   : > { %1091 = vadd.xlane.f32.xlu0 %v1090_v59 }
 0x49a   : > { %v1896_v63 = vsub.f32 %v1007_v20, %v1061_v57  ;;  %v1050_v0 = vpop.xlane.xlu0 %1049  ;;  %v1093_v2 = vsel %vm497_vm0, %v1079_v60, 0.0  ;;  %v1076_v33 = vmul.f32 %v1891_v55, %v1891_v55 }
 0x49b   : > { %v1064_v3 = vmul.f32 0.03125, %v1050_v0  ;;  %1094 = vadd.xlane.f32.xlu1 %v1093_v2  ;;  %v1311_v0 = vld [vmem:[%s2031_s11] ss:$0 sm:$0xff] }
 0x49c   : > { %v1053_v40 = vpop.xlane.xlu1 %1052  ;;  %v1084_v37 = vsel %vm497_vm0, %v1076_v33, 0.0  ;;  %v1077_v42 = vmul.f32 %v1896_v63, %v1896_v63 }
 0x49d   : > { %v1904_v44 = vsub.f32 %v1020_v27, %v1064_v3  ;;  %v1065_v6 = vmul.f32 0.03125, %v1053_v40  ;;  %1085 = vadd.xlane.f32.xlu0 %v1084_v37 }
 0x49e   : > { %v1056_v7 = vpop.xlane.xlu0 %1055  ;;  %v1087_v9 = vsel %vm497_vm0, %v1077_v42, 0.0 }
 0x49f   : > { %v1907_v10 = vsub.f32 %v1023_v31, %v1065_v6  ;;  %v1066_v11 = vmul.f32 0.03125, %v1056_v7  ;;  %1088 = vadd.xlane.f32.xlu1 %v1087_v9  ;;  %v1080_v56 = vmul.f32 %v1904_v44, %v1904_v44 }
 0x4a0   : > { %v1059_v12 = vpop.xlane.xlu1 %1058 }
 0x4a1   : > { %v1911_v61 = vsub.f32 %v1028_v30, %v1066_v11  ;;  %v1067_v15 = vmul.f32 0.03125, %v1059_v12  ;;  %v1096_v16 = vsel %vm497_vm0, %v1080_v56, 0.0  ;;  %v1081_v58 = vmul.f32 %v1907_v10, %v1907_v10 }
 0x4a2   : > { %1097 = vadd.xlane.f32.xlu0 %v1096_v16 }
 0x4a3   : > { %v1916_v51 = vsub.f32 %v1031_v34, %v1067_v15  ;;  %v1099_v17 = vsel %vm497_vm0, %v1081_v58, 0.0  ;;  %v1082_v18 = vmul.f32 %v1911_v61, %v1911_v61 }
 0x4a4   : > { %1100 = vadd.xlane.f32.xlu1 %v1099_v17 }
 0x4a5   : > { %v1102_v62 = vsel %vm497_vm0, %v1082_v18, 0.0  ;;  %v1083_v8 = vmul.f32 %v1916_v51, %v1916_v51 }
 0x4a6   : > { %1103 = vadd.xlane.f32.xlu0 %v1102_v62 }
 0x4a7   : > { %v1105_v19 = vsel %vm497_vm0, %v1083_v8, 0.0 }
 0x4a8   : > { %1106 = vadd.xlane.f32.xlu1 %v1105_v19 }
 0x526   : > { %v1092_v20 = vpop.xlane.xlu0 %1091 }
 0x527   : > { %v1110_v22 = vmul.f32 0.03125, %v1092_v20 }
 0x528   : > { %v1095_v23 = vpop.xlane.xlu1 %1094 }
 0x529   : > { %v1118_v24 = vadd.f32 1e-05, %v1110_v22  ;;  %v1111_v25 = vmul.f32 0.03125, %v1095_v23 }
 0x52a   : > { %v1086_v26 = vpop.xlane.xlu0 %1085 }
 0x52b   : > { %1479 = vrsqrt.f32 %v1118_v24  ;;  %v1119_v27 = vadd.f32 1e-05, %v1111_v25  ;;  %v1108_v28 = vmul.f32 0.03125, %v1086_v26 }
 0x52c   : > { %v1089_v29 = vpop.xlane.xlu1 %1088 }
 0x52d   : > { %1481 = vrsqrt.f32 %v1119_v27  ;;  %v1116_v30 = vadd.f32 1e-05, %v1108_v28  ;;  %v1109_v31 = vmul.f32 0.03125, %v1089_v29 }
 0x52f   : > { %1483 = vrsqrt.f32 %v1116_v30  ;;  %v1117_v32 = vadd.f32 1e-05, %v1109_v31  ;;  %v1098_v34 = vpop.xlane.xlu0 %1097 }
 0x530   : > { %v1112_v38 = vmul.f32 0.03125, %v1098_v34 }
 0x531   : > { %1485 = vrsqrt.f32 %v1117_v32  ;;  %v1101_v39 = vpop.xlane.xlu1 %1100 }
 0x532   : > { %v1120_v41 = vadd.f32 1e-05, %v1112_v38  ;;  %v1113_v36 = vmul.f32 0.03125, %v1101_v39 }
 0x533   : > { %v1104_v45 = vpop.xlane.xlu0 %1103 }
 0x534   : > { %1487 = vrsqrt.f32 %v1120_v41  ;;  %v1121_v46 = vadd.f32 1e-05, %v1113_v36  ;;  %v1114_v48 = vmul.f32 0.03125, %v1104_v45 }
 0x535   : > { %v1480_v49 = vpop.eup %1479  ;;  %v1107_v53 = vpop.xlane.xlu1 %1106 }
 0x536   : > { %v1134_v54 = vmul.f32 %v1480_v49, %v1885_v47  ;;  %1489 = vrsqrt.f32 %v1121_v46  ;;  %v1122_v57 = vadd.f32 1e-05, %v1114_v48  ;;  %v1115_v59 = vmul.f32 0.03125, %v1107_v53 }
 0x537   : > { %v1482_v60 = vpop.eup %1481 }
 0x538   : > { %v1148_v2 = vmul.f32 %v1310_v52, %v1134_v54  ;;  %v1135_v33 = vmul.f32 %v1482_v60, %v1887_v50  ;;  %1491 = vrsqrt.f32 %v1122_v57  ;;  %v1123_v3 = vadd.f32 1e-05, %v1115_v59 }
 0x539   : > { %v1484_v40 = vpop.eup %1483 }
 0x53a   : > { %v1162_v37 = vadd.f32 %v1311_v0, %v1148_v2  ;;  %v1149_v42 = vmul.f32 %v1310_v52, %v1135_v33  ;;  %v1132_v47 = vmul.f32 %v1484_v40, %v1891_v55  ;;  %1493 = vrsqrt.f32 %v1123_v3 }
 0x53b   : > { %v1486_v6 = vpop.eup %1485 }
 0x53c   : > { %v1170_v7 = vadd.f32 %v1162_v37, %v1778_v4  ;;  %v1163_v9 = vadd.f32 %v1311_v0, %v1149_v42  ;;  %v1146_v11 = vmul.f32 %v1310_v52, %v1132_v47  ;;  %v1133_v56 = vmul.f32 %v1486_v6, %v1896_v63 }
 0x53e   : > { %v1488_v12 = vpop.eup %1487  ;;  %1178 = vst.msk [vmem:[%s1939_s26 + $0x10] sm:$0xff] %vm497_vm0, %v1170_v7  ;;  %v1171_v50 = vadd.f32 %v1163_v9, %v1780_v5  ;;  %v1160_v15 = vadd.f32 %v1311_v0, %v1146_v11  ;;  %v1147_v55 = vmul.f32 %v1310_v52, %v1133_v56 }
 0x53f   : > { %v1136_v16 = vmul.f32 %v1488_v12, %v1904_v44 }
 0x540   : > { %v1490_v4 = vpop.eup %1489  ;;  %1179 = vst.msk [vmem:[%s1939_s26 + $0x18] sm:$0xff] %vm497_vm0, %v1171_v50  ;;  %v1168_v63 = vadd.f32 %v1160_v15, %v1768_v43  ;;  %v1161_v58 = vadd.f32 %v1311_v0, %v1147_v55 }
 0x541   : > { %v1150_v17 = vmul.f32 %v1310_v52, %v1136_v16  ;;  %v1137_v18 = vmul.f32 %v1490_v4, %v1907_v10 }
 0x542   : > { %v1492_v62 = vpop.eup %1491  ;;  %1176 = vst.msk [vmem:[%s1939_s26] sm:$0xff] %vm497_vm0, %v1168_v63  ;;  %v1169_v5 = vadd.f32 %v1161_v58, %v1770_v35 }
 0x543   : > { %v1164_v8 = vadd.f32 %v1311_v0, %v1150_v17  ;;  %v1151_v44 = vmul.f32 %v1310_v52, %v1137_v18  ;;  %v1138_v19 = vmul.f32 %v1492_v62, %v1911_v61 }
 0x544   : > { %v1494_v20 = vpop.eup %1493  ;;  %1177 = vst.msk [vmem:[%s1939_s26 + $0x8] sm:$0xff] %vm497_vm0, %v1169_v5 }
 0x545   : > { %v1172_v43 = vadd.f32 %v1164_v8, %v1789_v13  ;;  %v1165_v22 = vadd.f32 %v1311_v0, %v1151_v44  ;;  %v1152_v10 = vmul.f32 %v1310_v52, %v1138_v19  ;;  %v1139_v23 = vmul.f32 %v1494_v20, %v1916_v51 }
 0x547   : > { %1180 = vst.msk [vmem:[%s1939_s26 + $0x20] sm:$0xff] %vm497_vm0, %v1172_v43  ;;  %v1173_v35 = vadd.f32 %v1165_v22, %v1791_v14  ;;  %v1166_v24 = vadd.f32 %v1311_v0, %v1152_v10  ;;  %v1153_v25 = vmul.f32 %v1310_v52, %v1139_v23 }
 0x549   : > { %1181 = vst.msk [vmem:[%s1939_s26 + $0x28] sm:$0xff] %vm497_vm0, %v1173_v35  ;;  %v1174_v61 = vadd.f32 %v1166_v24, %v1798_v1  ;;  %v1167_v13 = vadd.f32 %v1311_v0, %v1153_v25 }
 0x54b   : > { %1182 = vst.msk [vmem:[%s1939_s26 + $0x30] sm:$0xff] %vm497_vm0, %v1174_v61  ;;  %v1175_v14 = vadd.f32 %v1167_v13, %v1800_v21 }
 0x54d   : > { %1183 = vst.msk [vmem:[%s1939_s26 + $0x38] sm:$0xff] %vm497_vm0, %v1175_v14 }
 0x54e   : > { %1508 = shalt.err (!%p1505_p3)
}
 0x54f   : > { %s1509_s16 = scalar_lea.hbm %s1968_s18, 1024  ;;  %s1513_s20 = scalar_lea.hbm %s2032_s12, 2048 }
 0x550   : > { %p1510_p4 = scmp.ne.s32.totalorder %s1968_s18, %s1509_s16  ;;  %p1514_p9 = scmp.lt.u32.totalorder %s1968_s18, %s2032_s12 }
 0x551   : > { %p1515_p10 = scmp.lt.u32.totalorder %s1513_s20, %s1509_s16  ;;  %p1517_p12 = scmp.lt.u32.totalorder %s1509_s16, %s1968_s18 }
 0x552   : > { %p1511_p7 = pnand %p1510_p4, %p1665_p5 }
 0x553   : > { %p1516_p11 = por %p1515_p10, %p1514_p9 }
 0x554   : > { %p1512_p8 = pneg %p1511_p7 }
 0x555   : > { %p1518_p13 = por %p1517_p12, %p1516_p11 }
 0x557   : > { %p1519_p0 = pnand %p1518_p13, %p1512_p8 }
 0x559   : > { %1522 = shalt.err (!%p1519_p0)
}
 0x55a   : > { %s1560_s19 = smov 128   ;;  %s1561_s29 = smov 8  }
 0x55b   : > { %1390 = dma.vmem_to_hbm [thread:$0]  (%p1665_p5), %s1970_s28, 1024, %s1968_s18, %s1979_s25, %s1560_s19, %s1560_s19, %s1561_s29  }
 0x55c PF: > { %p1396_p1 = scmp.ge.s32.totalorder %s1557_s24, 2  ;;  %s1213_s0 = sand.u32 1, %s1545_s21  }
 0x55d   : > { %s1214_s16 = scalar_lea.sflag [#allocation3], %s1213_s0 }
 0x55e   : > { %p1393_p2 = pnand %p1396_p1, %p1669_p6 }
 0x560   : > { %1540 = dma.done.wait (!%p1393_p2), %s1214_s16, 1024  }
 0x561   : > { %1542 = vsyncadd (!%p1393_p2), %s1214_s16, 4294966272  ;;  %p22_p3 = scmp.ge.s32.totalorder %s1652_s27, 4   ;;  %s2037_s21 = smov %s1549_s22 }
 0x562   : > { %s2038_s22 = smov %s1553_s23  ;;  %s2039_s23 = smov %s1663_s30 }
 0x563   : > { %s2040_s24 = smov %s1652_s27  ;;  %24 = sbr.rel (!%p22_p3) target bundleno = 5 (0x5), region = 106 }
 0x56a   :  { %1219 = vsyncpa [#allocation3], 1 }
 0x56b   :  { %1221 = vsyncpa [#allocation3 + $0x1], 1 }

// kernel: swin_block_forward_pallas.2
= control target key start
LH: loop header
LB: loop body
LE: loop exit
PB: predicated region body
PF: predicated region fallthrough
CT: control target
= control target key end

     0   :  { %s5198_s18 = smov 0   ;;  %s6601_s0 = inlined_call_operand.vmem [shape: f32[8,16,32], index: 0, kind: input, shape index: {}]   ;;  %s6602_s1 = inlined_call_operand.vmem [shape: bf16[32,96], index: 1, kind: input, shape index: {}]   ;;  %s6603_s2 = inlined_call_operand.vmem [shape: f32[1,96], index: 2, kind: input, shape index: {}]   ;;  %s6604_s3 = inlined_call_operand.vmem [shape: f32[4,4,16,16], index: 3, kind: input, shape index: {}]   ;;  %s6605_s4 = inlined_call_operand.vmem [shape: f32[1,4], index: 4, kind: input, shape index: {}]   ;;  %s6606_s5 = inlined_call_operand.vmem [shape: bf16[8,16,32], index: 5, kind: output, shape index: {}]  }
   0x1 LB: > { %s4104_s19 = sadd.s32 4294967295, %s5149_s18   ;;  %p4108_p0 = scmp.ge.s32.totalorder %s5149_s18, 1  ;;  %s5149_s18 = sphi %s5198_s18, %s15_s18  }
   0x2   : > { %p189_p1 = scmp.lt.s32.totalorder %s5149_s18, 3 }
   0x4   : > { %p190_p2 = pnand %p4108_p0, %p189_p1 }
   0x5   : > { %v4885_v0 = vld [vmem:[%s6602_s1] sm:$0xff] (!%p190_p2)   ;;  %s4109_s22 = sshll.u32 (!%p190_p2), %s4104_s19, 2  ;;  %v4886_v1 = vld [vmem:[%s6602_s1 + $0x8] sm:$0xff] (!%p190_p2)   ;;  %vm269_vm0 = vcmask (!%p190_p2), 261120   ;;  %s5151_s6 = smov (!%p190_p2), 88   ;;  %vm356_vm1 = vcmask (!%p190_p2), 64512  }
   0x6   : > { %193 = sbr.rel (%p190_p2) target bundleno = 1985 (0x7c1), region = 40  ;;  %p220_p3 = scmp.lt.s32.totalorder (!%p190_p2), %s4109_s22, 7  ;;  %4325 = vmatprep.subr.bf16.mxu0 (!%p190_p2), %v4885_v0  ;;  %v4115_v14 = vld [vmem:[%s6603_s2] ss:$0 sm:$0xff] (!%p190_p2)  ;;  %vm5724_vm2 = vmpackc.low (!%p190_p2), %vm356_vm1, %vm356_vm1  ;;  %vm2763_vm3 = vcmask (!%p190_p2), 130048   ;;  %vm5164_vm4 = vmmov (!%p190_p2), 0  }
   0x7   : > { %4326 = vmatpush3.bf16.msra.mxu0 (!%p190_p2), %v4885_v0  ;;  %s5152_s7 = smov (!%p190_p2), 120   ;;  %s5153_s8 = smov (!%p190_p2), 80   ;;  %vm3996_vm5 = vcmask (!%p190_p2), 195584   ;;  %vm4037_vm6 = vcmask (!%p190_p2), 257024  }
   0x8   : > { %4327 = vmatprep.subr.bf16.mxu0 (!%p190_p2), %v4886_v1  ;;  %s5154_s9 = smov (!%p190_p2), 112   ;;  %s5155_s10 = smov (!%p190_p2), 72  }
   0x9   : > { %s5156_s11 = smov (!%p190_p2), 104   ;;  %s5157_s12 = smov (!%p190_p2), 96  }
   0xa   : > { %s5163_s15 = smov (!%p190_p2), 64   ;;  %s5166_s13 = smov (!%p190_p2), 16  }
   0xb   : > { %4328 = vmatpush3.bf16.msra.mxu0 (!%p190_p2), %v4886_v1  ;;  %s5167_s14 = smov (!%p190_p2), 24  }
   0xd   : > { %s6610_s22 = smov (!%p220_p3, %s4109_s22), 7 }
   0xe   : > { %s4213_s25 = sshll.u32 %s6610_s22, 4  ;;  %s4214_s16 = sshll.u32 %s6610_s22, 3 }
   0xf   : > { %s224_s28 = scalar_lea.vmem %s6601_s0, %s4213_s25  ;;  %s6541_s20 = scalar_lea.vmem %s6606_s5, %s4214_s16 }
  0x10   : > { %v234_v2 = vld [vmem:[%s224_s28] sm:$0xff]  ;;  %v235_v3 = vld [vmem:[%s224_s28 + $0x8] sm:$0xff]  ;;  %v236_v4 = vld [vmem:[%s224_s28 + $0x10] sm:$0xff] }
  0x11   : > { %v242_v5 = vpack.c.bf16 %v235_v3, %v234_v2  ;;  %v237_v6 = vld [vmem:[%s224_s28 + $0x18] sm:$0xff]  ;;  %v238_v7 = vld [vmem:[%s224_s28 + $0x20] sm:$0xff]  ;;  %v239_v8 = vld [vmem:[%s224_s28 + $0x28] sm:$0xff] }
  0x12   : > { %v243_v9 = vpack.c.bf16 %v237_v6, %v236_v4  ;;  %v244_v10 = vpack.c.bf16 %v239_v8, %v238_v7  ;;  %v240_v11 = vld [vmem:[%s224_s28 + $0x30] sm:$0xff]  ;;  %v241_v12 = vld [vmem:[%s224_s28 + $0x38] sm:$0xff] }
  0x13   : > { %4329 = vmatprep.mubr.msk.bf16.mxu0 %vm269_vm0, %v242_v5  ;;  %v245_v13 = vpack.c.bf16 %v241_v12, %v240_v11 }
  0x14   : > { %4330 = vmatmul.mubr.msk.bf16.vlgmr.msra.gmra.mrb[0].mxu0 %vm269_vm0, %v243_v9 }
  0x15   : > { %4333 = vmatprep.mubr.msk.bf16.mxu0 %vm269_vm0, %v244_v10 }
  0x1c   : > { %4334 = vmatmul.mubr.msk.bf16.gmra.mrb[4].mxu0 %vm269_vm0, %v245_v13 }
  0xe7   : > { %v4331_v15 = vpop.f32.mrb[0].mxu0 }
  0xe8   : > { %v5221_v16 = vadd.f32 %v4331_v15, %v4115_v14  ;;  %v316_v17 = vpop.f32.mrb[1].mxu0 }
  0xe9   : > { %v4332_v18 = vpop.f32.mrb[2].mxu0  ;;  %v5237_v25 = vadd.f32 %v4115_v14, %v316_v17 }
  0xea   : > { %v319_v19 = vpop.f32.mrb[3].mxu0  ;;  %v5225_v20 = vmul.f32 %v5221_v16, %v5221_v16  ;;  %v5259_v30 = vadd.f32 %v4332_v18, %v4115_v14 }
  0xeb   : > { %v5249_v29 = vmul.f32 %v5237_v25, %v5237_v25  ;;  %v5277_v32 = vadd.f32 %v4115_v14, %v319_v19 }
  0xec   : > { %611 = vrot.lane.b32.xlu1 %v5225_v20, %s5151_s6  ;;  %547 = vrot.lane.b32.xlu0 %v5225_v20, %s5152_s7  ;;  %v5267_v31 = vmul.f32 %v5259_v30, %v5259_v30 }
  0xed   : > { %v5285_v33 = vmul.f32 %v5277_v32, %v5277_v32 }
  0xef   : > { %v4335_v21 = vpop.f32.mrb[4].mxu0 }
  0xf0   : > { %803 = vrot.lane.b32.xlu1 %v5225_v20, %s5153_s8  ;;  %739 = vrot.lane.b32.xlu0 %v5225_v20, %s5154_s9  ;;  %v332_v22 = vpop.f32.mrb[5].mxu0  ;;  %v5299_v34 = vadd.f32 %v4335_v21, %v4115_v14 }
  0xf1   : > { %v5235_v23 = vadd.f32 %v4115_v14, %v332_v22  ;;  %v4336_v24 = vpop.f32.mrb[6].mxu0 }
  0xf2   : > { %v5239_v26 = vadd.f32 %v4336_v24, %v4115_v14  ;;  %v335_v27 = vpop.f32.mrb[7].mxu0  ;;  %v5311_v35 = vmul.f32 %v5299_v34, %v5299_v34 }
  0xf3   : > { %v5241_v28 = vadd.f32 %v4115_v14, %v335_v27  ;;  %v5327_v36 = vmul.f32 %v5235_v23, %v5235_v23  ;;  %v5158_v27 = vmov 1  }
  0xf4   : > { %995 = vrot.lane.b32.xlu1 %v5225_v20, %s5155_s10  ;;  %931 = vrot.lane.b32.xlu0 %v5225_v20, %s5156_s11  ;;  %v5343_v37 = vmul.f32 %v5239_v26, %v5239_v26 }
  0xf5   : > { %v5363_v38 = vmul.f32 %v5241_v28, %v5241_v28  ;;  %4666 = vset.pattern.permute.xlu1 %v5158_v27 }
  0xf8   : > { %409 = vrot.lane.b32.xlu1 %v5225_v20, %s5157_s12  ;;  %543 = vrot.lane.b32.xlu0 %v5249_v29, %s5152_s7 }
  0xfc   : > { %799 = vrot.lane.b32.xlu1 %v5249_v29, %s5153_s8  ;;  %607 = vrot.lane.b32.xlu0 %v5249_v29, %s5151_s6 }
 0x100   : > { %991 = vrot.lane.b32.xlu1 %v5249_v29, %s5155_s10  ;;  %735 = vrot.lane.b32.xlu0 %v5249_v29, %s5154_s9 }
 0x104   : > { %549 = vrot.lane.b32.xlu1 %v5267_v31, %s5152_s7  ;;  %927 = vrot.lane.b32.xlu0 %v5249_v29, %s5156_s11 }
 0x108   : > { %741 = vrot.lane.b32.xlu1 %v5267_v31, %s5154_s9  ;;  %405 = vrot.lane.b32.xlu0 %v5249_v29, %s5157_s12 }
 0x10c   : > { %933 = vrot.lane.b32.xlu1 %v5267_v31, %s5156_s11  ;;  %613 = vrot.lane.b32.xlu0 %v5267_v31, %s5151_s6 }
 0x110   : > { %609 = vrot.lane.b32.xlu1 %v5285_v33, %s5151_s6  ;;  %805 = vrot.lane.b32.xlu0 %v5267_v31, %s5153_s8 }
 0x114   : > { %545 = vrot.lane.b32.xlu1 %v5285_v33, %s5152_s7  ;;  %997 = vrot.lane.b32.xlu0 %v5267_v31, %s5155_s10 }
 0x118   : > { %737 = vrot.lane.b32.xlu1 %v5285_v33, %s5154_s9  ;;  %411 = vrot.lane.b32.xlu0 %v5267_v31, %s5157_s12 }
 0x11c   : > { %929 = vrot.lane.b32.xlu1 %v5285_v33, %s5156_s11  ;;  %801 = vrot.lane.b32.xlu0 %v5285_v33, %s5153_s8 }
 0x120   : > { %407 = vrot.lane.b32.xlu1 %v5285_v33, %s5157_s12  ;;  %993 = vrot.lane.b32.xlu0 %v5285_v33, %s5155_s10 }
 0x124   : > { %619 = vrot.lane.b32.xlu1 %v5311_v35, %s5151_s6  ;;  %555 = vrot.lane.b32.xlu0 %v5311_v35, %s5152_s7 }
 0x128   : > { %811 = vrot.lane.b32.xlu1 %v5311_v35, %s5153_s8  ;;  %747 = vrot.lane.b32.xlu0 %v5311_v35, %s5154_s9 }
 0x12c   : > { %1003 = vrot.lane.b32.xlu1 %v5311_v35, %s5155_s10  ;;  %939 = vrot.lane.b32.xlu0 %v5311_v35, %s5156_s11 }
 0x130   : > { %417 = vrot.lane.b32.xlu1 %v5311_v35, %s5157_s12  ;;  %551 = vrot.lane.b32.xlu0 %v5327_v36, %s5152_s7 }
 0x134   : > { %615 = vrot.lane.b32.xlu1 %v5327_v36, %s5151_s6  ;;  %743 = vrot.lane.b32.xlu0 %v5327_v36, %s5154_s9 }
 0x138   : > { %807 = vrot.lane.b32.xlu1 %v5327_v36, %s5153_s8  ;;  %935 = vrot.lane.b32.xlu0 %v5327_v36, %s5156_s11 }
 0x13c   : > { %999 = vrot.lane.b32.xlu1 %v5327_v36, %s5155_s10  ;;  %621 = vrot.lane.b32.xlu0 %v5343_v37, %s5151_s6 }
 0x140   : > { %413 = vrot.lane.b32.xlu1 %v5327_v36, %s5157_s12  ;;  %813 = vrot.lane.b32.xlu0 %v5343_v37, %s5153_s8 }
 0x144   : > { %557 = vrot.lane.b32.xlu1 %v5343_v37, %s5152_s7  ;;  %1005 = vrot.lane.b32.xlu0 %v5343_v37, %s5155_s10 }
 0x148   : > { %749 = vrot.lane.b32.xlu1 %v5343_v37, %s5154_s9  ;;  %419 = vrot.lane.b32.xlu0 %v5343_v37, %s5157_s12 }
 0x14c   : > { %941 = vrot.lane.b32.xlu1 %v5343_v37, %s5156_s11  ;;  %617 = vrot.lane.b32.xlu0 %v5363_v38, %s5151_s6 }
 0x150   : > { %553 = vrot.lane.b32.xlu1 %v5363_v38, %s5152_s7  ;;  %809 = vrot.lane.b32.xlu0 %v5363_v38, %s5153_s8 }
 0x154   : > { %745 = vrot.lane.b32.xlu1 %v5363_v38, %s5154_s9  ;;  %1001 = vrot.lane.b32.xlu0 %v5363_v38, %s5155_s10 }
 0x158   : > { %937 = vrot.lane.b32.xlu1 %v5363_v38, %s5156_s11  ;;  %415 = vrot.lane.b32.xlu0 %v5363_v38, %s5157_s12 }
 0x15e   : > { %v612_v39 = vpop.permute.xlu1 %611  ;;  %v548_v40 = vpop.permute.xlu0 %547 }
 0x15f   : > { %v637_v53 = vsel %vm356_vm1, %v612_v39, 0.0  ;;  %v573_v57 = vsel %vm356_vm1, %v548_v40, 0.0 }
 0x162   : > { %v804_v41 = vpop.permute.xlu1 %803  ;;  %v740_v42 = vpop.permute.xlu0 %739 }
 0x163   : > { %v829_v56 = vsel %vm356_vm1, %v804_v41, 0.0  ;;  %v765_v61 = vsel %vm356_vm1, %v740_v42, 0.0 }
 0x166   : > { %v996_v43 = vpop.permute.xlu1 %995  ;;  %v932_v44 = vpop.permute.xlu0 %931 }
 0x167   : > { %v1021_v60 = vsel %vm356_vm1, %v996_v43, 0.0  ;;  %v957_v1 = vsel %vm356_vm1, %v932_v44, 0.0 }
 0x16a   : > { %v5381_v45 = vpop.permute.xlu1 %409  ;;  %v544_v46 = vpop.permute.xlu0 %543 }
 0x16b   : > { %v567_v0 = vsel %vm356_vm1, %v544_v46, 0.0 }
 0x16e   : > { %v800_v47 = vpop.permute.xlu1 %799  ;;  %v608_v48 = vpop.permute.xlu0 %607 }
 0x16f   : > { %v823_v4 = vsel %vm356_vm1, %v800_v47, 0.0  ;;  %v631_v5 = vsel %vm356_vm1, %v608_v48, 0.0 }
 0x172   : > { %v992_v49 = vpop.permute.xlu1 %991  ;;  %v736_v50 = vpop.permute.xlu0 %735 }
 0x173   : > { %v1015_v8 = vsel %vm356_vm1, %v992_v49, 0.0  ;;  %v759_v9 = vsel %vm356_vm1, %v736_v50, 0.0 }
 0x176   : > { %v550_v51 = vpop.permute.xlu1 %549  ;;  %v928_v52 = vpop.permute.xlu0 %927 }
 0x177   : > { %638 = vadd.xlane.f32.xlu0 %v637_v53  ;;  %v576_v12 = vsel %vm356_vm1, %v550_v51, 0.0  ;;  %v951_v13 = vsel %vm356_vm1, %v928_v52, 0.0 }
 0x17a   : > { %v742_v54 = vpop.permute.xlu1 %741  ;;  %v5384_v55 = vpop.permute.xlu0 %405 }
 0x17b   : > { %830 = vadd.xlane.f32.xlu0 %v829_v56  ;;  %v768_v17 = vsel %vm356_vm1, %v742_v54, 0.0 }
 0x17c   : > { %574 = vadd.xlane.f32.xlu1 %v573_v57  ;;  %v5159_v57 = vmov 2  }
 0x17d   : > { %4667 = vset.pattern.permute.xlu0 %v5159_v57 }
 0x17e   : > { %v934_v58 = vpop.permute.xlu1 %933  ;;  %v614_v59 = vpop.permute.xlu0 %613 }
 0x17f   : > { %1022 = vadd.xlane.f32.xlu0 %v1021_v60  ;;  %v640_v18 = vsel %vm356_vm1, %v614_v59, 0.0  ;;  %v960_v22 = vsel %vm356_vm1, %v934_v58, 0.0 }
 0x180   : > { %766 = vadd.xlane.f32.xlu1 %v765_v61 }
 0x182   : > { %v610_v62 = vpop.permute.xlu1 %609  ;;  %v806_v63 = vpop.permute.xlu0 %805 }
 0x183   : > { %568 = vadd.xlane.f32.xlu0 %v567_v0  ;;  %v832_v24 = vsel %vm356_vm1, %v806_v63, 0.0  ;;  %v634_v41 = vsel %vm356_vm1, %v610_v62, 0.0 }
 0x184   : > { %958 = vadd.xlane.f32.xlu1 %v957_v1 }
 0x186   : > { %v546_v2 = vpop.permute.xlu1 %545  ;;  %v998_v3 = vpop.permute.xlu0 %997 }
 0x187   : > { %824 = vadd.xlane.f32.xlu0 %v823_v4  ;;  %v1024_v42 = vsel %vm356_vm1, %v998_v3, 0.0  ;;  %v570_v46 = vsel %vm356_vm1, %v546_v2, 0.0 }
 0x188   : > { %632 = vadd.xlane.f32.xlu1 %v631_v5 }
 0x18a   : > { %v738_v6 = vpop.permute.xlu1 %737  ;;  %v5394_v7 = vpop.permute.xlu0 %411 }
 0x18b   : > { %1016 = vadd.xlane.f32.xlu0 %v1015_v8  ;;  %v762_v50 = vsel %vm356_vm1, %v738_v6, 0.0 }
 0x18c   : > { %760 = vadd.xlane.f32.xlu1 %v759_v9 }
 0x18e   : > { %v930_v10 = vpop.permute.xlu1 %929  ;;  %v802_v11 = vpop.permute.xlu0 %801 }
 0x18f   : > { %577 = vadd.xlane.f32.xlu0 %v576_v12  ;;  %v826_v47 = vsel %vm356_vm1, %v802_v11, 0.0  ;;  %v954_v54 = vsel %vm356_vm1, %v930_v10, 0.0 }
 0x190   : > { %952 = vadd.xlane.f32.xlu1 %v951_v13 }
 0x192   : > { %v5400_v14 = vpop.permute.xlu1 %407  ;;  %v994_v15 = vpop.permute.xlu0 %993 }
 0x193   : > { %769 = vadd.xlane.f32.xlu0 %v768_v17  ;;  %v1018_v51 = vsel %vm356_vm1, %v994_v15, 0.0 }
 0x194   : > { %641 = vadd.xlane.f32.xlu1 %v640_v18 }
 0x196   : > { %v620_v19 = vpop.permute.xlu1 %619  ;;  %v556_v21 = vpop.permute.xlu0 %555 }
 0x197   : > { %961 = vadd.xlane.f32.xlu0 %v960_v22  ;;  %v585_v56 = vsel %vm356_vm1, %v556_v21, 0.0  ;;  %v649_v60 = vsel %vm356_vm1, %v620_v19, 0.0 }
 0x198   : > { %833 = vadd.xlane.f32.xlu1 %v832_v24 }
 0x19a   : > { %v5407_v39 = vpop.permute.xlu1 %811  ;;  %v5409_v40 = vpop.permute.xlu0 %747 }
 0x19b   : > { %635 = vadd.xlane.f32.xlu0 %v634_v41 }
 0x19c   : > { %1025 = vadd.xlane.f32.xlu1 %v1024_v42 }
 0x19e   : > { %v5413_v43 = vpop.permute.xlu1 %1003  ;;  %v5415_v44 = vpop.permute.xlu0 %939 }
 0x19f   : > { %571 = vadd.xlane.f32.xlu0 %v570_v46 }
 0x1a0   : > { %827 = vadd.xlane.f32.xlu1 %v826_v47 }
 0x1a2   : > { %v5419_v48 = vpop.permute.xlu1 %417  ;;  %v552_v49 = vpop.permute.xlu0 %551 }
 0x1a3   : > { %763 = vadd.xlane.f32.xlu0 %v762_v50  ;;  %v579_v61 = vsel %vm356_vm1, %v552_v49, 0.0 }
 0x1a4   : > { %1019 = vadd.xlane.f32.xlu1 %v1018_v51  ;;  %v429_v51 = vsel %vm356_vm1, %v5384_v55, 0.0  ;;  %v841_v55 = vsel %vm356_vm1, %v5407_v39, 0.0 }
 0x1a6   : > { %v616_v52 = vpop.permute.xlu1 %615  ;;  %v744_v53 = vpop.permute.xlu0 %743 }
 0x1a7   : > { %955 = vadd.xlane.f32.xlu0 %v954_v54  ;;  %v643_v0 = vsel %vm356_vm1, %v616_v52, 0.0  ;;  %v771_v1 = vsel %vm356_vm1, %v744_v53, 0.0  ;;  %v432_v52 = vsel %vm356_vm1, %v5400_v14, 0.0  ;;  %v357_v53 = vsel %vm356_vm1, %v5249_v29, 0.0 }
 0x1a8   : > { %586 = vadd.xlane.f32.xlu1 %v585_v56  ;;  %v360_v54 = vsel %vm356_vm1, %v5285_v33, 0.0  ;;  %v777_v56 = vsel %vm356_vm1, %v5409_v40, 0.0  ;;  %v969_v29 = vsel %vm356_vm1, %v5415_v44, 0.0  ;;  %v1033_v33 = vsel %vm356_vm1, %v5413_v43, 0.0 }
 0x1a9   : > { %v438_v44 = vsel %vm356_vm1, %v5394_v7, 0.0  ;;  %v366_v43 = vsel %vm356_vm1, %v5267_v31, 0.0 }
 0x1aa   : > { %v808_v58 = vpop.permute.xlu1 %807  ;;  %v936_v59 = vpop.permute.xlu0 %935 }
 0x1ab   : > { %650 = vadd.xlane.f32.xlu0 %v649_v60  ;;  %v835_v4 = vsel %vm356_vm1, %v808_v58, 0.0  ;;  %v963_v5 = vsel %vm356_vm1, %v936_v59, 0.0  ;;  %v363_v59 = vsel %vm356_vm1, %v5225_v20, 0.0  ;;  %v435_v60 = vsel %vm356_vm1, %v5381_v45, 0.0 }
 0x1ac   : > { %580 = vadd.xlane.f32.xlu1 %v579_v61  ;;  %v369_v61 = vsel %vm356_vm1, %v5327_v36, 0.0 }
 0x1ae   : > { %v1000_v62 = vpop.permute.xlu1 %999  ;;  %v622_v63 = vpop.permute.xlu0 %621 }
 0x1af   : > { %644 = vadd.xlane.f32.xlu0 %v643_v0  ;;  %v1027_v9 = vsel %vm356_vm1, %v1000_v62, 0.0  ;;  %v652_v10 = vsel %vm356_vm1, %v622_v63, 0.0  ;;  %v372_v62 = vsel %vm356_vm1, %v5363_v38, 0.0 }
 0x1b0   : > { %772 = vadd.xlane.f32.xlu1 %v771_v1 }
 0x1b2   : > { %v5430_v2 = vpop.permute.xlu1 %413  ;;  %v814_v3 = vpop.permute.xlu0 %813 }
 0x1b3   : > { %836 = vadd.xlane.f32.xlu0 %v835_v4  ;;  %v844_v58 = vsel %vm356_vm1, %v814_v3, 0.0  ;;  %v441_v20 = vsel %vm356_vm1, %v5430_v2, 0.0 }
 0x1b4   : > { %964 = vadd.xlane.f32.xlu1 %v963_v5 }
 0x1b6   : > { %v558_v6 = vpop.permute.xlu1 %557  ;;  %v1006_v8 = vpop.permute.xlu0 %1005 }
 0x1b7   : > { %1028 = vadd.xlane.f32.xlu0 %v1027_v9  ;;  %v588_v13 = vsel %vm356_vm1, %v558_v6, 0.0  ;;  %v1036_v40 = vsel %vm356_vm1, %v1006_v8, 0.0  ;;  %v5491_v6 = vld [vmem:[%s6605_s4] ss:$0 sm:$0xff] }
 0x1b8   : > { %653 = vadd.xlane.f32.xlu1 %v652_v10 }
 0x1ba   : > { %v750_v11 = vpop.permute.xlu1 %749  ;;  %v5436_v12 = vpop.permute.xlu0 %419 }
 0x1bb   : > { %589 = vadd.xlane.f32.xlu0 %v588_v13  ;;  %v780_v14 = vsel %vm356_vm1, %v750_v11, 0.0 }
 0x1be   : > { %v942_v15 = vpop.permute.xlu1 %941  ;;  %v618_v17 = vpop.permute.xlu0 %617 }
 0x1bf   : > { %v646_v18 = vsel %vm356_vm1, %v618_v17, 0.0  ;;  %v972_v39 = vsel %vm356_vm1, %v942_v15, 0.0 }
 0x1c0   : > { %647 = vadd.xlane.f32.xlu1 %v646_v18 }
 0x1c2   : > { %v554_v19 = vpop.permute.xlu1 %553  ;;  %v810_v21 = vpop.permute.xlu0 %809 }
 0x1c3   : > { %v582_v22 = vsel %vm356_vm1, %v554_v19, 0.0  ;;  %v838_v24 = vsel %vm356_vm1, %v810_v21, 0.0 }
 0x1c4   : > { %583 = vadd.xlane.f32.xlu0 %v582_v22  ;;  %839 = vadd.xlane.f32.xlu1 %v838_v24 }
 0x1c6   : > { %v746_v41 = vpop.permute.xlu1 %745  ;;  %v1002_v42 = vpop.permute.xlu0 %1001 }
 0x1c7   : > { %v774_v46 = vsel %vm356_vm1, %v746_v41, 0.0  ;;  %v1030_v47 = vsel %vm356_vm1, %v1002_v42, 0.0 }
 0x1c8   : > { %775 = vadd.xlane.f32.xlu0 %v774_v46  ;;  %1031 = vadd.xlane.f32.xlu1 %v1030_v47 }
 0x1ca   : > { %v938_v49 = vpop.permute.xlu1 %937  ;;  %v416_v45 = vpop.permute.xlu0 %415 }
 0x1cb   : > { %v966_v50 = vsel %vm356_vm1, %v938_v49, 0.0  ;;  %v444_v7 = vsel %vm356_vm1, %v416_v45, 0.0 }
 0x1cc   : > { %967 = vadd.xlane.f32.xlu0 %v966_v50  ;;  %430 = vadd.xlane.f32.xlu1 %v429_v51  ;;  %v5160_v50 = vmov 3  }
 0x1d0   : > { %433 = vadd.xlane.f32.xlu0 %v432_v52  ;;  %358 = vadd.xlane.f32.xlu1 %v357_v53 }
 0x1d4   : > { %361 = vadd.xlane.f32.xlu0 %v360_v54  ;;  %778 = vadd.xlane.f32.xlu1 %v777_v56 }
 0x1d8   : > { %842 = vadd.xlane.f32.xlu0 %v841_v55  ;;  %845 = vadd.xlane.f32.xlu1 %v844_v58 }
 0x1dc   : > { %781 = vadd.xlane.f32.xlu0 %v780_v14  ;;  %970 = vadd.xlane.f32.xlu1 %v969_v29 }
 0x1e0   : > { %1034 = vadd.xlane.f32.xlu0 %v1033_v33  ;;  %1037 = vadd.xlane.f32.xlu1 %v1036_v40 }
 0x1e4   : > { %973 = vadd.xlane.f32.xlu0 %v972_v39  ;;  %364 = vadd.xlane.f32.xlu1 %v363_v59 }
 0x1e8   : > { %436 = vadd.xlane.f32.xlu0 %v435_v60  ;;  %439 = vadd.xlane.f32.xlu1 %v438_v44 }
 0x1ec   : > { %367 = vadd.xlane.f32.xlu0 %v366_v43  ;;  %370 = vadd.xlane.f32.xlu1 %v369_v61 }
 0x1f0   : > { %442 = vadd.xlane.f32.xlu0 %v441_v20  ;;  %373 = vadd.xlane.f32.xlu1 %v372_v62 }
 0x1f4   : > { %445 = vadd.xlane.f32.xlu0 %v444_v7 }
 0x204   : > { %v639_v63 = vpop.xlane.xlu0 %638 }
 0x205   : > { %v657_v21 = vmax.f32 %v639_v63, 1e-24 }
 0x208   : > { %v5480_v0 = vpop.xlane.xlu0 %830 }
 0x209   : > { %v575_v31 = vpop.xlane.xlu1 %574 }
 0x20a   : > { %v593_v1 = vmax.f32 %v575_v31, 1e-24 }
 0x20c   : > { %4887 = vrsqrt.f32 %v593_v1  ;;  %v5482_v36 = vpop.xlane.xlu0 %1022 }
 0x20d   : > { %v5484_v3 = vpop.xlane.xlu1 %766 }
 0x210   : > { %v569_v2 = vpop.xlane.xlu0 %568 }
 0x211   : > { %v591_v4 = vmax.f32 %v569_v2, 1e-24  ;;  %v5486_v5 = vpop.xlane.xlu1 %958 }
 0x213   : > { %4889 = vrsqrt.f32 %v591_v4 }
 0x214   : > { %v825_v38 = vpop.xlane.xlu0 %824 }
 0x215   : > { %v633_v8 = vpop.xlane.xlu1 %632  ;;  %v847_v29 = vmax.f32 %v825_v38, 1e-24 }
 0x216   : > { %v4888_v9 = vpop.eup %4887  ;;  %v655_v51 = vmax.f32 %v633_v8, 1e-24 }
 0x217   : > { %v673_v10 = vmul.f32 %v4888_v9, %v5491_v6 }
 0x218   : > { %v1017_v11 = vpop.xlane.xlu0 %1016 }
 0x219   : > { %v761_v13 = vpop.xlane.xlu1 %760  ;;  %691 = vperm.xlu1 %4666, %v673_v10   ;;  %v1039_v43 = vmax.f32 %v1017_v11, 1e-24 }
 0x21a   : > { %v783_v15 = vmax.f32 %v761_v13, 1e-24 }
 0x21c   : > { %4891 = vrsqrt.f32 %v783_v15  ;;  %v578_v17 = vpop.xlane.xlu0 %577 }
 0x21d   : > { %v4890_v18 = vpop.eup %4889  ;;  %v953_v19 = vpop.xlane.xlu1 %952  ;;  %v594_v47 = vmax.f32 %v578_v17, 1e-24 }
 0x21e   : > { %v975_v22 = vmax.f32 %v953_v19, 1e-24  ;;  %v671_v24 = vmul.f32 %v4890_v18, %v5491_v6 }
 0x220   : > { %4893 = vrsqrt.f32 %v975_v22  ;;  %v5495_v41 = vpop.xlane.xlu0 %769  ;;  %681 = vperm.xlu1 %4666, %v671_v24  }
 0x221   : > { %v642_v42 = vpop.xlane.xlu1 %641  ;;  %4895 = vrsqrt.f32 %v657_v21 }
 0x222   : > { %v658_v46 = vmax.f32 %v642_v42, 1e-24 }
 0x224   : > { %4897 = vrsqrt.f32 %v658_v46  ;;  %v5497_v49 = vpop.xlane.xlu0 %961  ;;  %4668 = vset.pattern.permute.xlu1 %v5160_v50 }
 0x225   : > { %v5500_v52 = vpop.xlane.xlu1 %833  ;;  %4899 = vrsqrt.f32 %v594_v47 }
 0x226   : > { %v4892_v53 = vpop.eup %4891  ;;  %4901 = vrsqrt.f32 %v655_v51 }
 0x227   : > { %v863_v54 = vmul.f32 %v4892_v53, %v5491_v6 }
 0x228   : > { %v636_v56 = vpop.xlane.xlu0 %635 }
 0x229   : > { %v656_v55 = vmax.f32 %v636_v56, 1e-24  ;;  %v5503_v58 = vpop.xlane.xlu1 %1025  ;;  %873 = vperm.xlu0 %4667, %v863_v54  }
 0x22a   : > { %v4894_v14 = vpop.eup %4893 }
 0x22b   : > { %4903 = vrsqrt.f32 %v656_v55  ;;  %v1055_v33 = vmul.f32 %v4894_v14, %v5491_v6  ;;  %v4896_v40 = vpop.eup %4895 }
 0x22c   : > { %v572_v39 = vpop.xlane.xlu0 %571  ;;  %4905 = vrsqrt.f32 %v847_v29  ;;  %v729_v20 = vmul.f32 %v4896_v40, %v5221_v16 }
 0x22d   : > { %v592_v59 = vmax.f32 %v572_v39, 1e-24  ;;  %v828_v60 = vpop.xlane.xlu1 %827  ;;  %1065 = vperm.xlu1 %4668, %v1055_v33   ;;  %4703 = vset.pattern.permute.xlu0 %v5158_v27 }
 0x22e   : > { %v4898_v44 = vpop.eup %4897  ;;  %v848_v61 = vmax.f32 %v828_v60, 1e-24 }
 0x22f   : > { %4907 = vrsqrt.f32 %v592_v59  ;;  %v730_v62 = vmul.f32 %v4898_v44, %v5259_v30  ;;  %v4900_v31 = vpop.eup %4899 }
 0x230   : > { %4909 = vrsqrt.f32 %v848_v61  ;;  %v5509_v45 = vpop.xlane.xlu0 %763  ;;  %v4902_v2 = vpop.eup %4901  ;;  %v674_v9 = vmul.f32 %v4900_v31, %v5491_v6 }
 0x231   : > { %v1020_v7 = vpop.xlane.xlu1 %1019  ;;  %v4669_v63 = vpack.i.bf16 %v730_v62, %v729_v20  ;;  %4674 = vset.pattern.permute.xlu1 %v5158_v27  ;;  %4911 = vrsqrt.f32 %v1039_v43  ;;  %v727_v10 = vmul.f32 %v4902_v2, %v5237_v25  ;;  %v375_v62 = vsel %vm356_vm1, %v5311_v35, 0.0 }
 0x232   : > { %v1040_v1 = vmax.f32 %v1020_v7, 1e-24  ;;  %v450_v7 = vsel %vm356_vm1, %v5436_v12, 0.0  ;;  %v378_v2 = vsel %vm356_vm1, %v5343_v37, 0.0  ;;  %v1042_v35 = vmax.f32 %v5503_v58, 1e-24 }
 0x233   : > { %4670 = vrot.lane.b32.xlu1 %v4669_v63, %s5152_s7  ;;  %v1041_v12 = vmax.f32 %v5482_v36, 1e-24  ;;  %v447_v37 = vsel %vm356_vm1, %v5419_v48, 0.0 }
 0x234   : > { %4913 = vrsqrt.f32 %v1040_v1  ;;  %v956_v4 = vpop.xlane.xlu0 %955  ;;  %v850_v1 = vmax.f32 %v5500_v52, 1e-24  ;;  %v784_v52 = vmax.f32 %v5509_v45, 1e-24 }
 0x235   : > { %v4904_v38 = vpop.eup %4903  ;;  %v976_v8 = vmax.f32 %v956_v4, 1e-24  ;;  %v587_v46 = vpop.xlane.xlu1 %586  ;;  %v849_v4 = vmax.f32 %v5480_v0, 1e-24 }
 0x236   : > { %v728_v11 = vmul.f32 %v4904_v38, %v5277_v32  ;;  %v4906_v13 = vpop.eup %4905  ;;  %v597_v58 = vmax.f32 %v587_v46, 1e-24 }
 0x237   : > { %696 = vperm.xlu1 %4674, %v674_v9   ;;  %4915 = vrsqrt.f32 %v976_v8  ;;  %v919_v22 = vmul.f32 %v4906_v13, %v5237_v25  ;;  %v785_v13 = vmax.f32 %v5484_v3, 1e-24 }
 0x238   : > { %v4675_v15 = vpack.i.bf16 %v728_v11, %v727_v10  ;;  %v5518_v21 = vpop.xlane.xlu0 %650  ;;  %4917 = vrsqrt.f32 %v850_v1 }
 0x239   : > { %v4908_v17 = vpop.eup %4907  ;;  %v581_v14 = vpop.xlane.xlu1 %580  ;;  %4919 = vrsqrt.f32 %v849_v4 }
 0x23a   : > { %v4910_v18 = vpop.eup %4909  ;;  %4676 = vrot.lane.b32.xlu0 %v4675_v15, %s5152_s7  ;;  %v672_v19 = vmul.f32 %v4908_v17, %v5491_v6  ;;  %4921 = vrsqrt.f32 %v1042_v35  ;;  %v595_v0 = vmax.f32 %v581_v14, 1e-24 }
 0x23b   : > { %v920_v24 = vmul.f32 %v4910_v18, %v5277_v32  ;;  %v4912_v42 = vpop.eup %4911  ;;  %4923 = vrsqrt.f32 %v1041_v12 }
 0x23c   : > { %686 = vperm.xlu1 %4674, %v672_v19   ;;  %v1111_v53 = vmul.f32 %v4912_v42, %v5237_v25  ;;  %v5525_v56 = vpop.xlane.xlu0 %644  ;;  %4925 = vrsqrt.f32 %v784_v52  ;;  %v786_v19 = vmax.f32 %v5495_v41, 1e-24  ;;  %v977_v41 = vmax.f32 %v5486_v5, 1e-24 }
 0x23d   : > { %v4680_v47 = vpack.i.bf16 %v920_v24, %v919_v22  ;;  %v5532_v39 = vpop.xlane.xlu1 %772  ;;  %4927 = vrsqrt.f32 %v595_v0  ;;  %v659_v5 = vmax.f32 %v5525_v56, 1e-24 }
 0x23e   : > { %v4914_v51 = vpop.eup %4913  ;;  %4929 = vrsqrt.f32 %v785_v13  ;;  %v787_v12 = vmax.f32 %v5532_v39, 1e-24 }
 0x23f   : > { %v1112_v54 = vmul.f32 %v4914_v51, %v5277_v32  ;;  %4931 = vrsqrt.f32 %v597_v58 }
 0x240   : > { %4681 = vrot.lane.b32.xlu1 %v4680_v47, %s5154_s9  ;;  %v5530_v40 = vpop.xlane.xlu0 %836 }
 0x241   : > { %v4685_v55 = vpack.i.bf16 %v1112_v54, %v1111_v53  ;;  %4690 = vset.pattern.permute.xlu1 %v5160_v50  ;;  %v4916_v29 = vpop.eup %4915  ;;  %v5537_v60 = vpop.xlane.xlu1 %964 }
 0x242   : > { %v1056_v33 = vmul.f32 %v4916_v29, %v5491_v6  ;;  %v4918_v11 = vpop.eup %4917 }
 0x243   : > { %v4920_v17 = vpop.eup %4919  ;;  %v922_v45 = vmul.f32 %v4918_v11, %v5259_v30 }
 0x244   : > { %4686 = vrot.lane.b32.xlu1 %v4685_v55, %s5156_s11  ;;  %v5535_v59 = vpop.xlane.xlu0 %1028  ;;  %v4922_v22 = vpop.eup %4921  ;;  %v921_v24 = vmul.f32 %v4920_v17, %v5221_v16 }
 0x245   : > { %v5541_v43 = vpop.xlane.xlu1 %653  ;;  %v4924_v42 = vpop.eup %4923  ;;  %v1114_v47 = vmul.f32 %v4922_v22, %v5259_v30 }
 0x246   : > { %v4692_v46 = vpack.i.bf16 %v922_v45, %v921_v24  ;;  %v1113_v53 = vmul.f32 %v4924_v42, %v5221_v16  ;;  %v4926_v54 = vpop.eup %4925  ;;  %v5161_v42 = vmov 0  }
 0x247   : > { %v4928_v29 = vpop.eup %4927  ;;  %v864_v1 = vmul.f32 %v4926_v54, %v5491_v6 }
 0x248   : > { %1070 = vperm.xlu1 %4690, %v1056_v33   ;;  %v5539_v44 = vpop.xlane.xlu0 %589  ;;  %v4698_v14 = vpack.i.bf16 %v1114_v47, %v1113_v53  ;;  %v978_v33 = vmax.f32 %v5497_v49, 1e-24  ;;  %v675_v49 = vmul.f32 %v4928_v29, %v5491_v6 }
 0x24c   : > { %4691 = vset.pattern.permute.xlu1 %v5159_v57 }
 0x24d   : > { %v5545_v20 = vpop.xlane.xlu1 %647 }
 0x251   : > { %v5543_v61 = vpop.xlane.xlu0 %583  ;;  %v5553_v31 = vpop.xlane.xlu1 %839 }
 0x252   : > { %v852_v11 = vmax.f32 %v5553_v31, 1e-24  ;;  %v596_v58 = vmax.f32 %v5543_v61, 1e-24 }
 0x255   : > { %v5551_v63 = vpop.xlane.xlu0 %775  ;;  %v5562_v8 = vpop.xlane.xlu1 %1031 }
 0x256   : > { %v1044_v47 = vmax.f32 %v5562_v8, 1e-24 }
 0x259   : > { %376 = vadd.xlane.f32.xlu0 %v375_v62  ;;  %v5559_v38 = vpop.xlane.xlu0 %967  ;;  %v431_v10 = vpop.xlane.xlu1 %430  ;;  %v660_v62 = vmax.f32 %v5545_v20, 1e-24 }
 0x25a   : > { %v453_v48 = vmax.f32 %v431_v10, 1e-24 }
 0x25d   : > { %451 = vadd.xlane.f32.xlu0 %v450_v7  ;;  %v434_v9 = vpop.xlane.xlu0 %433  ;;  %v5569_v18 = vpop.xlane.xlu1 %358 }
 0x25e   : > { %v454_v36 = vmax.f32 %v434_v9, 1e-24 }
 0x260   : > { %4933 = vrsqrt.f32 %v454_v36 }
 0x261   : > { %379 = vadd.xlane.f32.xlu0 %v378_v2  ;;  %v362_v15 = vpop.xlane.xlu0 %361  ;;  %4935 = vrsqrt.f32 %v786_v19  ;;  %v5577_v51 = vpop.xlane.xlu1 %778  ;;  %v851_v19 = vmax.f32 %v5530_v40, 1e-24 }
 0x262   : > { %4937 = vrsqrt.f32 %v453_v48  ;;  %v382_v55 = vmax.f32 %v362_v15, 1e-24  ;;  %v4930_v2 = vpop.eup %4929  ;;  %v979_v48 = vmax.f32 %v5537_v60, 1e-24 }
 0x263   : > { %4939 = vrsqrt.f32 %v977_v41  ;;  %v4932_v35 = vpop.eup %4931  ;;  %v865_v52 = vmul.f32 %v4930_v2, %v5491_v6 }
 0x264   : > { %4941 = vrsqrt.f32 %v382_v55  ;;  %v677_v0 = vmul.f32 %v4932_v35, %v5491_v6  ;;  %v788_v55 = vmax.f32 %v5551_v63, 1e-24 }
 0x265   : > { %v5574_v3 = vpop.xlane.xlu0 %842  ;;  %v5587_v4 = vpop.xlane.xlu1 %845  ;;  %4943 = vrsqrt.f32 %v978_v33  ;;  %v1043_v33 = vmax.f32 %v5535_v59, 1e-24  ;;  %v662_v59 = vmax.f32 %v5541_v43, 1e-24 }
 0x266   : > { %4945 = vrsqrt.f32 %v660_v62 }
 0x267   : > { %4947 = vrsqrt.f32 %v659_v5 }
 0x268   : > { %4949 = vrsqrt.f32 %v787_v12 }
 0x269   : > { %v782_v7 = vpop.xlane.xlu0 %781  ;;  %v5597_v13 = vpop.xlane.xlu1 %970 }
 0x26a   : > { %v4934_v9 = vpop.eup %4933  ;;  %v790_v56 = vmax.f32 %v782_v7, 1e-24 }
 0x26b   : > { %v4936_v20 = vpop.eup %4935  ;;  %v532_v39 = vmul.f32 %v4934_v9, %v5277_v32 }
 0x26c   : > { %448 = vadd.xlane.f32.xlu1 %v447_v37  ;;  %v4938_v10 = vpop.eup %4937  ;;  %v866_v15 = vmul.f32 %v4936_v20, %v5491_v6  ;;  %4951 = vrsqrt.f32 %v790_v56  ;;  %v661_v56 = vmax.f32 %v5518_v21, 1e-24 }
 0x26d   : > { %v5592_v37 = vpop.xlane.xlu0 %1034  ;;  %v531_v17 = vmul.f32 %v4938_v10, %v5237_v25  ;;  %v4940_v36 = vpop.eup %4939  ;;  %4953 = vrsqrt.f32 %v852_v11 }
 0x26e   : > { %v4942_v22 = vpop.eup %4941  ;;  %4955 = vrsqrt.f32 %v596_v58  ;;  %v5605_v24 = vpop.xlane.xlu1 %1037 }
 0x26f   : > { %v4728_v45 = vpack.i.bf16 %v532_v39, %v531_v17  ;;  %v4944_v61 = vpop.eup %4943  ;;  %4957 = vrsqrt.f32 %v851_v19  ;;  %v476_v60 = vmul.f32 %v4942_v22, %v5491_v6  ;;  %v598_v17 = vmax.f32 %v5539_v44, 1e-24 }
 0x270   : > { %v4946_v40 = vpop.eup %4945  ;;  %4959 = vrsqrt.f32 %v979_v48 }
 0x271   : > { %v974_v31 = vpop.xlane.xlu0 %973  ;;  %v4948_v41 = vpop.eup %4947  ;;  %v732_v29 = vmul.f32 %v4946_v40, %v5241_v28  ;;  %4961 = vrsqrt.f32 %v1044_v47  ;;  %v789_v47 = vmax.f32 %v5577_v51, 1e-24 }
 0x272   : > { %v982_v53 = vmax.f32 %v974_v31, 1e-24  ;;  %v4950_v54 = vpop.eup %4949  ;;  %v5616_v8 = vpop.xlane.xlu1 %364  ;;  %v731_v7 = vmul.f32 %v4948_v41, %v5235_v23  ;;  %v381_v31 = vmax.f32 %v5569_v18, 1e-24 }
 0x273   : > { %v867_v62 = vmul.f32 %v4950_v54, %v5491_v6  ;;  %v854_v54 = vmax.f32 %v5587_v4, 1e-24 }
 0x274   : > { %4963 = vrsqrt.f32 %v982_v53  ;;  %v4704_v2 = vpack.i.bf16 %v732_v29, %v731_v7 }
 0x275   : > { %4965 = vrsqrt.f32 %v788_v55 }
 0x276   : > { %4967 = vrsqrt.f32 %v1043_v33  ;;  %v5626_v20 = vpop.xlane.xlu1 %439 }
 0x277   : > { %4693 = vrot.lane.b32.xlu0 %v4692_v46, %s5154_s9  ;;  %v1057_v46 = vmul.f32 %v4940_v36, %v5491_v6  ;;  %4969 = vrsqrt.f32 %v662_v59 }
 0x27b   : > { %4699 = vrot.lane.b32.xlu0 %v4698_v14, %s5156_s11  ;;  %v1058_v14 = vmul.f32 %v4944_v61, %v5491_v6 }
 0x27d   : > { %878 = vperm.xlu1 %4691, %v864_v1   ;;  %v4952_v1 = vpop.eup %4951 }
 0x27e   : > { %v4954_v63 = vpop.eup %4953  ;;  %v870_v35 = vmul.f32 %v4952_v1, %v5491_v6  ;;  %v1046_v1 = vmax.f32 %v5605_v24, 1e-24 }
 0x27f   : > { %701 = vperm.xlu0 %4703, %v675_v49   ;;  %v4956_v5 = vpop.eup %4955  ;;  %v980_v49 = vmax.f32 %v5559_v38, 1e-24  ;;  %v924_v10 = vmul.f32 %v4954_v63, %v5241_v28 }
 0x280   : > { %v4958_v12 = vpop.eup %4957 }
 0x281   : > { %883 = vperm.xlu1 %4691, %v865_v52   ;;  %v4960_v9 = vpop.eup %4959  ;;  %v676_v52 = vmul.f32 %v4956_v5, %v5491_v6  ;;  %v923_v43 = vmul.f32 %v4958_v12, %v5235_v23  ;;  %4971 = vrsqrt.f32 %v980_v49  ;;  %v456_v49 = vmax.f32 %v5626_v20, 1e-24 }
 0x282   : > { %v1059_v38 = vmul.f32 %v4960_v9, %v5491_v6  ;;  %4973 = vrsqrt.f32 %v661_v56 }
 0x283   : > { %711 = vperm.xlu0 %4703, %v677_v0   ;;  %v4962_v0 = vpop.eup %4961  ;;  %v4710_v11 = vpack.i.bf16 %v924_v10, %v923_v43  ;;  %4975 = vrsqrt.f32 %v598_v17 }
 0x284   : > { %v4964_v39 = vpop.eup %4963  ;;  %4977 = vrsqrt.f32 %v381_v31 }
 0x285   : > { %888 = vperm.xlu1 %4691, %v866_v15   ;;  %v4966_v58 = vpop.eup %4965  ;;  %v5634_v15 = vpop.xlane.xlu1 %370  ;;  %v1062_v36 = vmul.f32 %v4964_v39, %v5491_v6  ;;  %4979 = vrsqrt.f32 %v789_v47 }
 0x286   : > { %v4968_v21 = vpop.eup %4967  ;;  %v868_v19 = vmul.f32 %v4966_v58, %v5491_v6 }
 0x287   : > { %4729 = vrot.lane.b32.xlu0 %v4728_v45, %s5157_s12  ;;  %v1116_v45 = vmul.f32 %v4962_v0, %v5241_v28  ;;  %v1115_v22 = vmul.f32 %v4968_v21, %v5235_v23  ;;  %v4970_v48 = vpop.eup %4969 }
 0x288   : > { %4734 = vset.pattern.permute.xlu0 %v5161_v42  ;;  %v734_v18 = vmul.f32 %v4970_v48, %v5239_v26 }
 0x289   : > { %4697 = vset.pattern.permute.xlu1 %v5160_v50  ;;  %v5644_v61 = vpop.xlane.xlu1 %373 }
 0x28a   : > { %1075 = vperm.xlu1 %4697, %v1057_v46   ;;  %v4716_v46 = vpack.i.bf16 %v1116_v45, %v1115_v22 }
 0x28b   : > { %490 = vperm.xlu0 %4734, %v476_v60   ;;  %v4972_v44 = vpop.eup %4971  ;;  %v853_v60 = vmax.f32 %v5574_v3, 1e-24  ;;  %v981_v3 = vmax.f32 %v5597_v13, 1e-24 }
 0x28c   : > { %v4974_v40 = vpop.eup %4973  ;;  %v1060_v53 = vmul.f32 %v4972_v44, %v5491_v6 }
 0x28d   : > { %v733_v55 = vmul.f32 %v4974_v40, %v5299_v34  ;;  %4981 = vrsqrt.f32 %v853_v60  ;;  %v4976_v33 = vpop.eup %4975 }
 0x28e   : > { %1080 = vperm.xlu1 %4697, %v1058_v14   ;;  %v437_v14 = vpop.xlane.xlu0 %436  ;;  %4983 = vrsqrt.f32 %v854_v54  ;;  %v678_v7 = vmul.f32 %v4976_v33, %v5491_v6  ;;  %v385_v33 = vmax.f32 %v5634_v15, 1e-24 }
 0x28f   : > { %4735 = vset.pattern.permute.xlu0 %v5159_v57  ;;  %v4722_v29 = vpack.i.bf16 %v734_v18, %v733_v55  ;;  %4985 = vrsqrt.f32 %v981_v3  ;;  %v455_v24 = vmax.f32 %v437_v14, 1e-24 }
 0x290   : > { %893 = vperm.xlu0 %4735, %v867_v62   ;;  %v1045_v62 = vmax.f32 %v5592_v37, 1e-24  ;;  %v383_v37 = vmax.f32 %v5616_v8, 1e-24 }
 0x292   : > { %4705 = vrot.lane.b32.xlu1 %v4704_v2, %s5152_s7  ;;  %v368_v63 = vpop.xlane.xlu0 %367  ;;  %v4978_v2 = vpop.eup %4977  ;;  %4987 = vrsqrt.f32 %v1045_v62  ;;  %v386_v62 = vmax.f32 %v5644_v61, 1e-24 }
 0x293   : > { %4709 = vset.pattern.permute.xlu1 %v5158_v27  ;;  %v4980_v5 = vpop.eup %4979  ;;  %4989 = vrsqrt.f32 %v1046_v1  ;;  %v475_v59 = vmul.f32 %v4978_v2, %v5491_v6 }
 0x294   : > { %908 = vperm.xlu0 %4735, %v870_v35   ;;  %4991 = vrsqrt.f32 %v383_v37 }
 0x295   : > { %4993 = vrsqrt.f32 %v455_v24 }
 0x296   : > { %706 = vperm.xlu1 %4709, %v676_v52   ;;  %v5669_v12 = vpop.xlane.xlu0 %442  ;;  %v869_v52 = vmul.f32 %v4980_v5, %v5491_v6  ;;  %4995 = vrsqrt.f32 %v456_v49 }
 0x297   : > { %v4982_v13 = vpop.eup %4981 }
 0x298   : > { %4742 = vset.pattern.permute.xlu0 %v5160_v50  ;;  %v5650_v41 = vpop.permute.xlu1 %691  ;;  %v925_v10 = vmul.f32 %v4982_v13, %v5299_v34 }
 0x299   : > { %1085 = vperm.xlu0 %4742, %v1059_v38  }
 0x29a   : > { %4711 = vrot.lane.b32.xlu1 %v4710_v11, %s5154_s9  ;;  %v446_v43 = vpop.xlane.xlu0 %445 }
 0x29b   : > { %4715 = vset.pattern.permute.xlu1 %v5159_v57 }
 0x29d   : > { %1100 = vperm.xlu0 %4742, %v1062_v36  }
 0x29e   : > { %898 = vperm.xlu1 %4715, %v868_v19   ;;  %v384_v19 = vmax.f32 %v368_v63, 1e-24 }
 0x29f   : > { %v5656_v51 = vpop.permute.xlu1 %681 }
 0x2a0   : > { %4997 = vrsqrt.f32 %v384_v19  ;;  %v719_v54 = vmul.f32 %v5656_v51, %v5237_v25  ;;  %v458_v51 = vmax.f32 %v446_v43, 1e-24  ;;  %v2700_v43 = vld [vmem:[%s6604_s3 + $0x8] sm:$0xff] }
 0x2a1   : > { %4999 = vrsqrt.f32 %v385_v33 }
 0x2a2   : > { %4717 = vrot.lane.b32.xlu1 %v4716_v46, %s5156_s11  ;;  %5001 = vrsqrt.f32 %v386_v62 }
 0x2a3   : > { %4721 = vset.pattern.permute.xlu1 %v5160_v50  ;;  %5003 = vrsqrt.f32 %v458_v51 }
 0x2a6   : > { %1090 = vperm.xlu1 %4721, %v1060_v53  }
 0x2a8   : > { %v874_v11 = vpop.permute.xlu0 %873 }
 0x2a9   : > { %v911_v60 = vmul.f32 %v874_v11, %v5237_v25 }
 0x2aa   : > { %4723 = vrot.lane.b32.xlu1 %v4722_v29, %s5152_s7 }
 0x2ab   : > { %4727 = vset.pattern.permute.xlu1 %v5158_v27  ;;  %v4984_v27 = vpop.eup %4983 }
 0x2ac   : > { %v5662_v4 = vpop.permute.xlu1 %1065  ;;  %v926_v56 = vmul.f32 %v4984_v27, %v5239_v26  ;;  %v4986_v8 = vpop.eup %4985 }
 0x2ad   : > { %v4988_v0 = vpop.eup %4987  ;;  %v1061_v58 = vmul.f32 %v4986_v8, %v5491_v6  ;;  %v4677_v31 = vpop.permute.xlu0 %4676  ;;  %v1103_v55 = vmul.f32 %v5662_v4, %v5237_v25  ;;  %v721_v4 = vmul.f32 %v5650_v41, %v5221_v16 }
 0x2ae   : > { %716 = vperm.xlu1 %4727, %v678_v7   ;;  %v4737_v38 = vpack.i.bf16 %v926_v56, %v925_v10  ;;  %v4990_v39 = vpop.eup %4989  ;;  %v1117_v21 = vmul.f32 %v4988_v0, %v5299_v34 }
 0x2af   : > { %v4992_v36 = vpop.eup %4991 }
 0x2b0   : > { %v4671_v35 = vpop.permute.xlu1 %4670  ;;  %v4994_v45 = vpop.eup %4993 }
 0x2b1   : > { %v4996_v48 = vpop.eup %4995  ;;  %v533_v44 = vmul.f32 %v4994_v45, %v5221_v16 }
 0x2b2   : > { %4733 = vset.pattern.permute.xlu1 %v5161_v42  ;;  %v534_v40 = vmul.f32 %v4996_v48, %v5259_v30  ;;  %v4998_v53 = vpop.eup %4997 }
 0x2b3   : > { %485 = vperm.xlu1 %4733, %v475_v59   ;;  %v478_v18 = vmul.f32 %v4998_v53, %v5491_v6  ;;  %v5000_v2 = vpop.eup %4999  ;;  %v457_v59 = vmax.f32 %v5669_v12, 1e-24 }
 0x2b4   : > { %v4765_v47 = vpack.i.bf16 %v534_v40, %v533_v44  ;;  %v479_v61 = vmul.f32 %v5000_v2, %v5491_v6  ;;  %v5002_v13 = vpop.eup %5001 }
 0x2b5   : > { %5005 = vrsqrt.f32 %v457_v59  ;;  %v480_v37 = vmul.f32 %v5002_v13, %v5491_v6  ;;  %v5004_v10 = vpop.eup %5003 }
 0x2b6   : > { %v5672_v9 = vpop.permute.xlu1 %696  ;;  %v536_v11 = vmul.f32 %v5004_v10, %v5241_v28 }
 0x2b7   : > { %4736 = vset.pattern.permute.xlu1 %v5159_v57  ;;  %v1118_v57 = vmul.f32 %v4990_v39, %v5239_v26 }
 0x2b8   : > { %903 = vperm.xlu1 %4736, %v869_v52  }
 0x2b9   : > { %v4744_v22 = vpack.i.bf16 %v1118_v57, %v1117_v21 }
 0x2bb   : > { %v687_v20 = vpop.permute.xlu1 %686 }
 0x2bc   : > { %4738 = vrot.lane.b32.xlu1 %v4737_v38, %s5154_s9 }
 0x2bd   : > { %4743 = vset.pattern.permute.xlu1 %v5160_v50  ;;  %v477_v50 = vmul.f32 %v4992_v36, %v5491_v6 }
 0x2bf   : > { %v4682_v17 = vpop.permute.xlu1 %4681  ;;  %v5006_v0 = vpop.eup %5005 }
 0x2c0   : > { %1095 = vperm.xlu1 %4743, %v1061_v58   ;;  %v535_v58 = vmul.f32 %v5006_v0, %v5235_v23 }
 0x2c2   : > { %v4785_v57 = vpack.i.bf16 %v536_v11, %v535_v58 }
 0x2c3   : > { %v4687_v46 = vpop.permute.xlu1 %4686 }
 0x2c4   : > { %4745 = vrot.lane.b32.xlu1 %v4744_v22, %s5156_s11  ;;  %4761 = vrot.lane.b32.xlu0 %v4687_v46, %s5157_s12 }
 0x2c5   : > { %4749 = vset.pattern.permute.xlu1 %v5161_v42  ;;  %v720_v42 = vmul.f32 %v687_v20, %v5277_v32  ;;  %v722_v20 = vmul.f32 %v5672_v9, %v5259_v30 }
 0x2c7   : > { %v1071_v1 = vpop.permute.xlu1 %1070 }
 0x2c8   : > { %495 = vperm.xlu1 %4749, %v477_v50   ;;  %4766 = vrot.lane.b32.xlu0 %v4765_v47, %s5157_s12  ;;  %v1104_v24 = vmul.f32 %v1071_v1, %v5277_v32 }
 0x2cc   : > { %4751 = vrot.lane.b32.xlu1 %v4677_v31, %s5157_s12  ;;  %1151 = vrot.lane.b32.xlu0 %v911_v60, %s5154_s9 }
 0x2d0   : > { %4756 = vrot.lane.b32.xlu1 %v4682_v17, %s5157_s12  ;;  %1129 = vrot.lane.b32.xlu0 %v720_v42, %s5152_s7 }
 0x2d4   : > { %500 = vperm.xlu1 %4749, %v478_v18  }
 0x2d8   : > { %4771 = vrot.lane.b32.xlu1 %v4671_v35, %s5157_s12 }
 0x2dc   : > { %1127 = vrot.lane.b32.xlu1 %v719_v54, %s5152_s7 }
 0x2e0   : > { %1175 = vrot.lane.b32.xlu1 %v1103_v55, %s5156_s11 }
 0x2e6   : > { %v377_v14 = vpop.xlane.xlu0 %376 }
 0x2e7   : > { %v387_v9 = vmax.f32 %v377_v14, 1e-24 }
 0x2e9   : > { %5007 = vrsqrt.f32 %v387_v9 }
 0x2ea   : > { %v5704_v29 = vpop.xlane.xlu0 %451 }
 0x2eb   : > { %v460_v46 = vmax.f32 %v5704_v29, 1e-24 }
 0x2ee   : > { %v380_v3 = vpop.xlane.xlu0 %379 }
 0x2ef   : > { %v388_v45 = vmax.f32 %v380_v3, 1e-24 }
 0x2f1   : > { %5009 = vrsqrt.f32 %v388_v45 }
 0x2f2   : > { %v4694_v7 = vpop.permute.xlu0 %4693 }
 0x2f3   : > { %4776 = vrot.lane.b32.xlu1 %v4694_v7, %s5157_s12  ;;  %v5008_v53 = vpop.eup %5007 }
 0x2f4   : > { %v481_v55 = vmul.f32 %v5008_v53, %v5491_v6  ;;  %v5816_v53 = vpack.c.bf16 %v5241_v28, %v5235_v23 }
 0x2f6   : > { %v4700_v5 = vpop.permute.xlu0 %4699 }
 0x2f7   : > { %1131 = vrot.lane.b32.xlu1 %v721_v4, %s5152_s7 }
 0x2f9   : > { %v449_v63 = vpop.xlane.xlu1 %448 }
 0x2fa   : > { %v459_v48 = vmax.f32 %v449_v63, 1e-24 }
 0x2fb   : > { %505 = vperm.xlu1 %4749, %v479_v61   ;;  %v5010_v54 = vpop.eup %5009 }
 0x2fc   : > { %5011 = vrsqrt.f32 %v459_v48  ;;  %v482_v7 = vmul.f32 %v5010_v54, %v5491_v6 }
 0x2fd   : > { %v879_v15 = vpop.permute.xlu1 %878  ;;  %5013 = vrsqrt.f32 %v460_v46 }
 0x2fe   : > { %v912_v35 = vmul.f32 %v879_v15, %v5277_v32  ;;  %v702_v27 = vpop.permute.xlu0 %701 }
 0x2ff   : > { %510 = vperm.xlu1 %4749, %v480_v37   ;;  %v723_v60 = vmul.f32 %v702_v27, %v5235_v23 }
 0x300   : > { %1153 = vrot.lane.b32.xlu0 %v912_v35, %s5154_s9 }
 0x301   : > { %v884_v41 = vpop.permute.xlu1 %883 }
 0x302   : > { %v5718_v12 = vpop.permute.xlu0 %711  ;;  %v913_v36 = vmul.f32 %v884_v41, %v5221_v16 }
 0x304   : > { %1177 = vrot.lane.b32.xlu0 %v1104_v24, %s5156_s11 }
 0x305   : > { %v889_v49 = vpop.permute.xlu1 %888 }
 0x306   : > { %v4730_v52 = vpop.permute.xlu0 %4729  ;;  %v914_v22 = vmul.f32 %v889_v49, %v5259_v30  ;;  %v5012_v14 = vpop.eup %5011 }
 0x307   : > { %v4732_v56 = vunpack.i.h.bf16 %v4730_v52  ;;  %v4731_v8 = vunpack.i.l.bf16 %v4730_v52  ;;  %v5014_v33 = vpop.eup %5013  ;;  %v537_v1 = vmul.f32 %v5012_v14, %v5299_v34 }
 0x308   : > { %4781 = vrot.lane.b32.xlu0 %v4700_v5, %s5157_s12  ;;  %v538_v4 = vmul.f32 %v5014_v33, %v5239_v26 }
 0x309   : > { %v1076_v38 = vpop.permute.xlu1 %1075  ;;  %v4545_v39 = vpack.c.bf16 %v4732_v56, %v4731_v8  ;;  %v725_v56 = vmul.f32 %v5718_v12, %v5299_v34 }
 0x30a   : > { %v1105_v31 = vmul.f32 %v1076_v38, %v5221_v16  ;;  %v491_v40 = vpop.permute.xlu0 %490  ;;  %v4805_v63 = vpack.i.bf16 %v538_v4, %v537_v1 }
 0x30b   : > { %4547 = vmatprep.subr.msk.bf16.mxu1 %vm5724_vm2, %v4545_v39  ;;  %v524_v13 = vmul.f32 %v491_v40, %v5277_v32 }
 0x30c   : > { %4550 = vmatpush3.bf16.xpose.msk.msra.mxu1 %vm5724_vm2, %v4545_v39  ;;  %1133 = vrot.lane.b32.xlu0 %v722_v20, %s5152_s7 }
 0x30d   : > { %v1081_v21 = vpop.permute.xlu1 %1080 }
 0x30e   : > { %v1106_v44 = vmul.f32 %v1081_v21, %v5259_v30 }
 0x30f   : > { %v894_v42 = vpop.permute.xlu0 %893 }
 0x310   : > { %4786 = vrot.lane.b32.xlu0 %v4785_v57, %s5157_s12  ;;  %v915_v59 = vmul.f32 %v894_v42, %v5235_v23 }
 0x311   : > { %v4706_v17 = vpop.permute.xlu1 %4705 }
 0x312   : > { %4791 = vrot.lane.b32.xlu1 %v4706_v17, %s5157_s12 }
 0x313   : > { %v909_v3 = vpop.permute.xlu0 %908 }
 0x314   : > { %1155 = vrot.lane.b32.xlu0 %v913_v36, %s5154_s9  ;;  %v918_v36 = vmul.f32 %v909_v3, %v5239_v26 }
 0x315   : > { %v707_v19 = vpop.permute.xlu1 %706 }
 0x316   : > { %1179 = vrot.lane.b32.xlu1 %v1105_v31, %s5156_s11  ;;  %v724_v62 = vmul.f32 %v707_v19, %v5241_v28 }
 0x318   : > { %1157 = vrot.lane.b32.xlu0 %v914_v22, %s5154_s9  ;;  %v1086_v2 = vpop.permute.xlu0 %1085  ;;  %v5789_v22 = vpack.c.bf16 %v5277_v32, %v5237_v25  ;;  %v5803_v32 = vpack.c.bf16 %v5259_v30, %v5221_v16 }
 0x319   : > { %v4712_v50 = vpop.permute.xlu1 %4711  ;;  %v1107_v15 = vmul.f32 %v1086_v2, %v5235_v23 }
 0x31a   : > { %4796 = vrot.lane.b32.xlu1 %v4712_v50, %s5157_s12 }
 0x31c   : > { %1181 = vrot.lane.b32.xlu0 %v1106_v44, %s5156_s11  ;;  %v1101_v27 = vpop.permute.xlu0 %1100 }
 0x31d   : > { %v899_v47 = vpop.permute.xlu1 %898  ;;  %v1110_v44 = vmul.f32 %v1101_v27, %v5239_v26 }
 0x31e   : > { %1135 = vrot.lane.b32.xlu1 %v723_v60, %s5152_s7  ;;  %v916_v35 = vmul.f32 %v899_v47, %v5241_v28 }
 0x321   : > { %v4718_v18 = vpop.permute.xlu1 %4717 }
 0x322   : > { %4801 = vrot.lane.b32.xlu0 %v4718_v18, %s5157_s12  ;;  %515 = vperm.xlu1 %4749, %v481_v55   ;;  %v5824_v55 = vpack.c.bf16 %v5239_v26, %v5299_v34 }
 0x325   : > { %v1091_v29 = vpop.permute.xlu1 %1090 }
 0x326   : > { %1137 = vrot.lane.b32.xlu0 %v724_v62, %s5152_s7  ;;  %520 = vperm.xlu1 %4749, %v482_v7   ;;  %v1108_v37 = vmul.f32 %v1091_v29, %v5241_v28 }
 0x329   : > { %v4724_v51 = vpop.permute.xlu1 %4723 }
 0x32a   : > { %4806 = vrot.lane.b32.xlu0 %v4805_v63, %s5157_s12  ;;  %4811 = vrot.lane.b32.xlu1 %v4724_v51, %s5157_s12 }
 0x32d   : > { %v717_v5 = vpop.permute.xlu1 %716 }
 0x32e   : > { %1159 = vrot.lane.b32.xlu0 %v915_v59, %s5154_s9  ;;  %1183 = vrot.lane.b32.xlu1 %v1107_v15, %s5156_s11  ;;  %v726_v20 = vmul.f32 %v717_v5, %v5239_v26 }
 0x332   : > { %v486_v6 = vpop.permute.xlu1 %485  ;;  %1161 = vrot.lane.b32.xlu0 %v916_v35, %s5154_s9 }
 0x333   : > { %v523_v61 = vmul.f32 %v486_v6, %v5237_v25 }
 0x335   : > { %4341 = vmatprep.mubr.msk.f32.mxu1 %vm356_vm1, %v523_v61 }
 0x336   : > { %4342 = vmatmul.mubr.msk.f32.vlgmr.msra.gmra.mrb[0].mxu1 %vm356_vm1, %v524_v13  ;;  %1185 = vrot.lane.b32.xlu0 %v1108_v37, %s5156_s11  ;;  %v4762_v24 = vpop.permute.xlu0 %4761 }
 0x337   : > { %v904_v41 = vpop.permute.xlu1 %903  ;;  %v4764_v58 = vunpack.i.h.bf16 %v4762_v24  ;;  %v4763_v12 = vunpack.i.l.bf16 %v4762_v24 }
 0x338   : > { %v917_v38 = vmul.f32 %v904_v41, %v5299_v34 }
 0x339   : > { %v4563_v19 = vpack.c.bf16 %v4764_v58, %v4763_v12 }
 0x33a   : > { %v4767_v52 = vpop.permute.xlu0 %4766 }
 0x33b   : > { %v4739_v49 = vpop.permute.xlu1 %4738  ;;  %v4769_v48 = vunpack.i.h.bf16 %v4767_v52  ;;  %v4768_v31 = vunpack.i.l.bf16 %v4767_v52 }
 0x33c   : > { %4816 = vrot.lane.b32.xlu1 %v4739_v49, %s5157_s12 }
 0x33d   : > { %v4569_v47 = vpack.c.bf16 %v4769_v48, %v4768_v31 }
 0x33e   : > { %v1152_v8 = vpop.permute.xlu0 %1151 }
 0x33f   : > { %v1096_v10 = vpop.permute.xlu1 %1095  ;;  %4355 = vmatprep.mubr.msk.f32.mxu0 %vm356_vm1, %v1152_v8 }
 0x340   : > { %1139 = vrot.lane.b32.xlu1 %v725_v56, %s5152_s7  ;;  %v1109_v11 = vmul.f32 %v1096_v10, %v5299_v34 }
 0x342   : > { %v1130_v14 = vpop.permute.xlu0 %1129 }
 0x343   : > { %v4746_v0 = vpop.permute.xlu1 %4745 }
 0x344   : > { %4821 = vrot.lane.b32.xlu0 %v4746_v0, %s5157_s12  ;;  %1163 = vrot.lane.b32.xlu1 %v917_v38, %s5154_s9 }
 0x347   : > { %v5778_v39 = vpop.permute.xlu1 %495 }
 0x348   : > { %1141 = vrot.lane.b32.xlu0 %v726_v20, %s5152_s7  ;;  %1187 = vrot.lane.b32.xlu1 %v1109_v11, %s5156_s11  ;;  %v525_v1 = vmul.f32 %v5778_v39, %v5221_v16 }
 0x34b   : > { %v4752_v21 = vpop.permute.xlu1 %4751 }
 0x34c   : > { %v4754_v57 = vunpack.i.h.bf16 %v4752_v21  ;;  %v4753_v17 = vunpack.i.l.bf16 %v4752_v21  ;;  %1165 = vrot.lane.b32.xlu0 %v918_v36, %s5154_s9  ;;  %1275 = vrot.lane.b32.xlu1 %v5789_v22, %s5154_s9 }
 0x34e   : > { %v4551_v9 = vpack.c.bf16 %v4754_v57, %v4753_v17 }
 0x34f   : > { %v4757_v45 = vpop.permute.xlu1 %4756 }
 0x350   : > { %v4759_v46 = vunpack.i.h.bf16 %v4757_v45  ;;  %v4758_v50 = vunpack.i.l.bf16 %v4757_v45  ;;  %4553 = vmatprep.subr.msk.bf16.mxu1 %vm5724_vm2, %v4551_v9  ;;  %1189 = vrot.lane.b32.xlu0 %v1110_v44, %s5156_s11 }
 0x351   : > { %4556 = vmatpush3.bf16.xpose.msk.msra.mxu1 %vm5724_vm2, %v4551_v9  ;;  %1277 = vrot.lane.b32.xlu1 %v5803_v32, %s5154_s9 }
 0x352   : > { %v4557_v40 = vpack.c.bf16 %v4759_v46, %v4758_v50  ;;  %4565 = vmatprep.subr.msk.bf16.mxu1 %vm5724_vm2, %v4563_v19 }
 0x353   : > { %v501_v25 = vpop.permute.xlu1 %500 }
 0x354   : > { %4559 = vmatprep.subr.msk.bf16.mxu0 %vm5724_vm2, %v4557_v40  ;;  %1267 = vrot.lane.b32.xlu0 %v5789_v22, %s5152_s7  ;;  %v526_v16 = vmul.f32 %v501_v25, %v5259_v30 }
 0x355   : > { %4562 = vmatpush3.bf16.xpose.msk.msra.mxu0 %vm5724_vm2, %v4557_v40  ;;  %1279 = vrot.lane.b32.xlu1 %v5816_v53, %s5154_s9 }
 0x356   : > { %4571 = vmatprep.subr.msk.bf16.mxu0 %vm5724_vm2, %v4569_v47 }
 0x357   : > { %v4772_v60 = vpop.permute.xlu1 %4771 }
 0x358   : > { %v4774_v42 = vunpack.i.h.bf16 %v4772_v60  ;;  %v4773_v18 = vunpack.i.l.bf16 %v4772_v60  ;;  %1283 = vrot.lane.b32.xlu0 %v5789_v22, %s5156_s11 }
 0x359   : > { %1273 = vrot.lane.b32.xlu1 %v5824_v55, %s5152_s7 }
 0x35a   : > { %v4575_v29 = vpack.c.bf16 %v4774_v42, %v4773_v18 }
 0x35b   : > { %v1128_v54 = vpop.permute.xlu1 %1127 }
 0x35c   : > { %4348 = vmatprep.mubr.msk.f32.mxu1 %vm356_vm1, %v1128_v54  ;;  %1269 = vrot.lane.b32.xlu0 %v5803_v32, %s5152_s7 }
 0x35d   : > { %4349 = vmatmul.mubr.msk.f32.vlgmr.msra.gmra.mrb[2].mxu1 %vm356_vm1, %v1130_v14  ;;  %1289 = vrot.lane.b32.xlu1 %v5824_v55, %s5156_s11 }
 0x35e   : > { %4568 = vmatpush3.bf16.xpose.msk.msra.mxu1 %vm5724_vm2, %v4563_v19 }
 0x35f   : > { %4577 = vmatprep.subr.msk.bf16.mxu1 %vm5724_vm2, %v4575_v29  ;;  %v1176_v33 = vpop.permute.xlu1 %1175 }
 0x360   : > { %4362 = vmatprep.mubr.msk.f32.mxu1 %vm356_vm1, %v1176_v33  ;;  %1285 = vrot.lane.b32.xlu0 %v5803_v32, %s5156_s11 }
 0x364   : > { %1271 = vrot.lane.b32.xlu0 %v5816_v53, %s5152_s7 }
 0x365   : > { %v4777_v3 = vpop.permute.xlu1 %4776 }
 0x366   : > { %v4779_v62 = vunpack.i.h.bf16 %v4777_v3  ;;  %v4778_v7 = vunpack.i.l.bf16 %v4777_v3 }
 0x368   : > { %1287 = vrot.lane.b32.xlu0 %v5816_v53, %s5156_s11  ;;  %v4581_v4 = vpack.c.bf16 %v4779_v62, %v4778_v7 }
 0x369   : > { %v1132_v2 = vpop.permute.xlu1 %1131 }
 0x36c   : > { %1281 = vrot.lane.b32.xlu0 %v5824_v55, %s5154_s9 }
 0x372   : > { %v1154_v51 = vpop.permute.xlu0 %1153 }
 0x373   : > { %4356 = vmatmul.mubr.msk.f32.vlgmr.msra.gmra.mrb[8].mxu0 %vm356_vm1, %v1154_v51 }
 0x374   : > { %4574 = vmatpush3.bf16.xpose.msk.msra.mxu0 %vm5724_vm2, %v4569_v47  ;;  %4369 = vmatprep.mubr.msk.f32.mxu0 %vm356_vm1, %v525_v1 }
 0x375   : > { %4583 = vmatprep.subr.msk.bf16.mxu0 %vm5724_vm2, %v4581_v4 }
 0x376   : > { %v1178_v63 = vpop.permute.xlu0 %1177 }
 0x377   : > { %4363 = vmatmul.mubr.msk.f32.vlgmr.msra.gmra.mrb[4].mxu1 %vm356_vm1, %v1178_v63 }
 0x378   : > { %4580 = vmatpush3.bf16.xpose.msk.msra.mxu1 %vm5724_vm2, %v4575_v29  ;;  %4376 = vmatprep.mubr.msk.f32.mxu1 %vm356_vm1, %v1132_v2 }
 0x37a   : > { %v4782_v5 = vpop.permute.xlu0 %4781  ;;  %v506_v13 = vpop.permute.xlu1 %505 }
 0x37b   : > { %v4784_v59 = vunpack.i.h.bf16 %v4782_v5  ;;  %v4783_v15 = vunpack.i.l.bf16 %v4782_v5  ;;  %4370 = vmatmul.mubr.msk.f32.vlgmr.msra.gmra.mrb[10].mxu0 %vm356_vm1, %v526_v16  ;;  %v527_v56 = vmul.f32 %v506_v13, %v5235_v23  ;;  %v5162_v16 = vmov 0.0   ;;  %v2699_v13 = vld [vmem:[%s6604_s3] sm:$0xff] }
 0x37c   : > { %4586 = vmatpush3.bf16.xpose.msk.msra.mxu0 %vm5724_vm2, %v4581_v4 }
 0x37d   : > { %v4587_v6 = vpack.c.bf16 %v4784_v59, %v4783_v15 }
 0x37e   : > { %v1134_v61 = vpop.permute.xlu0 %1133  ;;  %v511_v41 = vpop.permute.xlu1 %510 }
 0x37f   : > { %4377 = vmatmul.mubr.msk.f32.vlgmr.msra.gmra.mrb[6].mxu1 %vm356_vm1, %v1134_v61  ;;  %4589 = vmatprep.subr.msk.bf16.mxu1 %vm5724_vm2, %v4587_v6  ;;  %v528_v20 = vmul.f32 %v511_v41, %v5241_v28 }
 0x380   : > { %4592 = vmatpush3.bf16.xpose.msk.msra.mxu1 %vm5724_vm2, %v4587_v6 }
 0x382   : > { %v4787_v30 = vpop.permute.xlu0 %4786 }
 0x383   : > { %v4789_v35 = vunpack.i.h.bf16 %v4787_v30  ;;  %v4788_v27 = vunpack.i.l.bf16 %v4787_v30 }
 0x384   : > { %v4792_v49 = vpop.permute.xlu1 %4791 }
 0x385   : > { %v4593_v37 = vpack.c.bf16 %v4789_v35, %v4788_v27  ;;  %v4794_v52 = vunpack.i.h.bf16 %v4792_v49  ;;  %v4793_v10 = vunpack.i.l.bf16 %v4792_v49 }
 0x386   : > { %v1156_v24 = vpop.permute.xlu0 %1155 }
 0x387   : > { %4383 = vmatprep.mubr.msk.f32.mxu0 %vm356_vm1, %v1156_v24  ;;  %4595 = vmatprep.subr.msk.bf16.mxu0 %vm5724_vm2, %v4593_v37  ;;  %v4599_v0 = vpack.c.bf16 %v4794_v52, %v4793_v10 }
 0x388   : > { %v1180_v38 = vpop.permute.xlu1 %1179 }
 0x389   : > { %4390 = vmatprep.mubr.msk.f32.mxu1 %vm356_vm1, %v1180_v38  ;;  %4601 = vmatprep.subr.msk.bf16.mxu1 %vm5724_vm2, %v4599_v0 }
 0x38a   : > { %v1158_v8 = vpop.permute.xlu0 %1157 }
 0x38b   : > { %4384 = vmatmul.mubr.msk.f32.vlgmr.msra.gmra.mrb[12].mxu0 %vm356_vm1, %v1158_v8 }
 0x38c   : > { %4598 = vmatpush3.bf16.xpose.msk.msra.mxu0 %vm5724_vm2, %v4593_v37  ;;  %4397 = vmatprep.mubr.msk.f32.mxu0 %vm356_vm1, %v527_v56  ;;  %v4797_v23 = vpop.permute.xlu1 %4796  ;;  %v2702_v56 = vld [vmem:[%s6604_s3 + $0x18] sm:$0xff] }
 0x38d   : > { %v4799_v11 = vunpack.i.h.bf16 %v4797_v23  ;;  %v4798_v58 = vunpack.i.l.bf16 %v4797_v23 }
 0x38e   : > { %v1182_v39 = vpop.permute.xlu0 %1181 }
 0x38f   : > { %4391 = vmatmul.mubr.msk.f32.vlgmr.msra.gmra.mrb[8].mxu1 %vm356_vm1, %v1182_v39  ;;  %v4605_v12 = vpack.c.bf16 %v4799_v11, %v4798_v58  ;;  %v2701_v11 = vld [vmem:[%s6604_s3 + $0x10] sm:$0xff] }
 0x390   : > { %4604 = vmatpush3.bf16.xpose.msk.msra.mxu1 %vm5724_vm2, %v4599_v0  ;;  %v1136_v21 = vpop.permute.xlu1 %1135 }
 0x391   : > { %4404 = vmatprep.mubr.msk.f32.mxu1 %vm356_vm1, %v1136_v21  ;;  %4607 = vmatprep.subr.msk.bf16.mxu0 %vm5724_vm2, %v4605_v12 }
 0x393   : > { %4398 = vmatmul.mubr.msk.f32.vlgmr.msra.gmra.mrb[14].mxu0 %vm356_vm1, %v528_v20 }
 0x394   : > { %4610 = vmatpush3.bf16.xpose.msk.msra.mxu0 %vm5724_vm2, %v4605_v12  ;;  %v4802_v57 = vpop.permute.xlu0 %4801  ;;  %v2704_v12 = vld [vmem:[%s6604_s3 + $0x28] sm:$0xff] }
 0x395   : > { %v4804_v17 = vunpack.i.h.bf16 %v4802_v57  ;;  %v4803_v36 = vunpack.i.l.bf16 %v4802_v57  ;;  %v2703_v57 = vld [vmem:[%s6604_s3 + $0x20] sm:$0xff] }
 0x397   : > { %v4611_v9 = vpack.c.bf16 %v4804_v17, %v4803_v36 }
 0x398   : > { %v1138_v19 = vpop.permute.xlu0 %1137 }
 0x399   : > { %4405 = vmatmul.mubr.msk.f32.vlgmr.msra.gmra.mrb[10].mxu1 %vm356_vm1, %v1138_v19  ;;  %4613 = vmatprep.subr.msk.bf16.mxu1 %vm5724_vm2, %v4611_v9 }
 0x39a   : > { %4616 = vmatpush3.bf16.xpose.msk.msra.mxu1 %vm5724_vm2, %v4611_v9 }
 0x39c   : > { %v4807_v28 = vpop.permute.xlu0 %4806 }
 0x39d   : > { %v4809_v45 = vunpack.i.h.bf16 %v4807_v28  ;;  %v4808_v48 = vunpack.i.l.bf16 %v4807_v28  ;;  %v2706_v28 = vld [vmem:[%s6604_s3 + $0x38] sm:$0xff] }
 0x39f   : > { %v4617_v31 = vpack.c.bf16 %v4809_v45, %v4808_v48  ;;  %v2705_v48 = vld [vmem:[%s6604_s3 + $0x30] sm:$0xff] }
 0x3a0   : > { %v1160_v46 = vpop.permute.xlu0 %1159 }
 0x3a1   : > { %v516_v50 = vpop.permute.xlu1 %515  ;;  %4411 = vmatprep.mubr.msk.f32.mxu0 %vm356_vm1, %v1160_v46  ;;  %4619 = vmatprep.subr.msk.bf16.mxu0 %vm5724_vm2, %v4617_v31 }
 0x3a2   : > { %v529_v44 = vmul.f32 %v516_v50, %v5299_v34 }
 0x3a4   : > { %v1162_v40 = vpop.permute.xlu0 %1161 }
 0x3a5   : > { %v521_v25 = vpop.permute.xlu1 %520  ;;  %4412 = vmatmul.mubr.msk.f32.vlgmr.msra.gmra.mrb[16].mxu0 %vm356_vm1, %v1162_v40 }
 0x3a6   : > { %4622 = vmatpush3.bf16.xpose.msk.msra.mxu0 %vm5724_vm2, %v4617_v31  ;;  %4425 = vmatprep.mubr.msk.f32.mxu0 %vm356_vm1, %v529_v44  ;;  %v530_v18 = vmul.f32 %v521_v25, %v5239_v26  ;;  %v2708_v25 = vld [vmem:[%s6604_s3 + $0x48] sm:$0xff] }
 0x3a8   : > { %v1186_v29 = vpop.permute.xlu0 %1185 }
 0x3a9   : > { %v4812_v47 = vpop.permute.xlu1 %4811 }
 0x3aa   : > { %v4814_v60 = vunpack.i.h.bf16 %v4812_v47  ;;  %v4813_v42 = vunpack.i.l.bf16 %v4812_v47  ;;  %v2707_v47 = vld [vmem:[%s6604_s3 + $0x40] sm:$0xff] }
 0x3ac   : > { %v4623_v54 = vpack.c.bf16 %v4814_v60, %v4813_v42 }
 0x3ad   : > { %4426 = vmatmul.mubr.msk.f32.vlgmr.msra.gmra.mrb[18].mxu0 %vm356_vm1, %v530_v18  ;;  %v1184_v14 = vpop.permute.xlu1 %1183 }
 0x3ae   : > { %4418 = vmatprep.mubr.msk.f32.mxu1 %vm356_vm1, %v1184_v14  ;;  %4625 = vmatprep.subr.msk.bf16.mxu1 %vm5724_vm2, %v4623_v54 }
 0x3af   : > { %4419 = vmatmul.mubr.msk.f32.vlgmr.msra.gmra.mrb[12].mxu1 %vm356_vm1, %v1186_v29 }
 0x3b0   : > { %4628 = vmatpush3.bf16.xpose.msk.msra.mxu1 %vm5724_vm2, %v4623_v54 }
 0x3b1   : > { %v4817_v34 = vpop.permute.xlu1 %4816 }
 0x3b2   : > { %v4819_v33 = vunpack.i.h.bf16 %v4817_v34  ;;  %v4818_v3 = vunpack.i.l.bf16 %v4817_v34  ;;  %v2710_v34 = vld [vmem:[%s6604_s3 + $0x58] sm:$0xff] }
 0x3b4   : > { %v4629_v62 = vpack.c.bf16 %v4819_v33, %v4818_v3  ;;  %v2709_v3 = vld [vmem:[%s6604_s3 + $0x50] sm:$0xff] }
 0x3b5   : > { %v1140_v26 = vpop.permute.xlu1 %1139 }
 0x3b6   : > { %v4822_v7 = vpop.permute.xlu0 %4821  ;;  %4432 = vmatprep.mubr.msk.f32.mxu1 %vm356_vm1, %v1140_v26  ;;  %4631 = vmatprep.subr.msk.bf16.mxu0 %vm5724_vm2, %v4629_v62 }
 0x3b7   : > { %v4824_v1 = vunpack.i.h.bf16 %v4822_v7  ;;  %v4823_v51 = vunpack.i.l.bf16 %v4822_v7  ;;  %4634 = vmatpush3.bf16.xpose.msk.msra.mxu0 %vm5724_vm2, %v4629_v62 }
 0x3b8   : > { %4449 = vmatprep.subr.bf16.mxu0 %v5162_v16 }
 0x3b9   : > { %v4635_v4 = vpack.c.bf16 %v4824_v1, %v4823_v51  ;;  %v1164_v63 = vpop.permute.xlu1 %1163 }
 0x3ba   : > { %v1142_v2 = vpop.permute.xlu0 %1141  ;;  %4439 = vmatprep.mubr.msk.f32.mxu0 %vm356_vm1, %v1164_v63 }
 0x3bb   : > { %4433 = vmatmul.mubr.msk.f32.vlgmr.msra.gmra.mrb[14].mxu1 %vm356_vm1, %v1142_v2  ;;  %4637 = vmatprep.subr.msk.bf16.mxu1 %vm5724_vm2, %v4635_v4  ;;  %v2712_v2 = vld [vmem:[%s6604_s3 + $0x68] sm:$0xff] }
 0x3bc   : > { %4640 = vmatpush3.bf16.xpose.msk.msra.mxu1 %vm5724_vm2, %v4635_v4 }
 0x3bd   : > { %v1188_v5 = vpop.permute.xlu1 %1187  ;;  %4455 = vmatprep.subr.bf16.mxu1 %v5162_v16 }
 0x3be   : > { %v1166_v59 = vpop.permute.xlu0 %1165  ;;  %4446 = vmatprep.mubr.msk.f32.mxu1 %vm356_vm1, %v1188_v5  ;;  %v2711_v5 = vld [vmem:[%s6604_s3 + $0x60] sm:$0xff] }
 0x3bf   : > { %4440 = vmatmul.mubr.msk.f32.vlgmr.msra.gmra.mrb[20].mxu0 %vm356_vm1, %v1166_v59 }
 0x3c0   : > { %4451 = vmatprep.mubr.msk.bf16.mxu0 %vm5164_vm4, %v5162_v16 }
 0x3c1   : > { %v1276_v49 = vpop.permute.xlu1 %1275 }
 0x3c2   : > { %v1190_v15 = vpop.permute.xlu0 %1189 }
 0x3c3   : > { %4447 = vmatmul.mubr.msk.f32.vlgmr.msra.gmra.mrb[16].mxu1 %vm356_vm1, %v1190_v15 }
 0x3c4   : > { %4457 = vmatprep.mubr.msk.bf16.mxu1 %vm5164_vm4, %v5162_v16 }
 0x3c5   : > { %v5946_v52 = vpop.permute.xlu1 %1277 }
 0x3c6   : > { %v1268_v6 = vpop.permute.xlu0 %1267 }
 0x3c7   : > { %3179 = vrot.lane.b32.xlu1 %v1268_v6, %s5163_s15 }
 0x3c9   : > { %v5949_v10 = vpop.permute.xlu1 %1279 }
 0x3ca   : > { %v1284_v61 = vpop.permute.xlu0 %1283 }
 0x3cb   : > { %3273 = vrot.lane.b32.xlu1 %v1284_v61, %s5163_s15 }
 0x3cd   : > { %v5956_v39 = vpop.permute.xlu1 %1273 }
 0x409   : > { %v4343_v30 = vpop.f32.mrb[0].mxu1 }
 0x40a   : > { %v5936_v35 = vadd.f32 %v4343_v30, %v2700_v43  ;;  %v1373_v27 = vpop.f32.mrb[1].mxu1  ;;  %v2714_v43 = vld [vmem:[%s6604_s3 + $0x78] sm:$0xff]  ;;  %v2713_v30 = vld [vmem:[%s6604_s3 + $0x70] sm:$0xff] }
 0x40b   : > { %v5938_v41 = vadd.f32 %v2699_v13, %v1373_v27 }
 0x40c   : > { %v2767_v37 = vsel %vm2763_vm3, %v5936_v35, -inf }
 0x40d   : > { %2768 = vmax.xlane.f32.xlu0 %v2767_v37  ;;  %v2764_v24 = vsel %vm2763_vm3, %v5938_v41, -inf }
 0x40e   : > { %2765 = vmax.xlane.f32.xlu1 %v2764_v24 }
 0x423   : > { %3132 = vrot.lane.b32.xlu0 %v5789_v22, %s5163_s15  ;;  %v5960_v22 = vpop.permute.xlu1 %1289 }
 0x427   : > { %3226 = vrot.lane.b32.xlu0 %v1276_v49, %s5163_s15 }
 0x430   : > { %v4350_v8 = vpop.f32.mrb[2].mxu1 }
 0x431   : > { %v5954_v0 = vadd.f32 %v4350_v8, %v2702_v56  ;;  %v1460_v38 = vpop.f32.mrb[3].mxu1  ;;  %v2716_v8 = vld [vmem:[%s6604_s3 + $0x88] sm:$0xff] }
 0x432   : > { %v5966_v58 = vadd.f32 %v2701_v11, %v1460_v38  ;;  %v2715_v38 = vld [vmem:[%s6604_s3 + $0x80] sm:$0xff] }
 0x433   : > { %v2773_v23 = vsel %vm2763_vm3, %v5954_v0, -inf }
 0x434   : > { %2774 = vmax.xlane.f32.xlu1 %v2773_v23  ;;  %v2770_v21 = vsel %vm2763_vm3, %v5966_v58, -inf }
 0x439   : > { %v3180_v20 = vpop.permute.xlu1 %3179 }
 0x43a   : > { %4456 = vmatpush3.bf16.msra.mxu1 %v3180_v20 }
 0x43b   : > { %4467 = vmatprep.subr.bf16.mxu1 %v5162_v16 }
 0x446   : > { %v4357_v17 = vpop.f32.mrb[8].mxu0  ;;  %2771 = vmax.xlane.f32.xlu0 %v2770_v21 }
 0x447   : > { %v5976_v36 = vadd.f32 %v4357_v17, %v2704_v12  ;;  %v1547_v9 = vpop.f32.mrb[9].mxu0 }
 0x448   : > { %v5978_v19 = vadd.f32 %v2703_v57, %v1547_v9 }
 0x449   : > { %v2779_v45 = vsel %vm2763_vm3, %v5976_v36, -inf }
 0x44a   : > { %2780 = vmax.xlane.f32.xlu1 %v2779_v45  ;;  %v4364_v31 = vpop.f32.mrb[4].mxu1  ;;  %v2776_v46 = vsel %vm2763_vm3, %v5978_v19, -inf  ;;  %v2717_v45 = vld [vmem:[%s6604_s3 + $0x90] sm:$0xff] }
 0x44b   : > { %v5990_v50 = vadd.f32 %v4364_v31, %v2706_v28  ;;  %v1634_v44 = vpop.f32.mrb[5].mxu1  ;;  %2777 = vmax.xlane.f32.xlu0 %v2776_v46  ;;  %v2718_v28 = vld [vmem:[%s6604_s3 + $0x98] sm:$0xff] }
 0x44c   : > { %v5992_v40 = vadd.f32 %v2705_v48, %v1634_v44 }
 0x44d   : > { %v2785_v60 = vsel %vm2763_vm3, %v5990_v50, -inf }
 0x44e   : > { %v4371_v42 = vpop.f32.mrb[10].mxu0  ;;  %2786 = vmax.xlane.f32.xlu1 %v2785_v60  ;;  %v2782_v18 = vsel %vm2763_vm3, %v5992_v40, -inf  ;;  %v2720_v60 = vld [vmem:[%s6604_s3 + $0xa8] sm:$0xff] }
 0x44f   : > { %v6004_v54 = vadd.f32 %v4371_v42, %v2708_v25  ;;  %v1725_v14 = vpop.f32.mrb[11].mxu0  ;;  %2783 = vmax.xlane.f32.xlu0 %v2782_v18  ;;  %v2719_v42 = vld [vmem:[%s6604_s3 + $0xa0] sm:$0xff] }
 0x450   : > { %v6006_v29 = vadd.f32 %v2707_v47, %v1725_v14 }
 0x451   : > { %v2791_v33 = vsel %vm2763_vm3, %v6004_v54, -inf }
 0x452   : > { %2792 = vmax.xlane.f32.xlu1 %v2791_v33  ;;  %v4378_v62 = vpop.f32.mrb[6].mxu1  ;;  %v2788_v26 = vsel %vm2763_vm3, %v6006_v29, -inf  ;;  %v6090_v33 = vpop.permute.xlu0 %1269 }
 0x453   : > { %v6018_v7 = vadd.f32 %v4378_v62, %v2710_v34  ;;  %2789 = vmax.xlane.f32.xlu0 %v2788_v26  ;;  %v1812_v1 = vpop.f32.mrb[7].mxu1 }
 0x454   : > { %v6020_v51 = vadd.f32 %v2709_v3, %v1812_v1 }
 0x455   : > { %v2797_v4 = vsel %vm2763_vm3, %v6018_v7, -inf }
 0x456   : > { %2798 = vmax.xlane.f32.xlu1 %v2797_v4  ;;  %v2794_v63 = vsel %vm2763_vm3, %v6020_v51, -inf  ;;  %v6098_v1 = vpop.permute.xlu0 %1285 }
 0x457   : > { %2795 = vmax.xlane.f32.xlu0 %v2794_v63  ;;  %v2722_v63 = vld [vmem:[%s6604_s3 + $0xb8] sm:$0xff] }
 0x45e   : > { %v4385_v59 = vpop.f32.mrb[12].mxu0 }
 0x45f   : > { %v6032_v15 = vadd.f32 %v4385_v59, %v2712_v2  ;;  %v1899_v6 = vpop.f32.mrb[13].mxu0 }
 0x460   : > { %v6034_v61 = vadd.f32 %v2711_v5, %v1899_v6  ;;  %v2724_v5 = vld [vmem:[%s6604_s3 + $0xc8] sm:$0xff] }
 0x461   : > { %v2803_v13 = vsel %vm2763_vm3, %v6032_v15, -inf }
 0x462   : > { %2804 = vmax.xlane.f32.xlu1 %v2803_v13  ;;  %v4392_v27 = vpop.f32.mrb[8].mxu1  ;;  %v2800_v37 = vsel %vm2763_vm3, %v6034_v61, -inf }
 0x463   : > { %v6046_v24 = vadd.f32 %v4392_v27, %v2714_v43  ;;  %2801 = vmax.xlane.f32.xlu0 %v2800_v37  ;;  %v1986_v49 = vpop.f32.mrb[9].mxu1  ;;  %v6112_v27 = vpop.permute.xlu0 %1271 }
 0x464   : > { %v6048_v56 = vadd.f32 %v2713_v30, %v1986_v49 }
 0x465   : > { %v2809_v23 = vsel %vm2763_vm3, %v6046_v24, -inf }
 0x466   : > { %v4399_v20 = vpop.f32.mrb[14].mxu0  ;;  %2810 = vmax.xlane.f32.xlu1 %v2809_v23  ;;  %v2806_v11 = vsel %vm2763_vm3, %v6048_v56, -inf }
 0x467   : > { %v6060_v12 = vadd.f32 %v4399_v20, %v2716_v8  ;;  %v2077_v21 = vpop.f32.mrb[15].mxu0  ;;  %2807 = vmax.xlane.f32.xlu0 %v2806_v11  ;;  %v6116_v49 = vpop.permute.xlu0 %1287 }
 0x468   : > { %v6062_v57 = vadd.f32 %v2715_v38, %v2077_v21  ;;  %v6120_v11 = vpop.permute.xlu1 %3273 }
 0x469   : > { %v2815_v17 = vsel %vm2763_vm3, %v6060_v12, -inf }
 0x46a   : > { %2816 = vmax.xlane.f32.xlu1 %v2815_v17  ;;  %v2812_v9 = vsel %vm2763_vm3, %v6062_v57, -inf }
 0x46b   : > { %2813 = vmax.xlane.f32.xlu0 %v2812_v9  ;;  %v6118_v23 = vpop.permute.xlu0 %1281 }
 0x46c   : > { %v4406_v48 = vpop.f32.mrb[10].mxu1 }
 0x46d   : > { %v6074_v31 = vadd.f32 %v4406_v48, %v2718_v28  ;;  %v2164_v46 = vpop.f32.mrb[11].mxu1 }
 0x46e   : > { %v6076_v44 = vadd.f32 %v2717_v45, %v2164_v46 }
 0x46f   : > { %v2821_v25 = vsel %vm2763_vm3, %v6074_v31, -inf }
 0x470   : > { %2822 = vmax.xlane.f32.xlu1 %v2821_v25  ;;  %v2818_v47 = vsel %vm2763_vm3, %v6076_v44, -inf }
 0x471   : > { %2819 = vmax.xlane.f32.xlu0 %v2818_v47 }
 0x478   : > { %v4413_v18 = vpop.f32.mrb[16].mxu0 }
 0x479   : > { %v6088_v14 = vadd.f32 %v4413_v18, %v2720_v60  ;;  %v2251_v34 = vpop.f32.mrb[17].mxu0 }
 0x47a   : > { %v6092_v3 = vadd.f32 %v2719_v42, %v2251_v34  ;;  %v2721_v42 = vld [vmem:[%s6604_s3 + $0xb0] sm:$0xff] }
 0x47b   : > { %v2827_v62 = vsel %vm2763_vm3, %v6088_v14, -inf }
 0x47c   : > { %2828 = vmax.xlane.f32.xlu1 %v2827_v62  ;;  %v2824_v26 = vsel %vm2763_vm3, %v6092_v3, -inf }
 0x47d   : > { %2825 = vmax.xlane.f32.xlu0 %v2824_v26  ;;  %v2723_v26 = vld [vmem:[%s6604_s3 + $0xc0] sm:$0xff] }
 0x480   : > { %v4427_v4 = vpop.f32.mrb[18].mxu0 }
 0x481   : > { %v2429_v2 = vpop.f32.mrb[19].mxu0  ;;  %v6108_v13 = vadd.f32 %v4427_v4, %v2724_v5  ;;  %v2728_v5 = vld [vmem:[%s6604_s3 + $0xe8] sm:$0xff] }
 0x482   : > { %v4420_v59 = vpop.f32.mrb[12].mxu1 }
 0x483   : > { %v6106_v6 = vadd.f32 %v4420_v59, %v2722_v63  ;;  %v2338_v43 = vpop.f32.mrb[13].mxu1  ;;  %v2839_v37 = vsel %vm2763_vm3, %v6108_v13, -inf  ;;  %v6149_v59 = vadd.f32 %v2723_v26, %v2429_v2 }
 0x485   : > { %v2833_v30 = vsel %vm2763_vm3, %v6106_v6, -inf }
 0x486   : > { %2834 = vmax.xlane.f32.xlu1 %v2833_v30  ;;  %v2725_v30 = vld [vmem:[%s6604_s3 + $0xd0] sm:$0xff] }
 0x48a   : > { %2840 = vmax.xlane.f32.xlu1 %v2839_v37 }
 0x48e   : > { %v4434_v8 = vpop.f32.mrb[14].mxu1 }
 0x48f   : > { %v2516_v38 = vpop.f32.mrb[15].mxu1 }
 0x490   : > { %v6163_v2 = vadd.f32 %v2725_v30, %v2516_v38 }
 0x492   : > { %v4441_v20 = vpop.f32.mrb[20].mxu0 }
 0x493   : > { %v2603_v21 = vpop.f32.mrb[21].mxu0  ;;  %v6156_v37 = vadd.f32 %v4441_v20, %v2728_v5 }
 0x496   : > { %v4448_v9 = vpop.f32.mrb[16].mxu1 }
 0x497   : > { %v2690_v48 = vpop.f32.mrb[17].mxu1 }
 0x49a   : > { %v2769_v17 = vpop.xlane.xlu0 %2768 }
 0x49b   : > { %v2861_v28 = vsub.f32 %v5936_v35, %v2769_v17  ;;  %v2766_v45 = vpop.xlane.xlu1 %2765  ;;  %v2726_v35 = vld [vmem:[%s6604_s3 + $0xd8] sm:$0xff] }
 0x49c   : > { %v2860_v46 = vsub.f32 %v5938_v41, %v2766_v45  ;;  %v6135_v41 = vadd.f32 %v2721_v42, %v2338_v43  ;;  %v6142_v4 = vadd.f32 %v4434_v8, %v2726_v35  ;;  %v2730_v17 = vld [vmem:[%s6604_s3 + $0xf8] sm:$0xff]  ;;  %v2727_v45 = vld [vmem:[%s6604_s3 + $0xe0] sm:$0xff] }
 0x49d   : > { %v2894_v25 = vmul.f32 1.442695, %v2861_v28  ;;  %v2836_v28 = vsel %vm2763_vm3, %v6149_v59, -inf  ;;  %v6170_v20 = vadd.f32 %v4448_v9, %v2730_v17  ;;  %v6177_v38 = vadd.f32 %v2727_v45, %v2603_v21 }
 0x49e   : > { %v2892_v47 = vmul.f32 1.442695, %v2860_v46  ;;  %v3133_v60 = vpop.permute.xlu0 %3132  ;;  %v2830_v43 = vsel %vm2763_vm3, %v6135_v41, -inf  ;;  %v2845_v8 = vsel %vm2763_vm3, %v6142_v4, -inf  ;;  %v2851_v46 = vsel %vm2763_vm3, %v6156_v37, -inf }
 0x49f   : > { %5015 = vpow2.f32 %v2894_v25  ;;  %4450 = vmatpush3.bf16.msra.mxu0 %v3133_v60  ;;  %v2729_v25 = vld [vmem:[%s6604_s3 + $0xf0] sm:$0xff]  ;;  %v2857_v9 = vsel %vm2763_vm3, %v6170_v20, -inf  ;;  %v2848_v42 = vsel %vm2763_vm3, %v6177_v38, -inf }
 0x4a0   : > { %5017 = vpow2.f32 %v2892_v47  ;;  %4461 = vmatprep.subr.bf16.mxu0 %v5162_v16  ;;  %v2842_v47 = vsel %vm2763_vm3, %v6163_v2, -inf  ;;  %v6181_v60 = vadd.f32 %v2729_v25, %v2690_v48 }
 0x4a2   : > { %v2854_v35 = vsel %vm2763_vm3, %v6181_v60, -inf  ;;  %v6194_v48 = vpop.permute.xlu0 %3226 }
 0x4a9   : > { %v6131_v18 = vpop.eup %5015 }
 0x4aa   : > { %v6133_v34 = vpop.eup %5017  ;;  %v2959_v62 = vsel %vm2763_vm3, %v6131_v18, 0.0 }
 0x4ab   : > { %2960 = vadd.xlane.f32.xlu0 %v2959_v62  ;;  %v2956_v63 = vsel %vm2763_vm3, %v6133_v34, 0.0 }
 0x4ac   : > { %2957 = vadd.xlane.f32.xlu1 %v2956_v63 }
 0x4af   : > { %2831 = vmax.xlane.f32.xlu0 %v2830_v43 }
 0x4b0   : > { %2846 = vmax.xlane.f32.xlu1 %v2845_v8 }
 0x4b3   : > { %2837 = vmax.xlane.f32.xlu0 %v2836_v28 }
 0x4b4   : > { %2852 = vmax.xlane.f32.xlu1 %v2851_v46 }
 0x4b7   : > { %2843 = vmax.xlane.f32.xlu0 %v2842_v47 }
 0x4b8   : > { %2858 = vmax.xlane.f32.xlu1 %v2857_v9 }
 0x4bb   : > { %2849 = vmax.xlane.f32.xlu0 %v2848_v42 }
 0x4bc   : > { %2855 = vmax.xlane.f32.xlu1 %v2854_v35 }
 0x4c1   : > { %v2775_v21 = vpop.xlane.xlu1 %2774 }
 0x4c2   : > { %v2863_v62 = vsub.f32 %v5954_v0, %v2775_v21 }
 0x4c4   : > { %v2898_v26 = vmul.f32 1.442695, %v2863_v62 }
 0x4c6   : > { %5019 = vpow2.f32 %v2898_v26 }
 0x4d0   : > { %v6196_v63 = vpop.eup %5019 }
 0x4d1   : > { %v2965_v5 = vsel %vm2763_vm3, %v6196_v63, 0.0 }
 0x4d2   : > { %2966 = vadd.xlane.f32.xlu1 %v2965_v5 }
 0x4d3   : > { %v2772_v43 = vpop.xlane.xlu0 %2771 }
 0x4d4   : > { %v2862_v0 = vsub.f32 %v5966_v58, %v2772_v43 }
 0x4d6   : > { %v2896_v45 = vmul.f32 1.442695, %v2862_v0 }
 0x4d7   : > { %v2781_v30 = vpop.xlane.xlu1 %2780 }
 0x4d8   : > { %v2865_v8 = vsub.f32 %v5976_v36, %v2781_v30  ;;  %v2778_v17 = vpop.xlane.xlu0 %2777 }
 0x4d9   : > { %v2864_v28 = vsub.f32 %v5978_v19, %v2778_v17 }
 0x4da   : > { %v2902_v46 = vmul.f32 1.442695, %v2865_v8 }
 0x4db   : > { %v2900_v25 = vmul.f32 1.442695, %v2864_v28  ;;  %v2787_v47 = vpop.xlane.xlu1 %2786 }
 0x4dc   : > { %5021 = vpow2.f32 %v2902_v46  ;;  %v2867_v9 = vsub.f32 %v5990_v50, %v2787_v47  ;;  %v2784_v42 = vpop.xlane.xlu0 %2783 }
 0x4dd   : > { %5023 = vpow2.f32 %v2900_v25  ;;  %v2866_v21 = vsub.f32 %v5992_v40, %v2784_v42 }
 0x4de   : > { %5025 = vpow2.f32 %v2896_v45  ;;  %v2906_v35 = vmul.f32 1.442695, %v2867_v9 }
 0x4df   : > { %v2793_v58 = vpop.xlane.xlu1 %2792  ;;  %v2904_v26 = vmul.f32 1.442695, %v2866_v21 }
 0x4e0   : > { %v2869_v62 = vsub.f32 %v6004_v54, %v2793_v58  ;;  %v2790_v36 = vpop.xlane.xlu0 %2789  ;;  %5027 = vpow2.f32 %v2906_v35 }
 0x4e1   : > { %v2868_v5 = vsub.f32 %v6006_v29, %v2790_v36 }
 0x4e2   : > { %v2910_v19 = vmul.f32 1.442695, %v2869_v62 }
 0x4e3   : > { %v2799_v43 = vpop.xlane.xlu1 %2798  ;;  %v2908_v8 = vmul.f32 1.442695, %v2868_v5 }
 0x4e4   : > { %5029 = vpow2.f32 %v2910_v19  ;;  %v2871_v0 = vsub.f32 %v6018_v7, %v2799_v43  ;;  %v2796_v50 = vpop.xlane.xlu0 %2795 }
 0x4e5   : > { %5031 = vpow2.f32 %v2904_v26  ;;  %v2870_v40 = vsub.f32 %v6020_v51, %v2796_v50 }
 0x4e6   : > { %v6208_v30 = vpop.eup %5021  ;;  %v2914_v17 = vmul.f32 1.442695, %v2871_v0 }
 0x4e7   : > { %v6211_v28 = vpop.eup %5023  ;;  %v2971_v54 = vsel %vm2763_vm3, %v6208_v30, 0.0  ;;  %v2912_v7 = vmul.f32 1.442695, %v2870_v40 }
 0x4e8   : > { %v6215_v45 = vpop.eup %5025  ;;  %5033 = vpow2.f32 %v2914_v17  ;;  %2972 = vadd.xlane.f32.xlu1 %v2971_v54  ;;  %v2968_v29 = vsel %vm2763_vm3, %v6211_v28, 0.0 }
 0x4e9   : > { %2969 = vadd.xlane.f32.xlu0 %v2968_v29  ;;  %5035 = vpow2.f32 %v2908_v8  ;;  %v2962_v46 = vsel %vm2763_vm3, %v6215_v45, 0.0 }
 0x4ea   : > { %v6221_v25 = vpop.eup %5027  ;;  %5037 = vpow2.f32 %v2912_v7 }
 0x4eb   : > { %v2977_v42 = vsel %vm2763_vm3, %v6221_v25, 0.0 }
 0x4ec   : > { %2963 = vadd.xlane.f32.xlu1 %v2962_v46 }
 0x4ee   : > { %v6223_v51 = vpop.eup %5029 }
 0x4ef   : > { %v2805_v47 = vpop.xlane.xlu1 %2804  ;;  %v2983_v9 = vsel %vm2763_vm3, %v6223_v51, 0.0  ;;  %v6229_v35 = vpop.eup %5031 }
 0x4f0   : > { %v2873_v21 = vsub.f32 %v6032_v15, %v2805_v47  ;;  %v2802_v58 = vpop.xlane.xlu0 %2801  ;;  %2984 = vadd.xlane.f32.xlu0 %v2983_v9  ;;  %2978 = vadd.xlane.f32.xlu1 %v2977_v42  ;;  %v2974_v0 = vsel %vm2763_vm3, %v6229_v35, 0.0 }
 0x4f1   : > { %v2872_v62 = vsub.f32 %v6034_v61, %v2802_v58 }
 0x4f2   : > { %v6233_v36 = vpop.eup %5033  ;;  %v2918_v26 = vmul.f32 1.442695, %v2873_v21 }
 0x4f3   : > { %v2916_v19 = vmul.f32 1.442695, %v2872_v62  ;;  %v2811_v5 = vpop.xlane.xlu1 %2810  ;;  %v2989_v43 = vsel %vm2763_vm3, %v6233_v36, 0.0  ;;  %v6239_v50 = vpop.eup %5035 }
 0x4f4   : > { %5039 = vpow2.f32 %v2918_v26  ;;  %v2875_v15 = vsub.f32 %v6046_v24, %v2811_v5  ;;  %v2808_v8 = vpop.xlane.xlu0 %2807  ;;  %2990 = vadd.xlane.f32.xlu0 %v2989_v43  ;;  %2975 = vadd.xlane.f32.xlu1 %v2974_v0  ;;  %v2980_v54 = vsel %vm2763_vm3, %v6239_v50, 0.0  ;;  %v6245_v29 = vpop.eup %5037 }
 0x4f5   : > { %5041 = vpow2.f32 %v2916_v19  ;;  %v2874_v17 = vsub.f32 %v6048_v56, %v2808_v8  ;;  %v2986_v21 = vsel %vm2763_vm3, %v6245_v29, 0.0 }
 0x4f6   : > { %v2922_v61 = vmul.f32 1.442695, %v2875_v15 }
 0x4f7   : > { %v2817_v40 = vpop.xlane.xlu1 %2816  ;;  %v2920_v47 = vmul.f32 1.442695, %v2874_v17 }
 0x4f8   : > { %5043 = vpow2.f32 %v2922_v61  ;;  %v2877_v7 = vsub.f32 %v6060_v12, %v2817_v40  ;;  %v2814_v46 = vpop.xlane.xlu0 %2813  ;;  %2981 = vadd.xlane.f32.xlu1 %v2980_v54 }
 0x4f9   : > { %v2876_v24 = vsub.f32 %v6062_v57, %v2814_v46 }
 0x4fa   : > { %v2926_v9 = vmul.f32 1.442695, %v2877_v7 }
 0x4fb   : > { %v2924_v42 = vmul.f32 1.442695, %v2876_v24 }
 0x4fc   : > { %5045 = vpow2.f32 %v2926_v9  ;;  %2987 = vadd.xlane.f32.xlu1 %v2986_v21 }
 0x4fd   : > { %5047 = vpow2.f32 %v2924_v42  ;;  %v2823_v62 = vpop.xlane.xlu1 %2822 }
 0x4fe   : > { %v6251_v56 = vpop.eup %5039  ;;  %5049 = vpow2.f32 %v2920_v47  ;;  %v2879_v19 = vsub.f32 %v6074_v31, %v2823_v62  ;;  %v2820_v5 = vpop.xlane.xlu0 %2819 }
 0x4ff   : > { %v6253_v58 = vpop.eup %5041  ;;  %v2995_v12 = vsel %vm2763_vm3, %v6251_v56, 0.0  ;;  %v2878_v43 = vsub.f32 %v6076_v44, %v2820_v5 }
 0x500   : > { %2996 = vadd.xlane.f32.xlu0 %v2995_v12  ;;  %v2992_v57 = vsel %vm2763_vm3, %v6253_v58, 0.0  ;;  %v2930_v15 = vmul.f32 1.442695, %v2879_v19 }
 0x501   : > { %2993 = vadd.xlane.f32.xlu1 %v2992_v57  ;;  %v2928_v8 = vmul.f32 1.442695, %v2878_v43 }
 0x502   : > { %v6259_v26 = vpop.eup %5043  ;;  %5051 = vpow2.f32 %v2930_v15 }
 0x503   : > { %v3001_v0 = vsel %vm2763_vm3, %v6259_v26, 0.0  ;;  %5053 = vpow2.f32 %v2928_v8 }
 0x504   : > { %3002 = vadd.xlane.f32.xlu0 %v3001_v0 }
 0x506   : > { %v6265_v61 = vpop.eup %5045 }
 0x507   : > { %v6267_v17 = vpop.eup %5047  ;;  %v3007_v40 = vsel %vm2763_vm3, %v6265_v61, 0.0 }
 0x508   : > { %v6271_v54 = vpop.eup %5049  ;;  %3008 = vadd.xlane.f32.xlu1 %v3007_v40  ;;  %v3004_v31 = vsel %vm2763_vm3, %v6267_v17, 0.0 }
 0x509   : > { %3005 = vadd.xlane.f32.xlu0 %v3004_v31  ;;  %v2998_v44 = vsel %vm2763_vm3, %v6271_v54, 0.0  ;;  %v2829_v7 = vpop.xlane.xlu1 %2828 }
 0x50a   : > { %v2881_v46 = vsub.f32 %v6088_v14, %v2829_v7  ;;  %v2826_v24 = vpop.xlane.xlu0 %2825 }
 0x50b   : > { %v2880_v47 = vsub.f32 %v6092_v3, %v2826_v24 }
 0x50c   : > { %2999 = vadd.xlane.f32.xlu1 %v2998_v44  ;;  %v6279_v9 = vpop.eup %5051  ;;  %v2934_v42 = vmul.f32 1.442695, %v2881_v46 }
 0x50d   : > { %v2932_v21 = vmul.f32 1.442695, %v2880_v47  ;;  %v3013_v12 = vsel %vm2763_vm3, %v6279_v9, 0.0  ;;  %v6283_v57 = vpop.eup %5053 }
 0x50e   : > { %5055 = vpow2.f32 %v2934_v42  ;;  %3014 = vadd.xlane.f32.xlu0 %v3013_v12  ;;  %v3010_v62 = vsel %vm2763_vm3, %v6283_v57, 0.0 }
 0x50f   : > { %5057 = vpow2.f32 %v2932_v21 }
 0x512   : > { %3011 = vadd.xlane.f32.xlu0 %v3010_v62 }
 0x513   : > { %v2835_v14 = vpop.xlane.xlu1 %2834 }
 0x514   : > { %v2883_v19 = vsub.f32 %v6106_v6, %v2835_v14 }
 0x516   : > { %v2938_v3 = vmul.f32 1.442695, %v2883_v19 }
 0x517   : > { %v2841_v6 = vpop.xlane.xlu1 %2840 }
 0x518   : > { %v6288_v5 = vpop.eup %5055  ;;  %5059 = vpow2.f32 %v2938_v3 }
 0x519   : > { %v6290_v43 = vpop.eup %5057  ;;  %v3019_v0 = vsel %vm2763_vm3, %v6288_v5, 0.0 }
 0x51a   : > { %3020 = vadd.xlane.f32.xlu1 %v3019_v0  ;;  %v3016_v15 = vsel %vm2763_vm3, %v6290_v43, 0.0 }
 0x51b   : > { %3017 = vadd.xlane.f32.xlu0 %v3016_v15 }
 0x522   : > { %v6296_v8 = vpop.eup %5059 }
 0x523   : > { %v3025_v40 = vsel %vm2763_vm3, %v6296_v8, 0.0 }
 0x524   : > { %3026 = vadd.xlane.f32.xlu0 %v3025_v40 }
 0x52b   : > { %3367 = vrot.lane.b32.xlu1 %v6090_v33, %s5163_s15 }
 0x538   : > { %v2961_v31 = vpop.xlane.xlu0 %2960 }
 0x539   : > { %5061 = vrcp.f32 %v2961_v31  ;;  %v2958_v44 = vpop.xlane.xlu1 %2957 }
 0x53a   : > { %5063 = vrcp.f32 %v2958_v44 }
 0x53c   : > { %v2832_v7 = vpop.xlane.xlu0 %2831 }
 0x53d   : > { %v2882_v46 = vsub.f32 %v6135_v41, %v2832_v7  ;;  %v2847_v24 = vpop.xlane.xlu1 %2846  ;;  %v2885_v7 = vsub.f32 %v6108_v13, %v2841_v6 }
 0x53e   : > { %v2887_v21 = vsub.f32 %v6142_v4, %v2847_v24 }
 0x53f   : > { %v2936_v47 = vmul.f32 1.442695, %v2882_v46 }
 0x540   : > { %v2838_v42 = vpop.xlane.xlu0 %2837  ;;  %v2946_v0 = vmul.f32 1.442695, %v2887_v21 }
 0x541   : > { %5065 = vpow2.f32 %v2936_v47  ;;  %v2884_v12 = vsub.f32 %v6149_v59, %v2838_v42  ;;  %v6324_v40 = vpop.xlane.xlu1 %2852  ;;  %v2942_v47 = vmul.f32 1.442695, %v2885_v7 }
 0x543   : > { %v5062_v62 = vpop.eup %5061  ;;  %v2940_v14 = vmul.f32 1.442695, %v2884_v12 }
 0x544   : > { %v5064_v19 = vpop.eup %5063  ;;  %v3085_v33 = vmul.f32 %v5062_v62, %v6131_v18  ;;  %v2844_v44 = vpop.xlane.xlu0 %2843 }
 0x545   : > { %v3084_v3 = vmul.f32 %v5064_v19, %v6133_v34  ;;  %5067 = vpow2.f32 %v2940_v14  ;;  %v2859_v31 = vpop.xlane.xlu1 %2858  ;;  %v2886_v46 = vsub.f32 %v6163_v2, %v2844_v44 }
 0x546   : > { %5069 = vpow2.f32 %v2946_v0  ;;  %v2891_v13 = vsub.f32 %v6170_v20, %v2859_v31 }
 0x547   : > { %v3116_v15 = vpack.c.bf16 %v3085_v33, %v3084_v3  ;;  %v2944_v42 = vmul.f32 1.442695, %v2886_v46  ;;  %5071 = vpow2.f32 %v2942_v47 }
 0x548   : > { %v2850_v12 = vpop.xlane.xlu0 %2849  ;;  %v2954_v33 = vmul.f32 1.442695, %v2891_v13 }
 0x549   : > { %4452 = vmatmul.mubr.msk.bf16.vlgmr.msra.gmra.mrb[24].mxu0 %vm2763_vm3, %v3116_v15  ;;  %v6332_v24 = vpop.xlane.xlu1 %2855  ;;  %5073 = vpow2.f32 %v2944_v42 }
 0x54a   : > { %4462 = vmatpush3.bf16.msra.mxu0 %v6194_v48  ;;  %4463 = vmatprep.mubr.msk.bf16.mxu0 %vm5164_vm4, %v5162_v16 }
 0x54b   : > { %v6311_v41 = vpop.eup %5065  ;;  %4473 = vmatprep.subr.bf16.mxu0 %v5162_v16 }
 0x54c   : > { %v3022_v18 = vsel %vm2763_vm3, %v6311_v41, 0.0 }
 0x54d   : > { %3023 = vadd.xlane.f32.xlu0 %v3022_v18 }
 0x54f   : > { %v6316_v34 = vpop.eup %5067 }
 0x550   : > { %v3028_v4 = vsel %vm2763_vm3, %v6316_v34, 0.0  ;;  %v6320_v59 = vpop.eup %5069 }
 0x551   : > { %3029 = vadd.xlane.f32.xlu1 %v3028_v4  ;;  %v3037_v48 = vsel %vm2763_vm3, %v6320_v59, 0.0  ;;  %v6336_v19 = vpop.eup %5071 }
 0x552   : > { %v3031_v4 = vsel %vm2763_vm3, %v6336_v19, 0.0 }
 0x553   : > { %v6338_v3 = vpop.eup %5073 }
 0x554   : > { %v3034_v42 = vsel %vm2763_vm3, %v6338_v3, 0.0 }
 0x555   : > { %3038 = vadd.xlane.f32.xlu1 %v3037_v48 }
 0x55f   : > { %v2967_v21 = vpop.xlane.xlu1 %2966 }
 0x563   : > { %3320 = vrot.lane.b32.xlu0 %v5803_v32, %s5163_s15  ;;  %v2888_v32 = vsub.f32 %v6177_v38, %v2850_v12 }
 0x565   : > { %v2948_v6 = vmul.f32 1.442695, %v2888_v32 }
 0x566   : > { %3461 = vrot.lane.b32.xlu1 %v6098_v1, %s5163_s15 }
 0x575   : > { %v2973_v62 = vpop.xlane.xlu1 %2972 }
 0x576   : > { %5075 = vrcp.f32 %v2973_v62  ;;  %v2970_v14 = vpop.xlane.xlu0 %2969 }
 0x577   : > { %5077 = vrcp.f32 %v2970_v14 }
 0x578   : > { %5079 = vrcp.f32 %v2967_v21 }
 0x579   : > { %v2964_v1 = vpop.xlane.xlu1 %2963 }
 0x57a   : > { %5081 = vrcp.f32 %v2964_v1 }
 0x57b   : > { %5083 = vpow2.f32 %v2948_v6 }
 0x57d   : > { %v2979_v2 = vpop.xlane.xlu1 %2978  ;;  %v6344_v31 = vpop.xlane.xlu0 %2984 }
 0x57e   : > { %5085 = vrcp.f32 %v2979_v2 }
 0x57f   : > { %5087 = vpow2.f32 %v2954_v33 }
 0x580   : > { %v5076_v0 = vpop.eup %5075 }
 0x581   : > { %v5078_v15 = vpop.eup %5077  ;;  %v3089_v38 = vmul.f32 %v5076_v0, %v6208_v30  ;;  %v2976_v18 = vpop.xlane.xlu1 %2975 }
 0x582   : > { %v5080_v48 = vpop.eup %5079  ;;  %v3088_v20 = vmul.f32 %v5078_v15, %v6211_v28  ;;  %3032 = vadd.xlane.f32.xlu0 %v3031_v4  ;;  %5089 = vrcp.f32 %v2976_v18  ;;  %v2991_v12 = vpop.xlane.xlu0 %2990 }
 0x583   : > { %v3087_v46 = vmul.f32 %v5080_v48, %v6196_v63 }
 0x584   : > { %v5082_v44 = vpop.eup %5081  ;;  %v3118_v7 = vpack.c.bf16 %v3089_v38, %v3088_v20 }
 0x585   : > { %v3086_v47 = vmul.f32 %v5082_v44, %v6215_v45  ;;  %v6348_v30 = vpop.xlane.xlu1 %2981  ;;  %v6355_v28 = vpop.eup %5083 }
 0x586   : > { %3035 = vadd.xlane.f32.xlu0 %v3034_v42  ;;  %4464 = vmatmul.mubr.msk.bf16.vlgmr.msra.gmra.mrb[28].mxu0 %vm2763_vm3, %v3118_v7  ;;  %v3040_v62 = vsel %vm2763_vm3, %v6355_v28, 0.0 }
 0x587   : > { %v3117_v21 = vpack.c.bf16 %v3087_v46, %v3086_v47  ;;  %4475 = vmatprep.mubr.msk.bf16.mxu0 %vm5164_vm4, %v5162_v16 }
 0x588   : > { %v5086_v45 = vpop.eup %5085 }
 0x589   : > { %4458 = vmatmul.mubr.msk.bf16.vlgmr.msra.gmra.mrb[20].mxu1 %vm2763_vm3, %v3117_v21  ;;  %v2988_v63 = vpop.xlane.xlu1 %2987  ;;  %v6364_v32 = vpop.eup %5087  ;;  %v3091_v13 = vmul.f32 %v5086_v45, %v6221_v25 }
 0x58a   : > { %4468 = vmatpush3.bf16.msra.mxu1 %v6120_v11  ;;  %4469 = vmatprep.mubr.msk.bf16.mxu1 %vm5164_vm4, %v5162_v16  ;;  %v3049_v2 = vsel %vm2763_vm3, %v6364_v32, 0.0 }
 0x58b   : > { %4479 = vmatprep.subr.bf16.mxu1 %v5162_v16  ;;  %3041 = vadd.xlane.f32.xlu1 %v3040_v62 }
 0x58c   : > { %v5090_v14 = vpop.eup %5089 }
 0x58d   : > { %v2997_v1 = vpop.xlane.xlu0 %2996  ;;  %v3090_v6 = vmul.f32 %v5090_v14, %v6229_v35 }
 0x58e   : > { %5091 = vrcp.f32 %v2997_v1  ;;  %v2994_v11 = vpop.xlane.xlu1 %2993 }
 0x58f   : > { %5093 = vrcp.f32 %v2994_v11  ;;  %3050 = vadd.xlane.f32.xlu1 %v3049_v2  ;;  %v3119_v33 = vpack.c.bf16 %v3091_v13, %v3090_v6 }
 0x591   : > { %v6370_v0 = vpop.xlane.xlu0 %3002  ;;  %4470 = vmatmul.mubr.msk.bf16.vlgmr.msra.gmra.mrb[24].mxu1 %vm2763_vm3, %v3119_v33 }
 0x592   : > { %4481 = vmatprep.mubr.msk.bf16.mxu1 %vm5164_vm4, %v5162_v16 }
 0x595   : > { %v3009_v15 = vpop.xlane.xlu1 %3008 }
 0x596   : > { %5095 = vrcp.f32 %v3009_v15  ;;  %v3006_v25 = vpop.xlane.xlu0 %3005 }
 0x597   : > { %5097 = vrcp.f32 %v3006_v25 }
 0x598   : > { %v5092_v35 = vpop.eup %5091  ;;  %5099 = vrcp.f32 %v2988_v63 }
 0x599   : > { %v5094_v38 = vpop.eup %5093  ;;  %v6376_v18 = vmul.f32 %v5092_v35, %v6251_v56  ;;  %5101 = vrcp.f32 %v2991_v12  ;;  %v3000_v42 = vpop.xlane.xlu1 %2999 }
 0x59a   : > { %v6379_v4 = vmul.f32 %v5094_v38, %v6253_v58 }
 0x59b   : > { %v3015_v20 = vpop.xlane.xlu0 %3014 }
 0x59c   : > { %3414 = vrot.lane.b32.xlu0 %v5946_v52, %s5163_s15  ;;  %v3122_v48 = vpack.c.bf16 %v6376_v18, %v6379_v4  ;;  %5103 = vrcp.f32 %v3015_v20  ;;  %v2889_v52 = vsub.f32 %v6156_v37, %v6324_v40 }
 0x59f   : > { %v3012_v58 = vpop.xlane.xlu0 %3011 }
 0x5a0   : > { %v5096_v44 = vpop.eup %5095  ;;  %3555 = vrot.lane.b32.xlu1 %v6112_v27, %s5163_s15  ;;  %5105 = vrcp.f32 %v3012_v58  ;;  %v2890_v27 = vsub.f32 %v6181_v60, %v6332_v24 }
 0x5a1   : > { %v5098_v7 = vpop.eup %5097  ;;  %v6386_v46 = vmul.f32 %v5096_v44, %v6265_v61  ;;  %v2950_v61 = vmul.f32 1.442695, %v2889_v52 }
 0x5a2   : > { %v6391_v56 = vmul.f32 %v5098_v7, %v6267_v17  ;;  %v5100_v17 = vpop.eup %5099  ;;  %v2952_v63 = vmul.f32 1.442695, %v2890_v27 }
 0x5a3   : > { %v5102_v21 = vpop.eup %5101  ;;  %5107 = vpow2.f32 %v2950_v61  ;;  %v3094_v45 = vmul.f32 %v5100_v17, %v6245_v29 }
 0x5a4   : > { %v3124_v47 = vpack.c.bf16 %v6386_v46, %v6391_v56  ;;  %3602 = vrot.lane.b32.xlu1 %v5949_v10, %s5163_s15  ;;  %v3095_v60 = vmul.f32 %v5102_v21, %v6233_v36 }
 0x5a6   : > { %v5104_v40 = vpop.eup %5103  ;;  %v3121_v14 = vpack.c.bf16 %v3095_v60, %v3094_v45 }
 0x5a7   : > { %v3021_v37 = vpop.xlane.xlu1 %3020  ;;  %v6408_v24 = vmul.f32 %v5104_v40, %v6279_v9 }
 0x5a8   : > { %3696 = vrot.lane.b32.xlu1 %v5824_v55, %s5163_s15  ;;  %5109 = vrcp.f32 %v3021_v37  ;;  %v3018_v12 = vpop.xlane.xlu0 %3017 }
 0x5a9   : > { %5111 = vrcp.f32 %v3018_v12 }
 0x5aa   : > { %v5106_v10 = vpop.eup %5105  ;;  %5113 = vpow2.f32 %v2952_v63 }
 0x5ab   : > { %v6411_v55 = vmul.f32 %v5106_v10, %v6283_v57  ;;  %v3368_v62 = vpop.permute.xlu1 %3367  ;;  %5115 = vrcp.f32 %v6348_v30 }
 0x5ac   : > { %3790 = vrot.lane.b32.xlu1 %v6118_v23, %s5163_s15  ;;  %4480 = vmatpush3.bf16.msra.mxu1 %v3368_v62  ;;  %5117 = vrcp.f32 %v6344_v31 }
 0x5ad   : > { %4491 = vmatprep.subr.bf16.mxu1 %v5162_v16  ;;  %v3125_v29 = vpack.c.bf16 %v6408_v24, %v6411_v55  ;;  %v6419_v23 = vpop.eup %5107  ;;  %5119 = vrcp.f32 %v3000_v42 }
 0x5ae   : > { %v3043_v13 = vsel %vm2763_vm3, %v6419_v23, 0.0 }
 0x5af   : > { %4482 = vmatmul.mubr.msk.bf16.vlgmr.msra.gmra.mrb[28].mxu1 %vm2763_vm3, %v3121_v14 }
 0x5b0   : > { %4493 = vmatprep.mubr.msk.bf16.mxu1 %vm5164_vm4, %v5162_v16 }
 0x5b2   : > { %v5110_v36 = vpop.eup %5109 }
 0x5b3   : > { %v5112_v9 = vpop.eup %5111  ;;  %v6422_v57 = vmul.f32 %v5110_v36, %v6288_v5  ;;  %v3027_v5 = vpop.xlane.xlu0 %3026 }
 0x5b4   : > { %v6425_v1 = vmul.f32 %v5112_v9, %v6290_v43  ;;  %v6431_v11 = vpop.eup %5113  ;;  %5121 = vrcp.f32 %v3027_v5 }
 0x5b5   : > { %v3046_v2 = vsel %vm2763_vm3, %v6431_v11, 0.0  ;;  %v5116_v43 = vpop.eup %5115  ;;  %5123 = vrcp.f32 %v6370_v0 }
 0x5b6   : > { %v3126_v6 = vpack.c.bf16 %v6422_v57, %v6425_v1  ;;  %v5118_v15 = vpop.eup %5117  ;;  %v3092_v25 = vmul.f32 %v5116_v43, %v6239_v50 }
 0x5b7   : > { %v3093_v31 = vmul.f32 %v5118_v15, %v6223_v51 }
 0x5b9   : > { %v3120_v35 = vpack.c.bf16 %v3093_v31, %v3092_v25 }
 0x5bb   : > { %3044 = vadd.xlane.f32.xlu0 %v3043_v13 }
 0x5bf   : > { %3047 = vadd.xlane.f32.xlu0 %v3046_v2 }
 0x5d5   : > { %3508 = vrot.lane.b32.xlu0 %v5816_v53, %s5163_s15 }
 0x5d9   : > { %3649 = vrot.lane.b32.xlu0 %v6116_v49, %s5163_s15  ;;  %v5120_v49 = vpop.eup %5119 }
 0x5da   : > { %v3024_v33 = vpop.xlane.xlu0 %3023  ;;  %v5122_v0 = vpop.eup %5121  ;;  %v3098_v51 = vmul.f32 %v5120_v49, %v6271_v54 }
 0x5db   : > { %5125 = vrcp.f32 %v3024_v33  ;;  %v5124_v50 = vpop.eup %5123  ;;  %v3107_v20 = vmul.f32 %v5122_v0, %v6296_v8 }
 0x5dc   : > { %v3099_v7 = vmul.f32 %v5124_v50, %v6259_v26 }
 0x5dd   : > { %3743 = vrot.lane.b32.xlu0 %v5956_v39, %s5163_s15 }
 0x5de   : > { %v3321_v53 = vpop.permute.xlu0 %3320  ;;  %v3030_v30 = vpop.xlane.xlu1 %3029  ;;  %v3123_v58 = vpack.c.bf16 %v3099_v7, %v3098_v51 }
 0x5df   : > { %4474 = vmatpush3.bf16.msra.mxu0 %v3321_v53  ;;  %5127 = vrcp.f32 %v3030_v30 }
 0x5e0   : > { %4485 = vmatprep.subr.bf16.mxu0 %v5162_v16 }
 0x5e1   : > { %3837 = vrot.lane.b32.xlu0 %v5960_v22, %s5163_s15  ;;  %s5165_s15 = smov 8  }
 0x5e2   : > { %4476 = vmatmul.mubr.msk.bf16.vlgmr.msra.gmra.mrb[32].mxu0 %vm2763_vm3, %v3120_v35  ;;  %v3039_v39 = vpop.xlane.xlu1 %3038 }
 0x5e3   : > { %4487 = vmatprep.mubr.msk.bf16.mxu0 %vm5164_vm4, %v5162_v16 }
 0x5e5   : > { %v5126_v38 = vpop.eup %5125 }
 0x5e6   : > { %v3106_v44 = vmul.f32 %v5126_v38, %v6311_v41  ;;  %v3462_v52 = vpop.permute.xlu1 %3461 }
 0x5e7   : > { %4492 = vmatpush3.bf16.msra.mxu1 %v3462_v52 }
 0x5e8   : > { %v3127_v22 = vpack.c.bf16 %v3107_v20, %v3106_v44  ;;  %4503 = vmatprep.subr.bf16.mxu1 %v5162_v16 }
 0x5e9   : > { %v5128_v42 = vpop.eup %5127 }
 0x5ea   : > { %4494 = vmatmul.mubr.msk.bf16.vlgmr.msra.gmra.mrb[32].mxu1 %vm2763_vm3, %v3123_v58  ;;  %v6462_v27 = vmul.f32 %v5128_v42, %v6316_v34 }
 0x5eb   : > { %4505 = vmatprep.mubr.msk.bf16.mxu1 %vm5164_vm4, %v5162_v16 }
 0x60f   : > { %v3033_v61 = vpop.xlane.xlu0 %3032 }
 0x610   : > { %5129 = vrcp.f32 %v3033_v61 }
 0x613   : > { %v3036_v54 = vpop.xlane.xlu0 %3035 }
 0x614   : > { %5131 = vrcp.f32 %v3036_v54 }
 0x615   : > { %5133 = vrcp.f32 %v3039_v39 }
 0x617   : > { %v3415_v8 = vpop.permute.xlu0 %3414 }
 0x618   : > { %4486 = vmatpush3.bf16.msra.mxu0 %v3415_v8  ;;  %v3042_v41 = vpop.xlane.xlu1 %3041 }
 0x619   : > { %4497 = vmatprep.subr.bf16.mxu0 %v5162_v16 }
 0x61a   : > { %v5130_v26 = vpop.eup %5129 }
 0x61b   : > { %v6465_v17 = vmul.f32 %v5130_v26, %v6336_v19  ;;  %4488 = vmatmul.mubr.msk.bf16.vlgmr.msra.gmra.mrb[36].mxu0 %vm2763_vm3, %v3122_v48 }
 0x61c   : > { %v6471_v21 = vpop.f32.mrb[24].mxu0  ;;  %4499 = vmatprep.mubr.msk.bf16.mxu0 %vm5164_vm4, %v5162_v16  ;;  %v3051_v40 = vpop.xlane.xlu1 %3050 }
 0x61d   : > { %v4453_v37 = vpop.f32.mrb[25].mxu0  ;;  %v3128_v12 = vpack.c.bf16 %v6465_v17, %v6462_v27 }
 0x61e   : > { %v6477_v34 = vpop.f32.mrb[26].mxu0  ;;  %v5132_v60 = vpop.eup %5131 }
 0x61f   : > { %v4454_v63 = vpop.f32.mrb[27].mxu0  ;;  %v5134_v55 = vpop.eup %5133  ;;  %v3110_v56 = vmul.f32 %v5132_v60, %v6338_v3 }
 0x620   : > { %v3556_v19 = vpop.permute.xlu1 %3555  ;;  %v3111_v14 = vmul.f32 %v5134_v55, %v6320_v59 }
 0x621   : > { %4504 = vmatpush3.bf16.msra.mxu1 %v3556_v19 }
 0x622   : > { %4515 = vmatprep.subr.bf16.mxu1 %v5162_v16  ;;  %v3129_v5 = vpack.c.bf16 %v3111_v14, %v3110_v56 }
 0x624   : > { %4506 = vmatmul.mubr.msk.bf16.vlgmr.msra.gmra.mrb[36].mxu1 %vm2763_vm3, %v3125_v29  ;;  %v3603_v45 = vpop.permute.xlu1 %3602 }
 0x625   : > { %4517 = vmatprep.mubr.msk.bf16.mxu1 %vm5164_vm4, %v5162_v16 }
 0x628   : > { %v3697_v29 = vpop.permute.xlu1 %3696 }
 0x62c   : > { %v3791_v31 = vpop.permute.xlu1 %3790 }
 0x648   : > { %v3045_v18 = vpop.xlane.xlu0 %3044 }
 0x64c   : > { %v3048_v4 = vpop.xlane.xlu0 %3047 }
 0x64d   : > { %5135 = vrcp.f32 %v3048_v4 }
 0x64e   : > { %5137 = vrcp.f32 %v3051_v40 }
 0x64f   : > { %5139 = vrcp.f32 %v3045_v18 }
 0x650   : > { %v3509_v48 = vpop.permute.xlu0 %3508  ;;  %5141 = vrcp.f32 %v3042_v41 }
 0x651   : > { %4498 = vmatpush3.bf16.msra.mxu0 %v3509_v48 }
 0x652   : > { %4509 = vmatprep.subr.bf16.mxu0 %v5162_v16 }
 0x654   : > { %v3650_v10 = vpop.permute.xlu0 %3649  ;;  %4500 = vmatmul.mubr.msk.bf16.vlgmr.msra.gmra.mrb[40].mxu0 %vm2763_vm3, %v3124_v47 }
 0x655   : > { %4510 = vmatpush3.bf16.msra.mxu0 %v3603_v45  ;;  %4516 = vmatpush3.bf16.msra.mxu1 %v3650_v10 }
 0x656   : > { %4527 = vmatprep.subr.bf16.mxu1 %v5162_v16  ;;  %4511 = vmatprep.mubr.msk.bf16.mxu0 %vm5164_vm4, %v5162_v16 }
 0x657   : > { %4521 = vmatprep.subr.bf16.mxu0 %v5162_v16  ;;  %v5136_v43 = vpop.eup %5135 }
 0x658   : > { %v3744_v24 = vpop.permute.xlu0 %3743  ;;  %4518 = vmatmul.mubr.msk.bf16.vlgmr.msra.gmra.mrb[40].mxu1 %vm2763_vm3, %v3127_v22  ;;  %v5138_v25 = vpop.eup %5137  ;;  %v3114_v57 = vmul.f32 %v5136_v43, %v6431_v11 }
 0x659   : > { %v3266_v46 = vpop.f32.mrb[28].mxu0  ;;  %4528 = vmatpush3.bf16.msra.mxu1 %v3744_v24  ;;  %4529 = vmatprep.mubr.msk.bf16.mxu1 %vm5164_vm4, %v5162_v16  ;;  %v5140_v1 = vpop.eup %5139 }
 0x65a   : > { %v4465_v47 = vpop.f32.mrb[29].mxu0  ;;  %4539 = vmatprep.subr.bf16.mxu1 %v5162_v16  ;;  %v5142_v53 = vpop.eup %5141  ;;  %v3113_v11 = vmul.f32 %v5140_v1, %v6419_v23 }
 0x65b   : > { %v3269_v62 = vpop.f32.mrb[30].mxu0  ;;  %v3112_v0 = vmul.f32 %v5142_v53, %v6355_v28 }
 0x65c   : > { %v4830_v36 = vpack.i.bf16 %v3269_v62, %v3266_v46  ;;  %v3219_v9 = vpop.f32.mrb[20].mxu1  ;;  %4512 = vmatmul.mubr.msk.bf16.vlgmr.msra.gmra.mrb[44].mxu0 %vm2763_vm3, %v3126_v6  ;;  %v4466_v13 = vpop.f32.mrb[31].mxu0  ;;  %v3115_v6 = vmul.f32 %v5138_v25, %v6364_v32 }
 0x65d   : > { %4522 = vmatpush3.bf16.msra.mxu0 %v3697_v29  ;;  %v4459_v2 = vpop.f32.mrb[21].mxu1  ;;  %4523 = vmatprep.mubr.msk.bf16.mxu0 %vm5164_vm4, %v5162_v16  ;;  %v3838_v15 = vpop.permute.xlu0 %3837  ;;  %v3130_v38 = vpack.c.bf16 %v3113_v11, %v3112_v0 }
 0x65e   : > { %v3222_v3 = vpop.f32.mrb[22].mxu1  ;;  %4533 = vmatprep.subr.bf16.mxu0 %v5162_v16  ;;  %v3131_v49 = vpack.c.bf16 %v3115_v6, %v3114_v57 }
 0x65f   : > { %v4825_v59 = vpack.i.bf16 %v3222_v3, %v3219_v9  ;;  %v4460_v33 = vpop.f32.mrb[23].mxu1 }
 0x660   : > { %4530 = vmatmul.mubr.msk.bf16.vlgmr.msra.gmra.mrb[44].mxu1 %vm2763_vm3, %v3129_v5 }
 0x661   : > { %4540 = vmatpush3.bf16.msra.mxu1 %v3838_v15  ;;  %4826 = vrot.lane.b32.xlu1 %v4825_v59, %s5165_s15 }
 0x662   : > { %4541 = vmatprep.mubr.msk.bf16.mxu1 %vm5164_vm4, %v5162_v16 }
 0x664   : > { %4524 = vmatmul.mubr.msk.bf16.vlgmr.msra.gmra.mrb[48].mxu0 %vm2763_vm3, %v3128_v12  ;;  %v3313_v30 = vpop.f32.mrb[24].mxu1 }
 0x665   : > { %4534 = vmatpush3.bf16.msra.mxu0 %v3791_v31  ;;  %4831 = vrot.lane.b32.xlu1 %v4830_v36, %s5166_s13  ;;  %v4471_v35 = vpop.f32.mrb[25].mxu1 }
 0x666   : > { %4535 = vmatprep.mubr.msk.bf16.mxu0 %vm5164_vm4, %v5162_v16  ;;  %v3316_v32 = vpop.f32.mrb[26].mxu1 }
 0x667   : > { %v4835_v50 = vpack.i.bf16 %v3316_v32, %v3313_v30  ;;  %v4472_v39 = vpop.f32.mrb[27].mxu1 }
 0x668   : > { %4542 = vmatmul.mubr.msk.bf16.vlgmr.msra.gmra.mrb[48].mxu1 %vm2763_vm3, %v3131_v49 }
 0x669   : > { %4836 = vrot.lane.b32.xlu0 %v4835_v50, %s5167_s14 }
 0x66c   : > { %4536 = vmatmul.mubr.msk.bf16.vlgmr.msra.gmra.mrb[52].mxu0 %vm2763_vm3, %v3130_v38 }
 0x682   : > { %v3407_v51 = vpop.f32.mrb[28].mxu1 }
 0x683   : > { %v4483_v23 = vpop.f32.mrb[29].mxu1 }
 0x684   : > { %v3410_v20 = vpop.f32.mrb[30].mxu1 }
 0x685   : > { %v4840_v44 = vpack.i.bf16 %v3410_v20, %v3407_v51  ;;  %v4484_v7 = vpop.f32.mrb[31].mxu1 }
 0x687   : > { %4841 = vrot.lane.b32.xlu0 %v4840_v44, %s5165_s15 }
 0x6b5   : > { %v6527_v16 = vpop.f32.mrb[32].mxu0 }
 0x6b6   : > { %v4477_v28 = vpop.f32.mrb[33].mxu0 }
 0x6b7   : > { %v6529_v52 = vpop.f32.mrb[34].mxu0 }
 0x6b8   : > { %v4478_v22 = vpop.f32.mrb[35].mxu0 }
 0x6bd   : > { %v3501_v58 = vpop.f32.mrb[32].mxu1 }
 0x6be   : > { %v4495_v61 = vpop.f32.mrb[33].mxu1 }
 0x6bf   : > { %v3504_v54 = vpop.f32.mrb[34].mxu1 }
 0x6c0   : > { %v4850_v8 = vpack.i.bf16 %v3504_v54, %v3501_v58  ;;  %v4496_v42 = vpop.f32.mrb[35].mxu1 }
 0x6d3   : > { %v4827_v41 = vpop.permute.xlu1 %4826 }
 0x6d4   : > { %v4829_v27 = vunpack.i.h.bf16 %v4827_v41  ;;  %v4828_v17 = vunpack.i.l.bf16 %v4827_v41 }
 0x6d6   : > { %v3981_v63 = vsel %vm356_vm1, %v6477_v34, %v4829_v27  ;;  %v3980_v19 = vsel %vm356_vm1, %v6471_v21, %v4828_v17 }
 0x6d7   : > { %v4832_v26 = vpop.permute.xlu1 %4831 }
 0x6d8   : > { %v4834_v37 = vunpack.i.h.bf16 %v4832_v26  ;;  %v4833_v40 = vunpack.i.l.bf16 %v4832_v26 }
 0x6da   : > { %v3988_v48 = vsel %vm2763_vm3, %v3980_v19, %v4833_v40  ;;  %v3989_v45 = vsel %vm2763_vm3, %v3981_v63, %v4834_v37 }
 0x6db   : > { %v4837_v12 = vpop.permute.xlu0 %4836 }
 0x6dc   : > { %v4839_v18 = vunpack.i.h.bf16 %v4837_v12  ;;  %v4838_v4 = vunpack.i.l.bf16 %v4837_v12 }
 0x6de   : > { %v3997_v10 = vsel %vm3996_vm5, %v3988_v48, %v4838_v4  ;;  %v3998_v34 = vsel %vm3996_vm5, %v3989_v45, %v4839_v18 }
 0x6df   : > { %v4215_v60 = vpack.c.bf16 %v3997_v10, %v3997_v10  ;;  %v4216_v21 = vpack.c.bf16 %v3998_v34, %v3998_v34 }
 0x6e1   : > { %4038 = vst.msk [vmem:[%s6541_s20] sm:$0xf] %vm4037_vm6, %v4215_v60  ;;  %4039 = vst.msk [vmem:[%s6541_s20 + $0x4] sm:$0xf] %vm4037_vm6, %v4216_v21 }
 0x6ee   : > { %v3454_v24 = vpop.f32.mrb[36].mxu0 }
 0x6ef   : > { %v4489_v55 = vpop.f32.mrb[37].mxu0 }
 0x6f0   : > { %v3457_v46 = vpop.f32.mrb[38].mxu0 }
 0x6f1   : > { %v4845_v56 = vpack.i.bf16 %v3457_v46, %v3454_v24  ;;  %v4490_v47 = vpop.f32.mrb[39].mxu0 }
 0x6f3   : > { %4846 = vrot.lane.b32.xlu1 %v4845_v56, %s5166_s13 }
 0x6f7   : > { %4851 = vrot.lane.b32.xlu1 %v4850_v8, %s5167_s14  ;;  %v3595_v62 = vpop.f32.mrb[36].mxu1 }
 0x6f8   : > { %v4507_v14 = vpop.f32.mrb[37].mxu1 }
 0x6f9   : > { %v3598_v29 = vpop.f32.mrb[38].mxu1  ;;  %v4842_v8 = vpop.permute.xlu0 %4841 }
 0x6fa   : > { %v4855_v36 = vpack.i.bf16 %v3598_v29, %v3595_v62  ;;  %v4508_v9 = vpop.f32.mrb[39].mxu1  ;;  %v4844_v41 = vunpack.i.h.bf16 %v4842_v8  ;;  %v4843_v26 = vunpack.i.l.bf16 %v4842_v8 }
 0x6fc   : > { %4856 = vrot.lane.b32.xlu0 %v4855_v36, %s5165_s15  ;;  %v3983_v40 = vsel %vm356_vm1, %v6529_v52, %v4844_v41  ;;  %v3982_v12 = vsel %vm356_vm1, %v6527_v16, %v4843_v26 }
 0x727   : > { %v6552_v13 = vpop.f32.mrb[40].mxu0 }
 0x728   : > { %v4501_v2 = vpop.f32.mrb[41].mxu0 }
 0x729   : > { %v6554_v3 = vpop.f32.mrb[42].mxu0 }
 0x72a   : > { %v4502_v5 = vpop.f32.mrb[43].mxu0 }
 0x72b   : > { %v3689_v43 = vpop.f32.mrb[40].mxu1 }
 0x72c   : > { %v4519_v59 = vpop.f32.mrb[41].mxu1 }
 0x72d   : > { %v3692_v33 = vpop.f32.mrb[42].mxu1 }
 0x72e   : > { %v4875_v15 = vpack.i.bf16 %v3692_v33, %v3689_v43  ;;  %v4520_v25 = vpop.f32.mrb[43].mxu1 }
 0x72f   : > { %v3642_v57 = vpop.f32.mrb[44].mxu0 }
 0x730   : > { %v4513_v1 = vpop.f32.mrb[45].mxu0 }
 0x731   : > { %v3645_v6 = vpop.f32.mrb[46].mxu0 }
 0x732   : > { %v4860_v31 = vpack.i.bf16 %v3645_v6, %v3642_v57  ;;  %v4514_v53 = vpop.f32.mrb[47].mxu0 }
 0x733   : > { %v3783_v30 = vpop.f32.mrb[44].mxu1 }
 0x734   : > { %v4531_v11 = vpop.f32.mrb[45].mxu1  ;;  %4861 = vrot.lane.b32.xlu0 %v4860_v31, %s5166_s13 }
 0x735   : > { %v3786_v35 = vpop.f32.mrb[46].mxu1 }
 0x736   : > { %v4865_v49 = vpack.i.bf16 %v3786_v35, %v3783_v30  ;;  %v4532_v32 = vpop.f32.mrb[47].mxu1 }
 0x737   : > { %v6557_v0 = vpop.f32.mrb[48].mxu0 }
 0x738   : > { %4866 = vrot.lane.b32.xlu1 %v4865_v49, %s5165_s15  ;;  %v4525_v50 = vpop.f32.mrb[49].mxu0 }
 0x739   : > { %v3739_v39 = vpop.f32.mrb[50].mxu0 }
 0x73a   : > { %v4526_v38 = vpop.f32.mrb[51].mxu0 }
 0x73b   : > { %v3877_v51 = vpop.f32.mrb[48].mxu1 }
 0x73c   : > { %4876 = vrot.lane.b32.xlu1 %v4875_v15, %s5167_s14  ;;  %v4543_v23 = vpop.f32.mrb[49].mxu1 }
 0x73d   : > { %v3880_v20 = vpop.f32.mrb[50].mxu1 }
 0x73e   : > { %v4880_v44 = vpack.i.bf16 %v3880_v20, %v3877_v51  ;;  %v4544_v7 = vpop.f32.mrb[51].mxu1 }
 0x73f   : > { %v3830_v28 = vpop.f32.mrb[52].mxu0 }
 0x740   : > { %v4537_v22 = vpop.f32.mrb[53].mxu0 }
 0x741   : > { %v3833_v58 = vpop.f32.mrb[54].mxu0 }
 0x742   : > { %v4870_v61 = vpack.i.bf16 %v3833_v58, %v3830_v28  ;;  %v4538_v54 = vpop.f32.mrb[55].mxu0 }
 0x744   : > { %4871 = vrot.lane.b32.xlu0 %v4870_v61, %s5166_s13 }
 0x748   : > { %4881 = vrot.lane.b32.xlu0 %v4880_v44, %s5167_s14 }
 0x765   : > { %v4847_v42 = vpop.permute.xlu1 %4846 }
 0x766   : > { %v4849_v27 = vunpack.i.h.bf16 %v4847_v42  ;;  %v4848_v17 = vunpack.i.l.bf16 %v4847_v42 }
 0x768   : > { %v3991_v18 = vsel %vm2763_vm3, %v3983_v40, %v4849_v27  ;;  %v3990_v4 = vsel %vm2763_vm3, %v3982_v12, %v4848_v17 }
 0x769   : > { %v4852_v37 = vpop.permute.xlu1 %4851 }
 0x76a   : > { %v4854_v63 = vunpack.i.h.bf16 %v4852_v37  ;;  %v4853_v19 = vunpack.i.l.bf16 %v4852_v37 }
 0x76c   : > { %v3999_v48 = vsel %vm3996_vm5, %v3990_v4, %v4853_v19  ;;  %v4000_v45 = vsel %vm3996_vm5, %v3991_v18, %v4854_v63 }
 0x76d   : > { %v4217_v10 = vpack.c.bf16 %v3999_v48, %v3999_v48  ;;  %v4218_v34 = vpack.c.bf16 %v4000_v45, %v4000_v45 }
 0x76e   : > { %v4857_v52 = vpop.permute.xlu0 %4856 }
 0x76f   : > { %4040 = vst.msk [vmem:[%s6541_s20 + $0x8] sm:$0xf] %vm4037_vm6, %v4217_v10  ;;  %4041 = vst.msk [vmem:[%s6541_s20 + $0xc] sm:$0xf] %vm4037_vm6, %v4218_v34  ;;  %v4859_v16 = vunpack.i.h.bf16 %v4857_v52  ;;  %v4858_v24 = vunpack.i.l.bf16 %v4857_v52 }
 0x771   : > { %v3985_v47 = vsel %vm356_vm1, %v6554_v3, %v4859_v16  ;;  %v3984_v62 = vsel %vm356_vm1, %v6552_v13, %v4858_v24 }
 0x7a6   : > { %v4862_v60 = vpop.permute.xlu0 %4861 }
 0x7a7   : > { %v4864_v55 = vunpack.i.h.bf16 %v4862_v60  ;;  %v4863_v46 = vunpack.i.l.bf16 %v4862_v60 }
 0x7a9   : > { %v3993_v36 = vsel %vm2763_vm3, %v3985_v47, %v4864_v55  ;;  %v3992_v9 = vsel %vm2763_vm3, %v3984_v62, %v4863_v46 }
 0x7aa   : > { %v4867_v21 = vpop.permute.xlu1 %4866 }
 0x7ab   : > { %v4869_v33 = vunpack.i.h.bf16 %v4867_v21  ;;  %v4868_v13 = vunpack.i.l.bf16 %v4867_v21 }
 0x7ad   : > { %v3987_v1 = vsel %vm356_vm1, %v3739_v39, %v4869_v33  ;;  %v3986_v6 = vsel %vm356_vm1, %v6557_v0, %v4868_v13 }
 0x7ae   : > { %v4877_v56 = vpop.permute.xlu1 %4876 }
 0x7af   : > { %v4879_v14 = vunpack.i.h.bf16 %v4877_v56  ;;  %v4878_v29 = vunpack.i.l.bf16 %v4877_v56 }
 0x7b1   : > { %v4002_v2 = vsel %vm3996_vm5, %v3993_v36, %v4879_v14  ;;  %v4001_v5 = vsel %vm3996_vm5, %v3992_v9, %v4878_v29 }
 0x7b2   : > { %v4220_v43 = vpack.c.bf16 %v4002_v2, %v4002_v2  ;;  %v4219_v59 = vpack.c.bf16 %v4001_v5, %v4001_v5 }
 0x7b4   : > { %4042 = vst.msk [vmem:[%s6541_s20 + $0x10] sm:$0xf] %vm4037_vm6, %v4219_v59  ;;  %4043 = vst.msk [vmem:[%s6541_s20 + $0x14] sm:$0xf] %vm4037_vm6, %v4220_v43 }
 0x7b6   : > { %v4872_v3 = vpop.permute.xlu0 %4871 }
 0x7b7   : > { %v4874_v15 = vunpack.i.h.bf16 %v4872_v3  ;;  %v4873_v25 = vunpack.i.l.bf16 %v4872_v3 }
 0x7b9   : > { %v3994_v30 = vsel %vm2763_vm3, %v3986_v6, %v4873_v25  ;;  %v3995_v11 = vsel %vm2763_vm3, %v3987_v1, %v4874_v15 }
 0x7ba   : > { %v4882_v57 = vpop.permute.xlu0 %4881 }
 0x7bb   : > { %v4884_v31 = vunpack.i.h.bf16 %v4882_v57  ;;  %v4883_v53 = vunpack.i.l.bf16 %v4882_v57 }
 0x7bd   : > { %v4003_v35 = vsel %vm3996_vm5, %v3994_v30, %v4883_v53  ;;  %v4004_v49 = vsel %vm3996_vm5, %v3995_v11, %v4884_v31 }
 0x7be   : > { %v4221_v32 = vpack.c.bf16 %v4003_v35, %v4003_v35  ;;  %v4222_v50 = vpack.c.bf16 %v4004_v49, %v4004_v49 }
 0x7c0   : > { %4044 = vst.msk [vmem:[%s6541_s20 + $0x18] sm:$0xf] %vm4037_vm6, %v4221_v32  ;;  %4045 = vst.msk [vmem:[%s6541_s20 + $0x1c] sm:$0xf] %vm4037_vm6, %v4222_v50 }
 0x7c1 PF: > { %s15_s18 = sadd.s32 1, %s5149_s18  }
 0x7c2   : > { %p12_p4 = scmp.ge.s32.totalorder %s15_s18, 4  }
 0x7c4   :  { %14 = sbr.rel (!%p12_p4) target bundleno = 1 (0x1), region = 70 }

</bundles_post_ra>
